<compile_context>
chip_gen: v5e
topology: v5e:2x2
jax: 0.10.0
libtpu: 0.0.40
codegen_flags: <defaults>
</compile_context>

<pallas_src>
import jax
import jax.numpy as jnp
from jax.experimental import pallas as pl
from jax.experimental.pallas import tpu as pltpu

EPS = 1e-6
SLOPE = 0.2


# ----------------------------- kernel helpers -----------------------------
def _leaky(x):
    return jnp.where(x > 0, x, SLOPE * x)


def _lsum(x):
    """Reduce over the flattened (batch*point) lane axis; keep channel rows."""
    return jnp.sum(x, axis=1, keepdims=True)


def _bn_act(z, count):
    """Training-mode BatchNorm2d (eps=1e-6, weight=1, bias=0) + LeakyReLU(0.2).

    NOTE: single-pass E[x^2] - E[x]^2 variance; fine for normalized feature
    scales but can cancel if per-channel means are large relative to the std.
    """
    mean = _lsum(z) / count
    msq = _lsum(z * z) / count
    rs = jax.lax.rsqrt(msq - mean * mean + EPS)
    return _leaky((z - mean) * rs)


# --------------------------------- kernel ---------------------------------
def lfa_kernel(feat_ref, idx_ref, wcat_ref, w2t_ref, wmt_ref, out_ref):
    C, M = feat_ref.shape                              # M = B*N
    B, K, N = idx_ref.shape
    D = w2t_ref.shape[0]

    feat = feat_ref[...]                               # [C, M] f32
    idx = idx_ref[...]                                 # [B, K, N] int32

    # --- neighbour-count matrix A[b, j, n] = #{k : neigh_idx[b, n, k] == j} ---
    # Static K-loop of one-hot accumulations: no [B, N, K, N] materialization.
    # (Out-of-range indices contribute nothing; PyTorch's gather would differ.)
    iota_j = jnp.broadcast_to(
        jax.lax.broadcasted_iota(jnp.int32, (1, N, 1), 1), (B, N, N))  # hoisted
    a_cnt = jnp.zeros((B, N, N), jnp.float32)
    for k in range(K):                                 # K small & static -> unrolled
        a_cnt = a_cnt + (iota_j == idx[:, k:k + 1, :]).astype(jnp.float32)
    a_bf = a_cnt.astype(jnp.bfloat16)                  # exact: counts <= K

    # --- multiplicity of each source point j: cnt[b, j] = sum_n A[b, j, n] ---
    # Computed on the MXU (ones-row matmul); bf16 x bf16 -> f32 is exact here.
    ones_row = jnp.ones((1, N), jnp.bfloat16)
    cnt = jnp.concatenate(
        [jax.lax.dot_general(ones_row, a_bf[b],
                             dimension_numbers=(((1,), (1,)), ((), ())),
                             preferred_element_type=jnp.float32)
         for b in range(B)], axis=1)                   # [1, M]

    # --- fused projection of every C_in->* 1x1 conv: rows = [w3 | w_spe | w1] ---
    pcat = jnp.dot(wcat_ref[...], feat, preferred_element_type=jnp.float32)
    z3 = pcat[:D]                                      # LFE.mlp3 pre-activation
    p_g = pcat[D:]                                     # [D+C, M]: SPE.mlp2 | LFE.mlp1

    # --- BN stats of the (virtual) gathered tensors via neighbour multiplicities ---
    psq = p_g * p_g
    sum_w = _lsum(p_g * cnt)                           # neighbour-weighted sums
    ssq_w = _lsum(psq * cnt)
    sum_s = _lsum(p_g)                                 # self term (SPE concat)
    ssq_s = _lsum(psq)

    row = jax.lax.broadcasted_iota(jnp.int32, (D + C, 1), 0)
    is_spe = row < D                                   # rows 0..D-1: SPE (self + K neigh)
    denom = jnp.where(is_spe, jnp.float32(M * (K + 1)), jnp.float32(M * K))
    mean = (sum_w + jnp.where(is_spe, sum_s, 0.0)) / denom
    msq = (ssq_w + jnp.where(is_spe, ssq_s, 0.0)) / denom
    rs = jax.lax.rsqrt(msq - mean * mean + EPS)

    # BN + LeakyReLU commute with the gather once the statistics are fixed.
    acat = _leaky((p_g - mean) * rs)                   # [D+C, M] f32
    acat_bf = acat.astype(jnp.bfloat16)                # MXU feed only

    # --- sum over K neighbours == per-batch matmul against the count matrix ---
    gsum = jnp.concatenate(
        [jnp.dot(acat_bf[:, b * N:(b + 1) * N], a_bf[b],
                 preferred_element_type=jnp.float32)
         for b in range(B)], axis=1)                   # [D+C, M] f32

    spe_out = gsum[:D] + acat[:D]                      # SPE: K neighbours + self
    s1 = gsum[D:]                                      # LFE: sum_k mlp1(gathered)

    # --- remaining 1x1 convs; LFE.mlp2 / mlp3 BN statistics fused in one pass ---
    z2 = jnp.dot(w2t_ref[...], s1, preferred_element_type=jnp.float32)  # [D, M]
    zz = _bn_act(jnp.concatenate([z3, z2], axis=0), jnp.float32(M))     # [2D, M]
    f_agg = spe_out + zz[:D] + zz[D:]                  # SPE + LFE.mlp3 + LFE.mlp2

    zm = jnp.dot(wmt_ref[...], f_agg, preferred_element_type=jnp.float32)
    out_ref[...] = _bn_act(zm, jnp.float32(M))         # [D, M] lane-dense store


# -------------------------------- wrapper ----------------------------------
def lfa_pallas(feature_nchw, neigh_idx, params):
    """feature_nchw: [B, C, N, 1] (PyTorch layout), neigh_idx: [B, N, K] int.

    Returns [B, D_out, N, 1], matching the PyTorch module output.
    """
    B, C, N, _ = feature_nchw.shape
    K = neigh_idx.shape[-1]
    D = params["w_spe"].shape[1]
    M = B * N

    # Tiny wrapper-side layout massaging (<= 16 KiB each): features flattened to
    # [C, B*N] so every weight matmul is an unbatched 2D dot with a 256-lane RHS;
    # neigh_idx to [B, K, N] so each per-k slice is a lane-dense row.
    feat_flat = jnp.transpose(feature_nchw[..., 0], (1, 0, 2)).reshape(C, M)
    idx_t = jnp.transpose(neigh_idx.astype(jnp.int32), (0, 2, 1))

    # Weights pre-transposed to [C_out, C_in]; the three C_in->* convs fused.
    wcat_t = jnp.concatenate(
        [params["w3"].T, params["w_spe"].T, params["w1"].T], axis=0)   # [2D+C, C]
    w2_t = params["w2"].T                              # [D, C]
    wm_t = params["wm"].T                              # [D, D]

    flops = int(
        3 * B * N * N * K                              # one-hot compare/convert/add
        + 2 * B * (D + C + 1) * N * N                  # gsum + cnt matmuls
        + 2 * M * C * (2 * D + C)                      # fused input projection
        + 2 * M * C * D + 2 * M * D * D                # LFE.mlp2, LFA.mlp
        + 16 * M * (2 * D + C))                        # BN / LeakyReLU elementwise
    bytes_accessed = int(4 * (C * M + B * K * N + (2 * D + C) * C
                              + D * C + D * D + D * M))

    # TODO(synk): for large point clouds (N >> 128) this single-invocation design
    # must become a two-pass, N-tiled kernel (BN statistics couple all points):
    # pass 1 accumulates per-tile partial sums / per-tile count-matrix slabs,
    # pass 2 normalizes; that also yields a 'parallel' grid axis so v7x's second
    # TensorCore (and its 64 MiB VMEM budget) is actually used.
    out = pl.pallas_call(
        lfa_kernel,
        out_shape=jax.ShapeDtypeStruct((D, M), jnp.float32),
        grid=(1,),
        in_specs=[
            pl.BlockSpec((C, M), lambda i: (0, 0)),
            pl.BlockSpec((B, K, N), lambda i: (0, 0, 0)),
            pl.BlockSpec((2 * D + C, C), lambda i: (0, 0)),
            pl.BlockSpec((D, C), lambda i: (0, 0)),
            pl.BlockSpec((D, D), lambda i: (0, 0)),
        ],
        out_specs=pl.BlockSpec((D, M), lambda i: (0, 0)),
        compiler_params=pltpu.CompilerParams(
            dimension_semantics=("arbitrary",),
            vmem_limit_bytes=32 * 1024 * 1024),
        cost_estimate=pl.CostEstimate(
            flops=flops, transcendentals=4 * D + C,
            bytes_accessed=bytes_accessed),
    )(feat_flat, idx_t, wcat_t, w2_t, wm_t)

    # [D, B*N] -> [B, D, N, 1]  (32 KiB; plain XLA reshuffle outside the kernel)
    return jnp.transpose(out.reshape(D, B, N), (1, 0, 2))[..., None]


# ---------------- pure-JAX reference (mirrors the PyTorch forward) ----------------
def _conv_bn_act_ref(x, w):
    z = jnp.einsum("...i,io->...o", x, w)
    flat = z.reshape(-1, z.shape[-1])
    mean = jnp.mean(flat, axis=0)
    var = jnp.mean(jnp.square(flat - mean), axis=0)
    zn = (z - mean) / jnp.sqrt(var + EPS)
    return jnp.where(zn > 0, zn, SLOPE * zn)


def lfa_reference(feature_nchw, neigh_idx, params):
    feat_bnc = jnp.transpose(feature_nchw[..., 0], (0, 2, 1))       # [B, N, C]
    gathered = jax.vmap(lambda f, i: f[i])(feat_bnc, neigh_idx)     # [B, N, K, C]

    # SPE
    x_spe = jnp.concatenate([feat_bnc[:, :, None, :], gathered], axis=2)
    spe = jnp.sum(_conv_bn_act_ref(x_spe, params["w_spe"]), axis=2)

    # LFE
    a1 = _conv_bn_act_ref(gathered, params["w1"])
    s1 = jnp.sum(a1, axis=2)
    f_n = _conv_bn_act_ref(s1, params["w2"])
    f_f = _conv_bn_act_ref(feat_bnc, params["w3"])
    lfe = f_n + f_f

    out = _conv_bn_act_ref(spe + lfe, params["wm"])                 # [B, N, D]
    return jnp.transpose(out, (0, 2, 1))[..., None]


def make_params(key, d_in, d_out):
    # Kaiming-normal-like init (fan_in, gain=sqrt(2)), deterministic.
    ks = jax.random.split(key, 5)

    def kai(k, cin, cout):
        std = (2.0 / cin) ** 0.5
        return jax.random.normal(k, (cin, cout), dtype=jnp.float32) * std

    return {
        "w_spe": kai(ks[0], d_in, d_out),   # SPE.mlp2
        "w1":    kai(ks[1], d_in, d_in),    # LFE.mlp1
        "w2":    kai(ks[2], d_in, d_out),   # LFE.mlp2
        "w3":    kai(ks[3], d_in, d_out),   # LFE.mlp3
        "wm":    kai(ks[4], d_out, d_out),  # LFA.mlp
    }


if __name__ == "__main__":
    B, C_IN, D_OUT, N, K = 2, 4, 32, 128, 16

    key = jax.random.PRNGKey(0)
    k_feat, k_idx, k_par = jax.random.split(key, 3)

    feature = jax.random.normal(k_feat, (B, C_IN, N, 1), dtype=jnp.float32)
    neigh_idx = jax.random.randint(k_idx, (B, N, K), 0, N, dtype=jnp.int32)
    params = make_params(k_par, C_IN, D_OUT)

    out = jax.block_until_ready(lfa_pallas(feature, neigh_idx, params))
    ref = jax.block_until_ready(lfa_reference(feature, neigh_idx, params))

    assert out.shape == (B, D_OUT, N, 1), out.shape
    max_err = float(jnp.max(jnp.abs(out - ref)))
    # Tolerance reflects bf16 MXU operands on the neighbour-sum path (f32 accum).
    assert jnp.allclose(out, ref, rtol=2e-2, atol=2e-2), max_err

    print("KERNEL_OK")
</pallas_src>

<mosaic_0001>
module attributes {stable_mosaic.version = 11 : i64} {
  func.func @lfa_kernel(%arg0: i32, %arg1: memref<4x256xf32, #tpu.memory_space<vmem>>, %arg2: memref<2x16x128xi32, #tpu.memory_space<vmem>>, %arg3: memref<68x4xf32, #tpu.memory_space<vmem>>, %arg4: memref<32x4xf32, #tpu.memory_space<vmem>>, %arg5: memref<32x32xf32, #tpu.memory_space<vmem>>, %arg6: memref<32x256xf32, #tpu.memory_space<vmem>>) attributes {dimension_semantics = [#tpu.dimension_semantics<arbitrary>], iteration_bounds = array<i64: 1>, scalar_prefetch = 0 : i64, scratch_operands = 0 : i64, tpu.core_type = #tpu.core_type<tc>, window_params = [{pipeline_mode = #tpu.pipeline_mode<synchronous>, transform_indices = @transform_0, window_bounds = array<i64: 4, 256>}, {pipeline_mode = #tpu.pipeline_mode<synchronous>, transform_indices = @transform_1, window_bounds = array<i64: 2, 16, 128>}, {pipeline_mode = #tpu.pipeline_mode<synchronous>, transform_indices = @transform_2, window_bounds = array<i64: 68, 4>}, {pipeline_mode = #tpu.pipeline_mode<synchronous>, transform_indices = @transform_3, window_bounds = array<i64: 32, 4>}, {pipeline_mode = #tpu.pipeline_mode<synchronous>, transform_indices = @transform_4, window_bounds = array<i64: 32, 32>}, {pipeline_mode = #tpu.pipeline_mode<synchronous>, transform_indices = @transform_5, window_bounds = array<i64: 32, 256>}]} {
    %c0 = arith.constant 0 : index
    %c0_0 = arith.constant 0 : index
    %0 = vector.load %arg1[%c0, %c0_0] : memref<4x256xf32, #tpu.memory_space<vmem>>, vector<4x256xf32>
    %c0_1 = arith.constant 0 : index
    %c0_2 = arith.constant 0 : index
    %c0_3 = arith.constant 0 : index
    %1 = vector.load %arg2[%c0_1, %c0_2, %c0_3] : memref<2x16x128xi32, #tpu.memory_space<vmem>>, vector<2x16x128xi32>
    %2 = tpu.iota {dimensions = array<i32: 1>} : vector<1x128x1xi32>
    %3 = vector.shape_cast %2 : vector<1x128x1xi32> to vector<1x128x1xi32>
    %4 = vector.broadcast %3 : vector<1x128x1xi32> to vector<2x128x128xi32>
    %cst = arith.constant 0.000000e+00 : f32
    %5 = vector.broadcast %cst : f32 to vector<2x128x128xf32>
    %6 = vector.extract_strided_slice %1 {offsets = [0, 0, 0], sizes = [2, 1, 128], strides = [1, 1, 1]} : vector<2x16x128xi32> to vector<2x1x128xi32>
    %7 = vector.broadcast %6 : vector<2x1x128xi32> to vector<2x128x128xi32>
    %8 = arith.cmpi eq, %4, %7 : vector<2x128x128xi32>
    %9 = arith.extui %8 : vector<2x128x128xi1> to vector<2x128x128xi32>
    %10 = arith.sitofp %9 : vector<2x128x128xi32> to vector<2x128x128xf32>
    %11 = arith.addf %5, %10 : vector<2x128x128xf32>
    %12 = vector.extract_strided_slice %1 {offsets = [0, 1, 0], sizes = [2, 1, 128], strides = [1, 1, 1]} : vector<2x16x128xi32> to vector<2x1x128xi32>
    %13 = vector.broadcast %12 : vector<2x1x128xi32> to vector<2x128x128xi32>
    %14 = arith.cmpi eq, %4, %13 : vector<2x128x128xi32>
    %15 = arith.extui %14 : vector<2x128x128xi1> to vector<2x128x128xi32>
    %16 = arith.sitofp %15 : vector<2x128x128xi32> to vector<2x128x128xf32>
    %17 = arith.addf %11, %16 : vector<2x128x128xf32>
    %18 = vector.extract_strided_slice %1 {offsets = [0, 2, 0], sizes = [2, 1, 128], strides = [1, 1, 1]} : vector<2x16x128xi32> to vector<2x1x128xi32>
    %19 = vector.broadcast %18 : vector<2x1x128xi32> to vector<2x128x128xi32>
    %20 = arith.cmpi eq, %4, %19 : vector<2x128x128xi32>
    %21 = arith.extui %20 : vector<2x128x128xi1> to vector<2x128x128xi32>
    %22 = arith.sitofp %21 : vector<2x128x128xi32> to vector<2x128x128xf32>
    %23 = arith.addf %17, %22 : vector<2x128x128xf32>
    %24 = vector.extract_strided_slice %1 {offsets = [0, 3, 0], sizes = [2, 1, 128], strides = [1, 1, 1]} : vector<2x16x128xi32> to vector<2x1x128xi32>
    %25 = vector.broadcast %24 : vector<2x1x128xi32> to vector<2x128x128xi32>
    %26 = arith.cmpi eq, %4, %25 : vector<2x128x128xi32>
    %27 = arith.extui %26 : vector<2x128x128xi1> to vector<2x128x128xi32>
    %28 = arith.sitofp %27 : vector<2x128x128xi32> to vector<2x128x128xf32>
    %29 = arith.addf %23, %28 : vector<2x128x128xf32>
    %30 = vector.extract_strided_slice %1 {offsets = [0, 4, 0], sizes = [2, 1, 128], strides = [1, 1, 1]} : vector<2x16x128xi32> to vector<2x1x128xi32>
    %31 = vector.broadcast %30 : vector<2x1x128xi32> to vector<2x128x128xi32>
    %32 = arith.cmpi eq, %4, %31 : vector<2x128x128xi32>
    %33 = arith.extui %32 : vector<2x128x128xi1> to vector<2x128x128xi32>
    %34 = arith.sitofp %33 : vector<2x128x128xi32> to vector<2x128x128xf32>
    %35 = arith.addf %29, %34 : vector<2x128x128xf32>
    %36 = vector.extract_strided_slice %1 {offsets = [0, 5, 0], sizes = [2, 1, 128], strides = [1, 1, 1]} : vector<2x16x128xi32> to vector<2x1x128xi32>
    %37 = vector.broadcast %36 : vector<2x1x128xi32> to vector<2x128x128xi32>
    %38 = arith.cmpi eq, %4, %37 : vector<2x128x128xi32>
    %39 = arith.extui %38 : vector<2x128x128xi1> to vector<2x128x128xi32>
    %40 = arith.sitofp %39 : vector<2x128x128xi32> to vector<2x128x128xf32>
    %41 = arith.addf %35, %40 : vector<2x128x128xf32>
    %42 = vector.extract_strided_slice %1 {offsets = [0, 6, 0], sizes = [2, 1, 128], strides = [1, 1, 1]} : vector<2x16x128xi32> to vector<2x1x128xi32>
    %43 = vector.broadcast %42 : vector<2x1x128xi32> to vector<2x128x128xi32>
    %44 = arith.cmpi eq, %4, %43 : vector<2x128x128xi32>
    %45 = arith.extui %44 : vector<2x128x128xi1> to vector<2x128x128xi32>
    %46 = arith.sitofp %45 : vector<2x128x128xi32> to vector<2x128x128xf32>
    %47 = arith.addf %41, %46 : vector<2x128x128xf32>
    %48 = vector.extract_strided_slice %1 {offsets = [0, 7, 0], sizes = [2, 1, 128], strides = [1, 1, 1]} : vector<2x16x128xi32> to vector<2x1x128xi32>
    %49 = vector.broadcast %48 : vector<2x1x128xi32> to vector<2x128x128xi32>
    %50 = arith.cmpi eq, %4, %49 : vector<2x128x128xi32>
    %51 = arith.extui %50 : vector<2x128x128xi1> to vector<2x128x128xi32>
    %52 = arith.sitofp %51 : vector<2x128x128xi32> to vector<2x128x128xf32>
    %53 = arith.addf %47, %52 : vector<2x128x128xf32>
    %54 = vector.extract_strided_slice %1 {offsets = [0, 8, 0], sizes = [2, 1, 128], strides = [1, 1, 1]} : vector<2x16x128xi32> to vector<2x1x128xi32>
    %55 = vector.broadcast %54 : vector<2x1x128xi32> to vector<2x128x128xi32>
    %56 = arith.cmpi eq, %4, %55 : vector<2x128x128xi32>
    %57 = arith.extui %56 : vector<2x128x128xi1> to vector<2x128x128xi32>
    %58 = arith.sitofp %57 : vector<2x128x128xi32> to vector<2x128x128xf32>
    %59 = arith.addf %53, %58 : vector<2x128x128xf32>
    %60 = vector.extract_strided_slice %1 {offsets = [0, 9, 0], sizes = [2, 1, 128], strides = [1, 1, 1]} : vector<2x16x128xi32> to vector<2x1x128xi32>
    %61 = vector.broadcast %60 : vector<2x1x128xi32> to vector<2x128x128xi32>
    %62 = arith.cmpi eq, %4, %61 : vector<2x128x128xi32>
    %63 = arith.extui %62 : vector<2x128x128xi1> to vector<2x128x128xi32>
    %64 = arith.sitofp %63 : vector<2x128x128xi32> to vector<2x128x128xf32>
    %65 = arith.addf %59, %64 : vector<2x128x128xf32>
    %66 = vector.extract_strided_slice %1 {offsets = [0, 10, 0], sizes = [2, 1, 128], strides = [1, 1, 1]} : vector<2x16x128xi32> to vector<2x1x128xi32>
    %67 = vector.broadcast %66 : vector<2x1x128xi32> to vector<2x128x128xi32>
    %68 = arith.cmpi eq, %4, %67 : vector<2x128x128xi32>
    %69 = arith.extui %68 : vector<2x128x128xi1> to vector<2x128x128xi32>
    %70 = arith.sitofp %69 : vector<2x128x128xi32> to vector<2x128x128xf32>
    %71 = arith.addf %65, %70 : vector<2x128x128xf32>
    %72 = vector.extract_strided_slice %1 {offsets = [0, 11, 0], sizes = [2, 1, 128], strides = [1, 1, 1]} : vector<2x16x128xi32> to vector<2x1x128xi32>
    %73 = vector.broadcast %72 : vector<2x1x128xi32> to vector<2x128x128xi32>
    %74 = arith.cmpi eq, %4, %73 : vector<2x128x128xi32>
    %75 = arith.extui %74 : vector<2x128x128xi1> to vector<2x128x128xi32>
    %76 = arith.sitofp %75 : vector<2x128x128xi32> to vector<2x128x128xf32>
    %77 = arith.addf %71, %76 : vector<2x128x128xf32>
    %78 = vector.extract_strided_slice %1 {offsets = [0, 12, 0], sizes = [2, 1, 128], strides = [1, 1, 1]} : vector<2x16x128xi32> to vector<2x1x128xi32>
    %79 = vector.broadcast %78 : vector<2x1x128xi32> to vector<2x128x128xi32>
    %80 = arith.cmpi eq, %4, %79 : vector<2x128x128xi32>
    %81 = arith.extui %80 : vector<2x128x128xi1> to vector<2x128x128xi32>
    %82 = arith.sitofp %81 : vector<2x128x128xi32> to vector<2x128x128xf32>
    %83 = arith.addf %77, %82 : vector<2x128x128xf32>
    %84 = vector.extract_strided_slice %1 {offsets = [0, 13, 0], sizes = [2, 1, 128], strides = [1, 1, 1]} : vector<2x16x128xi32> to vector<2x1x128xi32>
    %85 = vector.broadcast %84 : vector<2x1x128xi32> to vector<2x128x128xi32>
    %86 = arith.cmpi eq, %4, %85 : vector<2x128x128xi32>
    %87 = arith.extui %86 : vector<2x128x128xi1> to vector<2x128x128xi32>
    %88 = arith.sitofp %87 : vector<2x128x128xi32> to vector<2x128x128xf32>
    %89 = arith.addf %83, %88 : vector<2x128x128xf32>
    %90 = vector.extract_strided_slice %1 {offsets = [0, 14, 0], sizes = [2, 1, 128], strides = [1, 1, 1]} : vector<2x16x128xi32> to vector<2x1x128xi32>
    %91 = vector.broadcast %90 : vector<2x1x128xi32> to vector<2x128x128xi32>
    %92 = arith.cmpi eq, %4, %91 : vector<2x128x128xi32>
    %93 = arith.extui %92 : vector<2x128x128xi1> to vector<2x128x128xi32>
    %94 = arith.sitofp %93 : vector<2x128x128xi32> to vector<2x128x128xf32>
    %95 = arith.addf %89, %94 : vector<2x128x128xf32>
    %96 = vector.extract_strided_slice %1 {offsets = [0, 15, 0], sizes = [2, 1, 128], strides = [1, 1, 1]} : vector<2x16x128xi32> to vector<2x1x128xi32>
    %97 = vector.broadcast %96 : vector<2x1x128xi32> to vector<2x128x128xi32>
    %98 = arith.cmpi eq, %4, %97 : vector<2x128x128xi32>
    %99 = arith.extui %98 : vector<2x128x128xi1> to vector<2x128x128xi32>
    %100 = arith.sitofp %99 : vector<2x128x128xi32> to vector<2x128x128xf32>
    %101 = arith.addf %95, %100 : vector<2x128x128xf32>
    %102 = arith.truncf %101 : vector<2x128x128xf32> to vector<2x128x128xbf16>
    %cst_4 = arith.constant 1.000000e+00 : bf16
    %103 = vector.broadcast %cst_4 : bf16 to vector<1x128xbf16>
    %104 = vector.extract_strided_slice %102 {offsets = [0, 0, 0], sizes = [1, 128, 128], strides = [1, 1, 1]} : vector<2x128x128xbf16> to vector<1x128x128xbf16>
    %105 = vector.shape_cast %104 : vector<1x128x128xbf16> to vector<128x128xbf16>
    %cst_5 = arith.constant dense<0.000000e+00> : vector<1x128xf32>
    %106 = tpu.matmul %103, %105, %cst_5 {dimension_numbers = #tpu.dot_dimension_numbers<[1], [1], [0], [0], [0, 0, 1, 0], [], []>} : vector<1x128xbf16>, vector<128x128xbf16>, vector<1x128xf32> -> vector<1x128xf32>
    %107 = vector.extract_strided_slice %102 {offsets = [1, 0, 0], sizes = [1, 128, 128], strides = [1, 1, 1]} : vector<2x128x128xbf16> to vector<1x128x128xbf16>
    %108 = vector.shape_cast %107 : vector<1x128x128xbf16> to vector<128x128xbf16>
    %cst_6 = arith.constant dense<0.000000e+00> : vector<1x128xf32>
    %109 = tpu.matmul %103, %108, %cst_6 {dimension_numbers = #tpu.dot_dimension_numbers<[1], [1], [0], [0], [0, 0, 1, 0], [], []>} : vector<1x128xbf16>, vector<128x128xbf16>, vector<1x128xf32> -> vector<1x128xf32>
    %110 = tpu.concatenate %106, %109 in 1 : vector<1x128xf32>, vector<1x128xf32> -> vector<1x256xf32>
    %c0_7 = arith.constant 0 : index
    %c0_8 = arith.constant 0 : index
    %111 = vector.load %arg3[%c0_7, %c0_8] : memref<68x4xf32, #tpu.memory_space<vmem>>, vector<68x4xf32>
    %cst_9 = arith.constant dense<0.000000e+00> : vector<68x256xf32>
    %112 = tpu.matmul %111, %0, %cst_9 {dimension_numbers = #tpu.dot_dimension_numbers<[1], [0], [0], [1], [0, 0, 1, 1], [], []>} : vector<68x4xf32>, vector<4x256xf32>, vector<68x256xf32> -> vector<68x256xf32>
    %113 = vector.extract_strided_slice %112 {offsets = [0, 0], sizes = [32, 256], strides = [1, 1]} : vector<68x256xf32> to vector<32x256xf32>
    %114 = vector.extract_strided_slice %112 {offsets = [32, 0], sizes = [36, 256], strides = [1, 1]} : vector<68x256xf32> to vector<36x256xf32>
    %115 = arith.mulf %114, %114 : vector<36x256xf32>
    %116 = vector.broadcast %110 : vector<1x256xf32> to vector<36x256xf32>
    %117 = arith.mulf %114, %116 : vector<36x256xf32>
    %cst_10 = arith.constant dense<0.000000e+00> : vector<36xf32>
    %118 = vector.multi_reduction <add>, %117, %cst_10 [1] : vector<36x256xf32> to vector<36xf32>
    %119 = vector.shape_cast %118 : vector<36xf32> to vector<36x1xf32>
    %120 = vector.broadcast %110 : vector<1x256xf32> to vector<36x256xf32>
    %121 = arith.mulf %115, %120 : vector<36x256xf32>
    %cst_11 = arith.constant dense<0.000000e+00> : vector<36xf32>
    %122 = vector.multi_reduction <add>, %121, %cst_11 [1] : vector<36x256xf32> to vector<36xf32>
    %123 = vector.shape_cast %122 : vector<36xf32> to vector<36x1xf32>
    %cst_12 = arith.constant dense<0.000000e+00> : vector<36xf32>
    %124 = vector.multi_reduction <add>, %114, %cst_12 [1] : vector<36x256xf32> to vector<36xf32>
    %125 = vector.shape_cast %124 : vector<36xf32> to vector<36x1xf32>
    %cst_13 = arith.constant dense<0.000000e+00> : vector<36xf32>
    %126 = vector.multi_reduction <add>, %115, %cst_13 [1] : vector<36x256xf32> to vector<36xf32>
    %127 = vector.shape_cast %126 : vector<36xf32> to vector<36x1xf32>
    %128 = tpu.iota {dimensions = array<i32: 0>} : vector<36x1xi32>
    %c32_i32 = arith.constant 32 : i32
    %129 = vector.broadcast %c32_i32 : i32 to vector<36x1xi32>
    %130 = arith.cmpi slt, %128, %129 : vector<36x1xi32>
    %cst_14 = arith.constant 4.352000e+03 : f32
    %cst_15 = arith.constant 4.096000e+03 : f32
    %131 = vector.broadcast %cst_14 : f32 to vector<36x1xf32>
    %132 = vector.broadcast %cst_15 : f32 to vector<36x1xf32>
    %133 = arith.select %130, %131, %132 : vector<36x1xi1>, vector<36x1xf32>
    %cst_16 = arith.constant 0.000000e+00 : f32
    %134 = vector.broadcast %cst_16 : f32 to vector<36x1xf32>
    %135 = arith.select %130, %125, %134 : vector<36x1xi1>, vector<36x1xf32>
    %136 = arith.addf %119, %135 : vector<36x1xf32>
    %137 = arith.divf %136, %133 : vector<36x1xf32>
    %cst_17 = arith.constant 0.000000e+00 : f32
    %138 = vector.broadcast %cst_17 : f32 to vector<36x1xf32>
    %139 = arith.select %130, %127, %138 : vector<36x1xi1>, vector<36x1xf32>
    %140 = arith.addf %123, %139 : vector<36x1xf32>
    %141 = arith.divf %140, %133 : vector<36x1xf32>
    %142 = arith.mulf %137, %137 : vector<36x1xf32>
    %143 = arith.subf %141, %142 : vector<36x1xf32>
    %cst_18 = arith.constant 9.99999997E-7 : f32
    %144 = vector.broadcast %cst_18 : f32 to vector<36x1xf32>
    %145 = arith.addf %143, %144 : vector<36x1xf32>
    %146 = math.rsqrt %145 : vector<36x1xf32>
    %147 = vector.broadcast %137 : vector<36x1xf32> to vector<36x256xf32>
    %148 = arith.subf %114, %147 : vector<36x256xf32>
    %149 = vector.broadcast %146 : vector<36x1xf32> to vector<36x256xf32>
    %150 = arith.mulf %148, %149 : vector<36x256xf32>
    %cst_19 = arith.constant 0.000000e+00 : f32
    %151 = vector.broadcast %cst_19 : f32 to vector<36x256xf32>
    %152 = arith.cmpf ogt, %150, %151 : vector<36x256xf32>
    %cst_20 = arith.constant 2.000000e-01 : f32
    %153 = vector.broadcast %cst_20 : f32 to vector<36x256xf32>
    %154 = arith.mulf %153, %150 : vector<36x256xf32>
    %155 = arith.select %152, %150, %154 : vector<36x256xi1>, vector<36x256xf32>
    %156 = arith.truncf %155 : vector<36x256xf32> to vector<36x256xbf16>
    %157 = vector.extract_strided_slice %156 {offsets = [0, 0], sizes = [36, 128], strides = [1, 1]} : vector<36x256xbf16> to vector<36x128xbf16>
    %158 = vector.extract_strided_slice %102 {offsets = [0, 0, 0], sizes = [1, 128, 128], strides = [1, 1, 1]} : vector<2x128x128xbf16> to vector<1x128x128xbf16>
    %159 = vector.shape_cast %158 : vector<1x128x128xbf16> to vector<128x128xbf16>
    %cst_21 = arith.constant dense<0.000000e+00> : vector<36x128xf32>
    %160 = tpu.matmul %157, %159, %cst_21 {dimension_numbers = #tpu.dot_dimension_numbers<[1], [0], [0], [1], [0, 0, 1, 1], [], []>} : vector<36x128xbf16>, vector<128x128xbf16>, vector<36x128xf32> -> vector<36x128xf32>
    %161 = vector.extract_strided_slice %156 {offsets = [0, 128], sizes = [36, 128], strides = [1, 1]} : vector<36x256xbf16> to vector<36x128xbf16>
    %162 = vector.extract_strided_slice %102 {offsets = [1, 0, 0], sizes = [1, 128, 128], strides = [1, 1, 1]} : vector<2x128x128xbf16> to vector<1x128x128xbf16>
    %163 = vector.shape_cast %162 : vector<1x128x128xbf16> to vector<128x128xbf16>
    %cst_22 = arith.constant dense<0.000000e+00> : vector<36x128xf32>
    %164 = tpu.matmul %161, %163, %cst_22 {dimension_numbers = #tpu.dot_dimension_numbers<[1], [0], [0], [1], [0, 0, 1, 1], [], []>} : vector<36x128xbf16>, vector<128x128xbf16>, vector<36x128xf32> -> vector<36x128xf32>
    %165 = tpu.concatenate %160, %164 in 1 : vector<36x128xf32>, vector<36x128xf32> -> vector<36x256xf32>
    %166 = vector.extract_strided_slice %165 {offsets = [0, 0], sizes = [32, 256], strides = [1, 1]} : vector<36x256xf32> to vector<32x256xf32>
    %167 = vector.extract_strided_slice %155 {offsets = [0, 0], sizes = [32, 256], strides = [1, 1]} : vector<36x256xf32> to vector<32x256xf32>
    %168 = arith.addf %166, %167 : vector<32x256xf32>
    %169 = vector.extract_strided_slice %165 {offsets = [32, 0], sizes = [4, 256], strides = [1, 1]} : vector<36x256xf32> to vector<4x256xf32>
    %c0_23 = arith.constant 0 : index
    %c0_24 = arith.constant 0 : index
    %170 = vector.load %arg4[%c0_23, %c0_24] : memref<32x4xf32, #tpu.memory_space<vmem>>, vector<32x4xf32>
    %cst_25 = arith.constant dense<0.000000e+00> : vector<32x256xf32>
    %171 = tpu.matmul %170, %169, %cst_25 {dimension_numbers = #tpu.dot_dimension_numbers<[1], [0], [0], [1], [0, 0, 1, 1], [], []>} : vector<32x4xf32>, vector<4x256xf32>, vector<32x256xf32> -> vector<32x256xf32>
    %172 = tpu.concatenate %113, %171 in 0 : vector<32x256xf32>, vector<32x256xf32> -> vector<64x256xf32>
    %cst_26 = arith.constant dense<0.000000e+00> : vector<64xf32>
    %173 = vector.multi_reduction <add>, %172, %cst_26 [1] : vector<64x256xf32> to vector<64xf32>
    %174 = vector.shape_cast %173 : vector<64xf32> to vector<64x1xf32>
    %cst_27 = arith.constant 2.560000e+02 : f32
    %175 = vector.broadcast %cst_27 : f32 to vector<64x1xf32>
    %176 = arith.divf %174, %175 : vector<64x1xf32>
    %177 = arith.mulf %172, %172 : vector<64x256xf32>
    %cst_28 = arith.constant dense<0.000000e+00> : vector<64xf32>
    %178 = vector.multi_reduction <add>, %177, %cst_28 [1] : vector<64x256xf32> to vector<64xf32>
    %179 = vector.shape_cast %178 : vector<64xf32> to vector<64x1xf32>
    %cst_29 = arith.constant 2.560000e+02 : f32
    %180 = vector.broadcast %cst_29 : f32 to vector<64x1xf32>
    %181 = arith.divf %179, %180 : vector<64x1xf32>
    %182 = arith.mulf %176, %176 : vector<64x1xf32>
    %183 = arith.subf %181, %182 : vector<64x1xf32>
    %cst_30 = arith.constant 9.99999997E-7 : f32
    %184 = vector.broadcast %cst_30 : f32 to vector<64x1xf32>
    %185 = arith.addf %183, %184 : vector<64x1xf32>
    %186 = math.rsqrt %185 : vector<64x1xf32>
    %187 = vector.broadcast %176 : vector<64x1xf32> to vector<64x256xf32>
    %188 = arith.subf %172, %187 : vector<64x256xf32>
    %189 = vector.broadcast %186 : vector<64x1xf32> to vector<64x256xf32>
    %190 = arith.mulf %188, %189 : vector<64x256xf32>
    %cst_31 = arith.constant 0.000000e+00 : f32
    %191 = vector.broadcast %cst_31 : f32 to vector<64x256xf32>
    %192 = arith.cmpf ogt, %190, %191 : vector<64x256xf32>
    %cst_32 = arith.constant 2.000000e-01 : f32
    %193 = vector.broadcast %cst_32 : f32 to vector<64x256xf32>
    %194 = arith.mulf %193, %190 : vector<64x256xf32>
    %195 = arith.select %192, %190, %194 : vector<64x256xi1>, vector<64x256xf32>
    %196 = vector.extract_strided_slice %195 {offsets = [0, 0], sizes = [32, 256], strides = [1, 1]} : vector<64x256xf32> to vector<32x256xf32>
    %197 = arith.addf %168, %196 : vector<32x256xf32>
    %198 = vector.extract_strided_slice %195 {offsets = [32, 0], sizes = [32, 256], strides = [1, 1]} : vector<64x256xf32> to vector<32x256xf32>
    %199 = arith.addf %197, %198 : vector<32x256xf32>
    %c0_33 = arith.constant 0 : index
    %c0_34 = arith.constant 0 : index
    %200 = vector.load %arg5[%c0_33, %c0_34] : memref<32x32xf32, #tpu.memory_space<vmem>>, vector<32x32xf32>
    %cst_35 = arith.constant dense<0.000000e+00> : vector<32x256xf32>
    %201 = tpu.matmul %200, %199, %cst_35 {dimension_numbers = #tpu.dot_dimension_numbers<[1], [0], [0], [1], [0, 0, 1, 1], [], []>} : vector<32x32xf32>, vector<32x256xf32>, vector<32x256xf32> -> vector<32x256xf32>
    %cst_36 = arith.constant dense<0.000000e+00> : vector<32xf32>
    %202 = vector.multi_reduction <add>, %201, %cst_36 [1] : vector<32x256xf32> to vector<32xf32>
    %203 = vector.shape_cast %202 : vector<32xf32> to vector<32x1xf32>
    %cst_37 = arith.constant 2.560000e+02 : f32
    %204 = vector.broadcast %cst_37 : f32 to vector<32x1xf32>
    %205 = arith.divf %203, %204 : vector<32x1xf32>
    %206 = arith.mulf %201, %201 : vector<32x256xf32>
    %cst_38 = arith.constant dense<0.000000e+00> : vector<32xf32>
    %207 = vector.multi_reduction <add>, %206, %cst_38 [1] : vector<32x256xf32> to vector<32xf32>
    %208 = vector.shape_cast %207 : vector<32xf32> to vector<32x1xf32>
    %cst_39 = arith.constant 2.560000e+02 : f32
    %209 = vector.broadcast %cst_39 : f32 to vector<32x1xf32>
    %210 = arith.divf %208, %209 : vector<32x1xf32>
    %211 = arith.mulf %205, %205 : vector<32x1xf32>
    %212 = arith.subf %210, %211 : vector<32x1xf32>
    %cst_40 = arith.constant 9.99999997E-7 : f32
    %213 = vector.broadcast %cst_40 : f32 to vector<32x1xf32>
    %214 = arith.addf %212, %213 : vector<32x1xf32>
    %215 = math.rsqrt %214 : vector<32x1xf32>
    %216 = vector.broadcast %205 : vector<32x1xf32> to vector<32x256xf32>
    %217 = arith.subf %201, %216 : vector<32x256xf32>
    %218 = vector.broadcast %215 : vector<32x1xf32> to vector<32x256xf32>
    %219 = arith.mulf %217, %218 : vector<32x256xf32>
    %cst_41 = arith.constant 0.000000e+00 : f32
    %220 = vector.broadcast %cst_41 : f32 to vector<32x256xf32>
    %221 = arith.cmpf ogt, %219, %220 : vector<32x256xf32>
    %cst_42 = arith.constant 2.000000e-01 : f32
    %222 = vector.broadcast %cst_42 : f32 to vector<32x256xf32>
    %223 = arith.mulf %222, %219 : vector<32x256xf32>
    %224 = arith.select %221, %219, %223 : vector<32x256xi1>, vector<32x256xf32>
    %c0_43 = arith.constant 0 : index
    %c0_44 = arith.constant 0 : index
    %225 = vector.load %arg6[%c0_43, %c0_44] : memref<32x256xf32, #tpu.memory_space<vmem>>, vector<32x256xf32>
    tpu.vector_store %arg6[%c0_43, %c0_44], %224 {strides = array<i32>} : memref<32x256xf32, #tpu.memory_space<vmem>>, vector<32x256xf32>,
    return
  }
  func.func @transform_0(%arg0: i32) -> (i32, i32) {
    %c0_i32 = arith.constant 0 : i32
    %c0_i32_0 = arith.constant 0 : i32
    %c0_i32_1 = arith.constant 0 : i32
    return %c0_i32, %c0_i32_0 : i32, i32
  }
  func.func @transform_1(%arg0: i32) -> (i32, i32, i32) {
    %c0_i32 = arith.constant 0 : i32
    %c0_i32_0 = arith.constant 0 : i32
    %c0_i32_1 = arith.constant 0 : i32
    %c0_i32_2 = arith.constant 0 : i32
    return %c0_i32, %c0_i32_0, %c0_i32_1 : i32, i32, i32
  }
  func.func @transform_2(%arg0: i32) -> (i32, i32) {
    %c0_i32 = arith.constant 0 : i32
    %c0_i32_0 = arith.constant 0 : i32
    %c0_i32_1 = arith.constant 0 : i32
    return %c0_i32, %c0_i32_0 : i32, i32
  }
  func.func @transform_3(%arg0: i32) -> (i32, i32) {
    %c0_i32 = arith.constant 0 : i32
    %c0_i32_0 = arith.constant 0 : i32
    %c0_i32_1 = arith.constant 0 : i32
    return %c0_i32, %c0_i32_0 : i32, i32
  }
  func.func @transform_4(%arg0: i32) -> (i32, i32) {
    %c0_i32 = arith.constant 0 : i32
    %c0_i32_0 = arith.constant 0 : i32
    %c0_i32_1 = arith.constant 0 : i32
    return %c0_i32, %c0_i32_0 : i32, i32
  }
  func.func @transform_5(%arg0: i32) -> (i32, i32) {
    %c0_i32 = arith.constant 0 : i32
    %c0_i32_0 = arith.constant 0 : i32
    %c0_i32_1 = arith.constant 0 : i32
    return %c0_i32, %c0_i32_0 : i32, i32
  }
}

</mosaic_0001>

<bundles_post_ra>
// kernel: tpu_custom_call.1
= control target key start
LH: loop header
LB: loop body
LE: loop exit
PB: predicated region body
PF: predicated region fallthrough
CT: control target
= control target key end

     0   :  { %vm2319_vm0 = vcmask 1043456   ;;  %vm2291_vm1 = vcmask 31744   ;;  %v27_v2 = vlaneseq  ;;  %s6306_s0 = inlined_call_operand.vmem [shape: f32[4,256], index: 0, kind: input, shape index: {}]   ;;  %s6307_s1 = inlined_call_operand.vmem [shape: s32[2,16,128], index: 1, kind: input, shape index: {}]   ;;  %s6308_s2 = inlined_call_operand.vmem [shape: f32[68,4], index: 2, kind: input, shape index: {}]   ;;  %s6309_s3 = inlined_call_operand.vmem [shape: f32[32,4], index: 3, kind: input, shape index: {}]   ;;  %s6310_s4 = inlined_call_operand.vmem [shape: f32[32,32], index: 4, kind: input, shape index: {}]   ;;  %s6311_s5 = inlined_call_operand.hbm [shape: f32[32,256], index: 5, kind: output, shape index: {}]  }
   0x1   :  { %v22_v0 = vld [vmem:[%s6306_s0] sm:$0xff]  ;;  %v24_v3 = vld [vmem:[%s6307_s1 + $0x8] sm:$0xff] }
   0x2   :  { %v23_v1 = vld [vmem:[%s6307_s1] sm:$0xff]  ;;  %2288 = vst [vmem:[#allocation1] ss:$2 sm:$0xff] %v22_v0  ;;  %v4102_v7 = vshrl.u32 %v27_v2, 7  ;;  %v4114_v13 = vperm.slane %v24_v3, 0  ;;  %v4116_v14 = vperm.slane %v24_v3, 1 }
   0x3   :  { %v4096_v4 = vperm.slane %v23_v1, 0  ;;  %v4098_v5 = vperm.slane %v23_v1, 1  ;;  %v4100_v6 = vperm.slane %v23_v1, 2  ;;  %v4104_v8 = vperm.slane %v23_v1, 3 }
   0x4   :  { %v4106_v9 = vperm.slane %v23_v1, 4  ;;  %v4108_v10 = vperm.slane %v23_v1, 5  ;;  %v4110_v11 = vperm.slane %v23_v1, 6  ;;  %v4112_v12 = vperm.slane %v23_v1, 7 }
   0x5   :  { %10 = vsyncpa [#allocation3], 0  ;;  %v4119_v15 = vadd.s32 112, %v4102_v7  ;;  %v4122_v16 = vadd.s32 120, %v4102_v7  ;;  %v4124_v17 = vperm.slane %v24_v3, 2  ;;  %v4126_v18 = vperm.slane %v24_v3, 3 }
   0x6   :  { %v4128_v19 = vperm.slane %v24_v3, 4  ;;  %v4130_v20 = vperm.slane %v24_v3, 5  ;;  %v4132_v21 = vperm.slane %v24_v3, 6  ;;  %v4134_v22 = vperm.slane %v24_v3, 7  ;;  %v2278_v23 = vld [vmem:[%s6308_s2] sm:$0xff]  ;;  %s3411_s9 = sshll.u32 %s6311_s5, 4  ;;  %s3412_s9 = int_to_ptr.hbm [resolvable:$true] %s3411_s9 }
   0x7   :  { %vm60_vm2 = vcmp.eq.s32.totalorder %v4119_v15, %v4096_v4  ;;  %vm61_vm3 = vcmp.eq.s32.totalorder %v4122_v16, %v4096_v4  ;;  %vm190_vm4 = vcmp.eq.s32.totalorder %v4119_v15, %v4098_v5  ;;  %vm191_vm5 = vcmp.eq.s32.totalorder %v4122_v16, %v4098_v5  ;;  %s4055_s10 = smov 256   ;;  %s4056_s11 = smov 16  }
   0x8   :  { %v4049_v24 = vmov 0.0   ;;  %vm320_vm6 = vcmp.eq.s32.totalorder %v4119_v15, %v4100_v6  ;;  %vm321_vm7 = vcmp.eq.s32.totalorder %v4122_v16, %v4100_v6  ;;  %vm450_vm8 = vcmp.eq.s32.totalorder %v4119_v15, %v4104_v8 }
   0x9   :  { %v3437_v25 = vsel %vm60_vm2, 1.0, %v4049_v24  ;;  %v3438_v26 = vsel %vm61_vm3, 1.0, %v4049_v24  ;;  %v3469_v27 = vsel %vm190_vm4, 1.0, %v4049_v24  ;;  %v3470_v28 = vsel %vm191_vm5, 1.0, %v4049_v24 }
   0xa   :  { %v2289_v29 = vld.sshfl [vmem:[#allocation1] sm:$0xff pattern:$0x75316420]  ;;  %v2290_v30 = vld.sshfl [vmem:[#allocation1 + $0x8] sm:$0xff pattern:$0x75316420]  ;;  %v286_v31 = vadd.f32 %v3469_v27, %v3437_v25  ;;  %v287_v32 = vadd.f32 %v3470_v28, %v3438_v26  ;;  %vm451_vm9 = vcmp.eq.s32.totalorder %v4122_v16, %v4104_v8  ;;  %vm580_vm10 = vcmp.eq.s32.totalorder %v4119_v15, %v4106_v9 }
   0xb   :  { %3935 = vmatpush.msk.msra.mxu2 %vm2319_vm0, %v2289_v29  ;;  %3945 = vmatpush.msk.msra.mxu3 %vm2319_vm0, %v2290_v30  ;;  %v3501_v33 = vsel %vm320_vm6, 1.0, %v4049_v24  ;;  %v3502_v34 = vsel %vm321_vm7, 1.0, %v4049_v24  ;;  %v3533_v37 = vsel %vm450_vm8, 1.0, %v4049_v24  ;;  %v3534_v38 = vsel %vm451_vm9, 1.0, %v4049_v24  ;;  %v25_v29 = vld [vmem:[%s6307_s1 + $0x10] sm:$0xff] }
   0xc   :  { %3936 = vmatmul.msk.f32.vlgmr.msra.gmra.mxu2 %vm2291_vm1, %v2278_v23  ;;  %3946 = vmatmul.msk.f32.vlgmr.msra.gmra.mxu3 %vm2291_vm1, %v2278_v23  ;;  %v416_v35 = vadd.f32 %v3501_v33, %v286_v31  ;;  %v417_v36 = vadd.f32 %v3502_v34, %v287_v32  ;;  %vm581_vm11 = vcmp.eq.s32.totalorder %v4122_v16, %v4106_v9  ;;  %v3565_v41 = vsel %vm580_vm10, 1.0, %v4049_v24 }
   0xd   :  { %vm710_vm12 = vcmp.eq.s32.totalorder %v4119_v15, %v4108_v10  ;;  %vm711_vm13 = vcmp.eq.s32.totalorder %v4122_v16, %v4108_v10  ;;  %v3566_v42 = vsel %vm581_vm11, 1.0, %v4049_v24  ;;  %vm840_vm14 = vcmp.eq.s32.totalorder %v4119_v15, %v4110_v11 }
   0xe   :  { %v546_v39 = vadd.f32 %v3533_v37, %v416_v35  ;;  %v547_v40 = vadd.f32 %v3534_v38, %v417_v36  ;;  %v3597_v43 = vsel %vm710_vm12, 1.0, %v4049_v24  ;;  %v3598_v44 = vsel %vm711_vm13, 1.0, %v4049_v24 }
   0xf   :  { %vm841_vm15 = vcmp.eq.s32.totalorder %v4122_v16, %v4110_v11  ;;  %v3629_v47 = vsel %vm840_vm14, 1.0, %v4049_v24  ;;  %vm970_vm2 = vcmp.eq.s32.totalorder %v4119_v15, %v4112_v12  ;;  %vm971_vm3 = vcmp.eq.s32.totalorder %v4122_v16, %v4112_v12 }
  0x10   :  { %v676_v45 = vadd.f32 %v3565_v41, %v546_v39  ;;  %v677_v46 = vadd.f32 %v3566_v42, %v547_v40  ;;  %v3630_v48 = vsel %vm841_vm15, 1.0, %v4049_v24  ;;  %vm1100_vm4 = vcmp.eq.s32.totalorder %v4119_v15, %v4114_v13 }
  0x11   :  { %vm1101_vm5 = vcmp.eq.s32.totalorder %v4122_v16, %v4114_v13  ;;  %v3661_v51 = vsel %vm970_vm2, 1.0, %v4049_v24  ;;  %v3662_v52 = vsel %vm971_vm3, 1.0, %v4049_v24  ;;  %v3693_v53 = vsel %vm1100_vm4, 1.0, %v4049_v24 }
  0x12   :  { %v806_v49 = vadd.f32 %v3597_v43, %v676_v45  ;;  %v807_v50 = vadd.f32 %v3598_v44, %v677_v46  ;;  %v3694_v54 = vsel %vm1101_vm5, 1.0, %v4049_v24  ;;  %vm1230_vm6 = vcmp.eq.s32.totalorder %v4119_v15, %v4116_v14 }
  0x13   :  { %vm1231_vm7 = vcmp.eq.s32.totalorder %v4122_v16, %v4116_v14  ;;  %v3725_v57 = vsel %vm1230_vm6, 1.0, %v4049_v24  ;;  %vm1360_vm8 = vcmp.eq.s32.totalorder %v4119_v15, %v4124_v17  ;;  %vm1361_vm9 = vcmp.eq.s32.totalorder %v4122_v16, %v4124_v17 }
  0x14   :  { %v936_v55 = vadd.f32 %v3629_v47, %v806_v49  ;;  %v937_v56 = vadd.f32 %v3630_v48, %v807_v50  ;;  %v3726_v58 = vsel %vm1231_vm7, 1.0, %v4049_v24  ;;  %vm1490_vm10 = vcmp.eq.s32.totalorder %v4119_v15, %v4126_v18 }
  0x15   :  { %vm1491_vm11 = vcmp.eq.s32.totalorder %v4122_v16, %v4126_v18  ;;  %v3757_v61 = vsel %vm1360_vm8, 1.0, %v4049_v24  ;;  %v3758_v62 = vsel %vm1361_vm9, 1.0, %v4049_v24  ;;  %v3789_v63 = vsel %vm1490_vm10, 1.0, %v4049_v24 }
  0x16   :  { %v1066_v59 = vadd.f32 %v3661_v51, %v936_v55  ;;  %v1067_v60 = vadd.f32 %v3662_v52, %v937_v56  ;;  %v3790_v0 = vsel %vm1491_vm11, 1.0, %v4049_v24  ;;  %vm1620_vm12 = vcmp.eq.s32.totalorder %v4119_v15, %v4128_v19 }
  0x17   :  { %vm1621_vm13 = vcmp.eq.s32.totalorder %v4122_v16, %v4128_v19  ;;  %v3821_v3 = vsel %vm1620_vm12, 1.0, %v4049_v24  ;;  %vm1750_vm14 = vcmp.eq.s32.totalorder %v4119_v15, %v4130_v20  ;;  %vm1751_vm15 = vcmp.eq.s32.totalorder %v4122_v16, %v4130_v20 }
  0x18   :  { %v1196_v1 = vadd.f32 %v3693_v53, %v1066_v59  ;;  %v1197_v2 = vadd.f32 %v3694_v54, %v1067_v60  ;;  %v3822_v23 = vsel %vm1621_vm13, 1.0, %v4049_v24  ;;  %vm1880_vm2 = vcmp.eq.s32.totalorder %v4119_v15, %v4132_v21 }
  0x19   :  { %vm1881_vm3 = vcmp.eq.s32.totalorder %v4122_v16, %v4132_v21  ;;  %v3853_v27 = vsel %vm1750_vm14, 1.0, %v4049_v24  ;;  %v3854_v28 = vsel %vm1751_vm15, 1.0, %v4049_v24  ;;  %v3885_v30 = vsel %vm1880_vm2, 1.0, %v4049_v24 }
  0x1a   :  { %v1326_v25 = vadd.f32 %v3725_v57, %v1196_v1  ;;  %v1327_v26 = vadd.f32 %v3726_v58, %v1197_v2  ;;  %v3886_v31 = vsel %vm1881_vm3, 1.0, %v4049_v24  ;;  %vm2010_vm4 = vcmp.eq.s32.totalorder %v4119_v15, %v4134_v22 }
  0x1b   :  { %vm2011_vm5 = vcmp.eq.s32.totalorder %v4122_v16, %v4134_v22  ;;  %v3917_v34 = vsel %vm2010_vm4, 1.0, %v4049_v24  ;;  %v4242_v36 = vperm.slane %v25_v29, 0  ;;  %v4244_v37 = vperm.slane %v25_v29, 1 }
  0x1c   :  { %v1456_v32 = vadd.f32 %v3757_v61, %v1326_v25  ;;  %v1457_v33 = vadd.f32 %v3758_v62, %v1327_v26  ;;  %v3918_v35 = vsel %vm2011_vm5, 1.0, %v4049_v24  ;;  %v4246_v38 = vperm.slane %v25_v29, 2 }
  0x1d   :  { %v4248_v39 = vperm.slane %v25_v29, 3  ;;  %v4250_v42 = vperm.slane %v25_v29, 4  ;;  %v4252_v43 = vperm.slane %v25_v29, 5  ;;  %vm76_vm6 = vcmp.eq.s32.totalorder %v4119_v15, %v4242_v36 }
  0x1e   :  { %v1586_v40 = vadd.f32 %v3789_v63, %v1456_v32  ;;  %v1587_v41 = vadd.f32 %v3790_v0, %v1457_v33  ;;  %vm77_vm7 = vcmp.eq.s32.totalorder %v4122_v16, %v4242_v36  ;;  %vm206_vm8 = vcmp.eq.s32.totalorder %v4119_v15, %v4244_v37 }
  0x1f   :  { %vm207_vm9 = vcmp.eq.s32.totalorder %v4122_v16, %v4244_v37  ;;  %v3453_v46 = vsel %vm76_vm6, 1.0, %v4049_v24  ;;  %v3454_v47 = vsel %vm77_vm7, 1.0, %v4049_v24  ;;  %v3485_v48 = vsel %vm206_vm8, 1.0, %v4049_v24 }
  0x20   :  { %v1716_v44 = vadd.f32 %v3821_v3, %v1586_v40  ;;  %v1717_v45 = vadd.f32 %v3822_v23, %v1587_v41  ;;  %v3486_v49 = vsel %vm207_vm9, 1.0, %v4049_v24  ;;  %vm336_vm10 = vcmp.eq.s32.totalorder %v4119_v15, %v4246_v38  ;;  %v2279_v23 = vld [vmem:[%s6308_s2 + $0x8] sm:$0xff]  ;;  %v26_v40 = vld [vmem:[%s6307_s1 + $0x18] sm:$0xff] }
  0x21   :  { %vm337_vm11 = vcmp.eq.s32.totalorder %v4122_v16, %v4246_v38  ;;  %v302_v52 = vadd.f32 %v3485_v48, %v3453_v46  ;;  %v303_v53 = vadd.f32 %v3486_v49, %v3454_v47  ;;  %v3517_v54 = vsel %vm336_vm10, 1.0, %v4049_v24  ;;  %3937 = vmatmul.msk.f32.gmra.mxu2 %vm2291_vm1, %v2279_v23  ;;  %3947 = vmatmul.msk.f32.gmra.mxu3 %vm2291_vm1, %v2279_v23 }
  0x22   :  { %v1846_v50 = vadd.f32 %v3853_v27, %v1716_v44  ;;  %v1847_v51 = vadd.f32 %v3854_v28, %v1717_v45  ;;  %v3518_v55 = vsel %vm337_vm11, 1.0, %v4049_v24  ;;  %vm466_vm12 = vcmp.eq.s32.totalorder %v4119_v15, %v4248_v39 }
  0x23   :  { %vm467_vm13 = vcmp.eq.s32.totalorder %v4122_v16, %v4248_v39  ;;  %v432_v58 = vadd.f32 %v3517_v54, %v302_v52  ;;  %v433_v59 = vadd.f32 %v3518_v55, %v303_v53  ;;  %v3549_v60 = vsel %vm466_vm12, 1.0, %v4049_v24 }
  0x24   :  { %v1976_v56 = vadd.f32 %v3885_v30, %v1846_v50  ;;  %v1977_v57 = vadd.f32 %v3886_v31, %v1847_v51  ;;  %v3550_v61 = vsel %vm467_vm13, 1.0, %v4049_v24  ;;  %vm596_vm14 = vcmp.eq.s32.totalorder %v4119_v15, %v4250_v42 }
  0x25   :  { %vm597_vm15 = vcmp.eq.s32.totalorder %v4122_v16, %v4250_v42  ;;  %v562_v0 = vadd.f32 %v3549_v60, %v432_v58  ;;  %v563_v1 = vadd.f32 %v3550_v61, %v433_v59  ;;  %v3581_v2 = vsel %vm596_vm14, 1.0, %v4049_v24 }
  0x26   :  { %v2106_v62 = vadd.f32 %v3917_v34, %v1976_v56  ;;  %v2107_v63 = vadd.f32 %v3918_v35, %v1977_v57  ;;  %v3582_v3 = vsel %vm597_vm15, 1.0, %v4049_v24  ;;  %vm726_vm2 = vcmp.eq.s32.totalorder %v4119_v15, %v4252_v43 }
  0x27   :  { %vm727_vm3 = vcmp.eq.s32.totalorder %v4122_v16, %v4252_v43  ;;  %v692_v27 = vadd.f32 %v3581_v2, %v562_v0  ;;  %v693_v28 = vadd.f32 %v3582_v3, %v563_v1  ;;  %v3613_v30 = vsel %vm726_vm2, 1.0, %v4049_v24 }
  0x28   :  { %v2138_v25 = vpack.c.bf16 %v2106_v62, %v2106_v62  ;;  %v2139_v26 = vpack.c.bf16 %v2107_v63, %v2107_v63  ;;  %v3614_v31 = vsel %vm727_vm3, 1.0, %v4049_v24  ;;  %v4294_v32 = vperm.slane %v25_v29, 6 }
  0x29   :  { %v4296_v33 = vperm.slane %v25_v29, 7  ;;  %v822_v41 = vadd.f32 %v3613_v30, %v692_v27  ;;  %v823_v44 = vadd.f32 %v3614_v31, %v693_v28  ;;  %v4314_v51 = vperm.slane %v26_v40, 0 }
  0x2a   :  { %v2186_v34 = vunpack.c.l.b16 %v2138_v25  ;;  %v2187_v35 = vunpack.c.l.b16 %v2139_v26  ;;  %vm856_vm4 = vcmp.eq.s32.totalorder %v4119_v15, %v4294_v32  ;;  %vm857_vm5 = vcmp.eq.s32.totalorder %v4122_v16, %v4294_v32 }
  0x2b   :  { %vm986_vm6 = vcmp.eq.s32.totalorder %v4119_v15, %v4296_v33  ;;  %vm987_vm7 = vcmp.eq.s32.totalorder %v4122_v16, %v4296_v33  ;;  %v3645_v45 = vsel %vm856_vm4, 1.0, %v4049_v24  ;;  %v3646_v46 = vsel %vm857_vm5, 1.0, %v4049_v24 }
  0x2c   :  { %v2195_v29 = vpack.c.b16 %v2187_v35, %v2186_v34  ;;  %v3677_v47 = vsel %vm986_vm6, 1.0, %v4049_v24  ;;  %v952_v48 = vadd.f32 %v3645_v45, %v822_v41  ;;  %v953_v49 = vadd.f32 %v3646_v46, %v823_v44 }
  0x2d   :  { %v3678_v50 = vsel %vm987_vm7, 1.0, %v4049_v24  ;;  %v4316_v52 = vperm.slane %v26_v40, 1  ;;  %v4318_v53 = vperm.slane %v26_v40, 2  ;;  %v4320_v54 = vperm.slane %v26_v40, 3 }
  0x2e   :  { %2204 = vmatpush.bf16.xpose.msra.mxu0 %v2195_v29  ;;  %v4322_v55 = vperm.slane %v26_v40, 4  ;;  %2758 = vmatpush.bf16.msrb.mxu2 %v2195_v29  ;;  %v1082_v56 = vadd.f32 %v3677_v47, %v952_v48  ;;  %v1083_v57 = vadd.f32 %v3678_v50, %v953_v49  ;;  %vm1116_vm8 = vcmp.eq.s32.totalorder %v4119_v15, %v4314_v51 }
  0x2f   :  { %vm1117_vm9 = vcmp.eq.s32.totalorder %v4122_v16, %v4314_v51  ;;  %v3709_v58 = vsel %vm1116_vm8, 1.0, %v4049_v24  ;;  %vm1246_vm10 = vcmp.eq.s32.totalorder %v4119_v15, %v4316_v52  ;;  %vm1247_vm11 = vcmp.eq.s32.totalorder %v4122_v16, %v4316_v52 }
  0x30   :  { %v3710_v59 = vsel %vm1117_vm9, 1.0, %v4049_v24  ;;  %v1212_v60 = vadd.f32 %v3709_v58, %v1082_v56  ;;  %v3741_v62 = vsel %vm1246_vm10, 1.0, %v4049_v24  ;;  %v3742_v63 = vsel %vm1247_vm11, 1.0, %v4049_v24 }
  0x31   :  { %v1213_v61 = vadd.f32 %v3710_v59, %v1083_v57  ;;  %vm1376_vm12 = vcmp.eq.s32.totalorder %v4119_v15, %v4318_v53  ;;  %vm1377_vm13 = vcmp.eq.s32.totalorder %v4122_v16, %v4318_v53  ;;  %vm1506_vm14 = vcmp.eq.s32.totalorder %v4119_v15, %v4320_v54 }
  0x32   :  { %vm1507_vm15 = vcmp.eq.s32.totalorder %v4122_v16, %v4320_v54  ;;  %v1342_v0 = vadd.f32 %v3741_v62, %v1212_v60  ;;  %v3773_v2 = vsel %vm1376_vm12, 1.0, %v4049_v24  ;;  %v3774_v3 = vsel %vm1377_vm13, 1.0, %v4049_v24 }
  0x33   :  { %v1343_v1 = vadd.f32 %v3742_v63, %v1213_v61  ;;  %v3805_v23 = vsel %vm1506_vm14, 1.0, %v4049_v24  ;;  %v3806_v25 = vsel %vm1507_vm15, 1.0, %v4049_v24  ;;  %vm1636_vm2 = vcmp.eq.s32.totalorder %v4119_v15, %v4322_v55 }
  0x34   :  { %vm1637_vm3 = vcmp.eq.s32.totalorder %v4122_v16, %v4322_v55  ;;  %v1472_v26 = vadd.f32 %v3773_v2, %v1342_v0  ;;  %v3837_v28 = vsel %vm1636_vm2, 1.0, %v4049_v24  ;;  %v4354_v31 = vperm.slane %v26_v40, 5 }
  0x35   :  { %v1473_v27 = vadd.f32 %v3774_v3, %v1343_v1  ;;  %v3838_v30 = vsel %vm1637_vm3, 1.0, %v4049_v24  ;;  %v4356_v34 = vperm.slane %v26_v40, 6  ;;  %v4358_v35 = vperm.slane %v26_v40, 7 }
  0x36   :  { %v1602_v41 = vadd.f32 %v3805_v23, %v1472_v26  ;;  %v4361_v29 = vadd.s32 96, %v4102_v7  ;;  %v4364_v45 = vadd.s32 104, %v4102_v7  ;;  %vm1766_vm4 = vcmp.eq.s32.totalorder %v4119_v15, %v4354_v31 }
  0x37   :  { %v1603_v44 = vadd.f32 %v3806_v25, %v1473_v27  ;;  %vm1767_vm5 = vcmp.eq.s32.totalorder %v4122_v16, %v4354_v31  ;;  %vm1896_vm6 = vcmp.eq.s32.totalorder %v4119_v15, %v4356_v34  ;;  %vm1897_vm7 = vcmp.eq.s32.totalorder %v4122_v16, %v4356_v34 }
  0x38   :  { %v1732_v40 = vadd.f32 %v3837_v28, %v1602_v41  ;;  %v3869_v47 = vsel %vm1766_vm4, 1.0, %v4049_v24  ;;  %v3870_v48 = vsel %vm1767_vm5, 1.0, %v4049_v24  ;;  %v3901_v49 = vsel %vm1896_vm6, 1.0, %v4049_v24 }
  0x39   :  { %v1733_v46 = vadd.f32 %v3838_v30, %v1603_v44  ;;  %v3902_v50 = vsel %vm1897_vm7, 1.0, %v4049_v24  ;;  %vm2026_vm8 = vcmp.eq.s32.totalorder %v4119_v15, %v4358_v35  ;;  %vm2027_vm9 = vcmp.eq.s32.totalorder %v4122_v16, %v4358_v35 }
  0x3a   :  { %v1862_v56 = vadd.f32 %v3869_v47, %v1732_v40  ;;  %v3933_v58 = vsel %vm2026_vm8, 1.0, %v4049_v24  ;;  %v3934_v59 = vsel %vm2027_vm9, 1.0, %v4049_v24  ;;  %vm58_vm10 = vcmp.eq.s32.totalorder %v4361_v29, %v4096_v4 }
  0x3b   :  { %v1863_v57 = vadd.f32 %v3870_v48, %v1733_v46  ;;  %vm59_vm11 = vcmp.eq.s32.totalorder %v4364_v45, %v4096_v4  ;;  %vm188_vm12 = vcmp.eq.s32.totalorder %v4361_v29, %v4098_v5  ;;  %vm189_vm13 = vcmp.eq.s32.totalorder %v4364_v45, %v4098_v5 }
  0x3c   :  { %v1992_v15 = vadd.f32 %v3901_v49, %v1862_v56  ;;  %v3435_v60 = vsel %vm58_vm10, 1.0, %v4049_v24  ;;  %v3436_v61 = vsel %vm59_vm11, 1.0, %v4049_v24  ;;  %v3467_v62 = vsel %vm188_vm12, 1.0, %v4049_v24 }
  0x3d   :  { %v1993_v16 = vadd.f32 %v3902_v50, %v1863_v57  ;;  %v3468_v63 = vsel %vm189_vm13, 1.0, %v4049_v24  ;;  %vm318_vm14 = vcmp.eq.s32.totalorder %v4361_v29, %v4100_v6  ;;  %vm319_vm15 = vcmp.eq.s32.totalorder %v4364_v45, %v4100_v6 }
  0x3e   :  { %v2122_v0 = vadd.f32 %v3933_v58, %v1992_v15  ;;  %v284_v2 = vadd.f32 %v3467_v62, %v3435_v60  ;;  %v285_v3 = vadd.f32 %v3468_v63, %v3436_v61  ;;  %v3499_v23 = vsel %vm318_vm14, 1.0, %v4049_v24 }
  0x3f   :  { %v2123_v1 = vadd.f32 %v3934_v59, %v1993_v16  ;;  %v3500_v25 = vsel %vm319_vm15, 1.0, %v4049_v24  ;;  %vm448_vm2 = vcmp.eq.s32.totalorder %v4361_v29, %v4104_v8  ;;  %vm449_vm3 = vcmp.eq.s32.totalorder %v4364_v45, %v4104_v8 }
  0x40   :  { %v2154_v26 = vpack.c.bf16 %v2122_v0, %v2122_v0  ;;  %v414_v28 = vadd.f32 %v3499_v23, %v284_v2  ;;  %v415_v30 = vadd.f32 %v3500_v25, %v285_v3  ;;  %v3531_v41 = vsel %vm448_vm2, 1.0, %v4049_v24 }
  0x41   :  { %v2155_v27 = vpack.c.bf16 %v2123_v1, %v2123_v1  ;;  %v3532_v44 = vsel %vm449_vm3, 1.0, %v4049_v24  ;;  %vm578_vm4 = vcmp.eq.s32.totalorder %v4361_v29, %v4106_v9  ;;  %vm579_vm5 = vcmp.eq.s32.totalorder %v4364_v45, %v4106_v9 }
  0x42   :  { %v2247_v40 = vunpack.c.l.b16 %v2154_v26  ;;  %v544_v47 = vadd.f32 %v3531_v41, %v414_v28  ;;  %v545_v48 = vadd.f32 %v3532_v44, %v415_v30  ;;  %v3563_v49 = vsel %vm578_vm4, 1.0, %v4049_v24 }
  0x43   :  { %v2248_v46 = vunpack.c.l.b16 %v2155_v27  ;;  %v3564_v50 = vsel %vm579_vm5, 1.0, %v4049_v24  ;;  %vm708_vm6 = vcmp.eq.s32.totalorder %v4361_v29, %v4108_v10  ;;  %vm709_vm7 = vcmp.eq.s32.totalorder %v4364_v45, %v4108_v10 }
  0x44   :  { %v674_v57 = vadd.f32 %v3563_v49, %v544_v47  ;;  %v675_v58 = vadd.f32 %v3564_v50, %v545_v48  ;;  %v3595_v59 = vsel %vm708_vm6, 1.0, %v4049_v24  ;;  %v3596_v15 = vsel %vm709_vm7, 1.0, %v4049_v24 }
  0x45   :  { %v2256_v56 = vpack.c.b16 %v2248_v46, %v2247_v40  ;;  %vm838_vm8 = vcmp.eq.s32.totalorder %v4361_v29, %v4110_v11  ;;  %vm839_vm9 = vcmp.eq.s32.totalorder %v4364_v45, %v4110_v11  ;;  %vm968_vm10 = vcmp.eq.s32.totalorder %v4361_v29, %v4112_v12 }
  0x46   :  { %v804_v16 = vadd.f32 %v3595_v59, %v674_v57  ;;  %v805_v60 = vadd.f32 %v3596_v15, %v675_v58  ;;  %v3627_v61 = vsel %vm838_vm8, 1.0, %v4049_v24  ;;  %v3628_v62 = vsel %vm839_vm9, 1.0, %v4049_v24 }
  0x47   :  { %2265 = vmatpush.bf16.xpose.msra.mxu1 %v2256_v56  ;;  %2792 = vmatpush.bf16.msrb.mxu3 %v2256_v56  ;;  %vm969_vm11 = vcmp.eq.s32.totalorder %v4364_v45, %v4112_v12  ;;  %v3659_v63 = vsel %vm968_vm10, 1.0, %v4049_v24  ;;  %vm1098_vm12 = vcmp.eq.s32.totalorder %v4361_v29, %v4114_v13  ;;  %vm1099_vm13 = vcmp.eq.s32.totalorder %v4364_v45, %v4114_v13 }
  0x48   :  { %v934_v0 = vadd.f32 %v3627_v61, %v804_v16  ;;  %v935_v1 = vadd.f32 %v3628_v62, %v805_v60  ;;  %v3660_v2 = vsel %vm969_vm11, 1.0, %v4049_v24  ;;  %v3691_v3 = vsel %vm1098_vm12, 1.0, %v4049_v24 }
  0x49   :  { %v3692_v23 = vsel %vm1099_vm13, 1.0, %v4049_v24  ;;  %vm1228_vm14 = vcmp.eq.s32.totalorder %v4361_v29, %v4116_v14  ;;  %vm1229_vm15 = vcmp.eq.s32.totalorder %v4364_v45, %v4116_v14  ;;  %vm1358_vm2 = vcmp.eq.s32.totalorder %v4361_v29, %v4124_v17 }
  0x4a   :  { %v1064_v25 = vadd.f32 %v3659_v63, %v934_v0  ;;  %v1065_v26 = vadd.f32 %v3660_v2, %v935_v1  ;;  %v3723_v27 = vsel %vm1228_vm14, 1.0, %v4049_v24  ;;  %v3724_v28 = vsel %vm1229_vm15, 1.0, %v4049_v24 }
  0x4b   :  { %vm1359_vm3 = vcmp.eq.s32.totalorder %v4364_v45, %v4124_v17  ;;  %v3755_v30 = vsel %vm1358_vm2, 1.0, %v4049_v24  ;;  %vm1488_vm4 = vcmp.eq.s32.totalorder %v4361_v29, %v4126_v18  ;;  %vm1489_vm5 = vcmp.eq.s32.totalorder %v4364_v45, %v4126_v18 }
  0x4c   :  { %v1194_v41 = vadd.f32 %v3691_v3, %v1064_v25  ;;  %v1195_v44 = vadd.f32 %v3692_v23, %v1065_v26  ;;  %v3756_v40 = vsel %vm1359_vm3, 1.0, %v4049_v24  ;;  %v3787_v46 = vsel %vm1488_vm4, 1.0, %v4049_v24 }
  0x4d   :  { %v3788_v47 = vsel %vm1489_vm5, 1.0, %v4049_v24  ;;  %vm1618_vm6 = vcmp.eq.s32.totalorder %v4361_v29, %v4128_v19  ;;  %vm1619_vm7 = vcmp.eq.s32.totalorder %v4364_v45, %v4128_v19  ;;  %vm1748_vm8 = vcmp.eq.s32.totalorder %v4361_v29, %v4130_v20 }
  0x4e   :  { %v1324_v48 = vadd.f32 %v3723_v27, %v1194_v41  ;;  %v1325_v49 = vadd.f32 %v3724_v28, %v1195_v44  ;;  %v3819_v50 = vsel %vm1618_vm6, 1.0, %v4049_v24  ;;  %v3820_v56 = vsel %vm1619_vm7, 1.0, %v4049_v24 }
  0x4f   :  { %vm1749_vm9 = vcmp.eq.s32.totalorder %v4364_v45, %v4130_v20  ;;  %v3851_v57 = vsel %vm1748_vm8, 1.0, %v4049_v24  ;;  %vm1878_vm10 = vcmp.eq.s32.totalorder %v4361_v29, %v4132_v21  ;;  %vm1879_vm11 = vcmp.eq.s32.totalorder %v4364_v45, %v4132_v21 }
  0x50   :  { %v1454_v58 = vadd.f32 %v3755_v30, %v1324_v48  ;;  %v1455_v59 = vadd.f32 %v3756_v40, %v1325_v49  ;;  %v3852_v15 = vsel %vm1749_vm9, 1.0, %v4049_v24  ;;  %v3883_v16 = vsel %vm1878_vm10, 1.0, %v4049_v24 }
  0x51   :  { %v3884_v60 = vsel %vm1879_vm11, 1.0, %v4049_v24  ;;  %vm2008_vm12 = vcmp.eq.s32.totalorder %v4361_v29, %v4134_v22  ;;  %vm2009_vm13 = vcmp.eq.s32.totalorder %v4364_v45, %v4134_v22  ;;  %vm74_vm14 = vcmp.eq.s32.totalorder %v4361_v29, %v4242_v36 }
  0x52   :  { %v1584_v61 = vadd.f32 %v3787_v46, %v1454_v58  ;;  %v1585_v62 = vadd.f32 %v3788_v47, %v1455_v59  ;;  %v3915_v63 = vsel %vm2008_vm12, 1.0, %v4049_v24  ;;  %v3916_v0 = vsel %vm2009_vm13, 1.0, %v4049_v24 }
  0x53   :  { %vm75_vm15 = vcmp.eq.s32.totalorder %v4364_v45, %v4242_v36  ;;  %v3451_v1 = vsel %vm74_vm14, 1.0, %v4049_v24  ;;  %vm204_vm2 = vcmp.eq.s32.totalorder %v4361_v29, %v4244_v37  ;;  %vm205_vm3 = vcmp.eq.s32.totalorder %v4364_v45, %v4244_v37 }
  0x54   :  { %v1714_v2 = vadd.f32 %v3819_v50, %v1584_v61  ;;  %v1715_v3 = vadd.f32 %v3820_v56, %v1585_v62  ;;  %v3452_v23 = vsel %vm75_vm15, 1.0, %v4049_v24  ;;  %v3483_v25 = vsel %vm204_vm2, 1.0, %v4049_v24 }
  0x55   :  { %v3484_v26 = vsel %vm205_vm3, 1.0, %v4049_v24  ;;  %v300_v27 = vadd.f32 %v3483_v25, %v3451_v1  ;;  %vm334_vm4 = vcmp.eq.s32.totalorder %v4361_v29, %v4246_v38  ;;  %vm335_vm5 = vcmp.eq.s32.totalorder %v4364_v45, %v4246_v38 }
  0x56   :  { %v1844_v28 = vadd.f32 %v3851_v57, %v1714_v2  ;;  %v1845_v30 = vadd.f32 %v3852_v15, %v1715_v3  ;;  %v301_v41 = vadd.f32 %v3484_v26, %v3452_v23  ;;  %v3515_v44 = vsel %vm334_vm4, 1.0, %v4049_v24 }
  0x57   :  { %v3516_v40 = vsel %vm335_vm5, 1.0, %v4049_v24  ;;  %v430_v46 = vadd.f32 %v3515_v44, %v300_v27  ;;  %vm464_vm6 = vcmp.eq.s32.totalorder %v4361_v29, %v4248_v39  ;;  %vm465_vm7 = vcmp.eq.s32.totalorder %v4364_v45, %v4248_v39 }
  0x58   :  { %v1974_v47 = vadd.f32 %v3883_v16, %v1844_v28  ;;  %v1975_v48 = vadd.f32 %v3884_v60, %v1845_v30  ;;  %v431_v49 = vadd.f32 %v3516_v40, %v301_v41  ;;  %v3547_v50 = vsel %vm464_vm6, 1.0, %v4049_v24  ;;  %v2280_v16 = vld [vmem:[%s6308_s2 + $0x10] sm:$0xff] }
  0x59   :  { %v3548_v56 = vsel %vm465_vm7, 1.0, %v4049_v24  ;;  %v560_v57 = vadd.f32 %v3547_v50, %v430_v46  ;;  %vm594_vm8 = vcmp.eq.s32.totalorder %v4361_v29, %v4250_v42  ;;  %vm595_vm9 = vcmp.eq.s32.totalorder %v4364_v45, %v4250_v42  ;;  %3938 = vmatmul.msk.f32.gmra.mxu2 %vm2291_vm1, %v2280_v16  ;;  %3948 = vmatmul.msk.f32.gmra.mxu3 %vm2291_vm1, %v2280_v16 }
  0x5a   :  { %v2104_v58 = vadd.f32 %v3915_v63, %v1974_v47  ;;  %v2105_v59 = vadd.f32 %v3916_v0, %v1975_v48  ;;  %v561_v15 = vadd.f32 %v3548_v56, %v431_v49  ;;  %v3579_v61 = vsel %vm594_vm8, 1.0, %v4049_v24 }
  0x5b   :  { %v3580_v60 = vsel %vm595_vm9, 1.0, %v4049_v24  ;;  %v690_v62 = vadd.f32 %v3579_v61, %v560_v57  ;;  %vm724_vm10 = vcmp.eq.s32.totalorder %v4361_v29, %v4252_v43  ;;  %vm725_vm11 = vcmp.eq.s32.totalorder %v4364_v45, %v4252_v43 }
  0x5c   :  { %v2136_v63 = vpack.c.bf16 %v2104_v58, %v2104_v58  ;;  %v2137_v0 = vpack.c.bf16 %v2105_v59, %v2105_v59  ;;  %v691_v1 = vadd.f32 %v3580_v60, %v561_v15  ;;  %v3611_v2 = vsel %vm724_vm10, 1.0, %v4049_v24 }
  0x5d   :  { %v3612_v3 = vsel %vm725_vm11, 1.0, %v4049_v24  ;;  %v820_v23 = vadd.f32 %v3611_v2, %v690_v62  ;;  %vm854_vm12 = vcmp.eq.s32.totalorder %v4361_v29, %v4294_v32  ;;  %vm855_vm13 = vcmp.eq.s32.totalorder %v4364_v45, %v4294_v32 }
  0x5e   :  { %v2184_v25 = vunpack.c.l.b16 %v2136_v63  ;;  %v2185_v26 = vunpack.c.l.b16 %v2137_v0  ;;  %v821_v27 = vadd.f32 %v3612_v3, %v691_v1  ;;  %v3643_v28 = vsel %vm854_vm12, 1.0, %v4049_v24 }
  0x5f   :  { %v3644_v30 = vsel %vm855_vm13, 1.0, %v4049_v24  ;;  %v950_v41 = vadd.f32 %v3643_v28, %v820_v23  ;;  %vm984_vm14 = vcmp.eq.s32.totalorder %v4361_v29, %v4296_v33  ;;  %vm985_vm15 = vcmp.eq.s32.totalorder %v4364_v45, %v4296_v33 }
  0x60   :  { %v2194_v44 = vpack.c.b16 %v2185_v26, %v2184_v25  ;;  %v951_v40 = vadd.f32 %v3644_v30, %v821_v27  ;;  %v3675_v46 = vsel %vm984_vm14, 1.0, %v4049_v24  ;;  %v3676_v47 = vsel %vm985_vm15, 1.0, %v4049_v24 }
  0x61   :  { %v1080_v48 = vadd.f32 %v3675_v46, %v950_v41  ;;  %vm1114_vm2 = vcmp.eq.s32.totalorder %v4361_v29, %v4314_v51  ;;  %vm1115_vm3 = vcmp.eq.s32.totalorder %v4364_v45, %v4314_v51  ;;  %vm1244_vm4 = vcmp.eq.s32.totalorder %v4361_v29, %v4316_v52 }
  0x62   :  { %2205 = vmatpush.bf16.xpose.msra.mxu0 %v2194_v44  ;;  %v1081_v49 = vadd.f32 %v3676_v47, %v951_v40  ;;  %v3707_v50 = vsel %vm1114_vm2, 1.0, %v4049_v24  ;;  %v3708_v56 = vsel %vm1115_vm3, 1.0, %v4049_v24  ;;  %vm1245_vm5 = vcmp.eq.s32.totalorder %v4364_v45, %v4316_v52  ;;  %2759 = vmatpush.bf16.msrb.mxu2 %v2194_v44 }
  0x63   :  { %v1210_v57 = vadd.f32 %v3707_v50, %v1080_v48  ;;  %v3739_v58 = vsel %vm1244_vm4, 1.0, %v4049_v24  ;;  %v3740_v59 = vsel %vm1245_vm5, 1.0, %v4049_v24  ;;  %vm1374_vm6 = vcmp.eq.s32.totalorder %v4361_v29, %v4318_v53 }
  0x64   :  { %v1211_v15 = vadd.f32 %v3708_v56, %v1081_v49  ;;  %vm1375_vm7 = vcmp.eq.s32.totalorder %v4364_v45, %v4318_v53  ;;  %v3771_v61 = vsel %vm1374_vm6, 1.0, %v4049_v24  ;;  %vm1504_vm8 = vcmp.eq.s32.totalorder %v4361_v29, %v4320_v54 }
  0x65   :  { %v1340_v16 = vadd.f32 %v3739_v58, %v1210_v57  ;;  %v3772_v60 = vsel %vm1375_vm7, 1.0, %v4049_v24  ;;  %vm1505_vm9 = vcmp.eq.s32.totalorder %v4364_v45, %v4320_v54  ;;  %v3803_v63 = vsel %vm1504_vm8, 1.0, %v4049_v24 }
  0x66   :  { %v1341_v62 = vadd.f32 %v3740_v59, %v1211_v15  ;;  %vm1634_vm10 = vcmp.eq.s32.totalorder %v4361_v29, %v4322_v55  ;;  %vm1635_vm11 = vcmp.eq.s32.totalorder %v4364_v45, %v4322_v55  ;;  %v3804_v1 = vsel %vm1505_vm9, 1.0, %v4049_v24 }
  0x67   :  { %v1470_v0 = vadd.f32 %v3771_v61, %v1340_v16  ;;  %vm1764_vm12 = vcmp.eq.s32.totalorder %v4361_v29, %v4354_v31  ;;  %v3835_v3 = vsel %vm1634_vm10, 1.0, %v4049_v24  ;;  %vm1765_vm13 = vcmp.eq.s32.totalorder %v4364_v45, %v4354_v31 }
  0x68   :  { %v1471_v2 = vadd.f32 %v3772_v60, %v1341_v62  ;;  %vm1894_vm14 = vcmp.eq.s32.totalorder %v4361_v29, %v4356_v34  ;;  %v3836_v25 = vsel %vm1635_vm11, 1.0, %v4049_v24  ;;  %v3867_v26 = vsel %vm1764_vm12, 1.0, %v4049_v24 }
  0x69   :  { %v1600_v23 = vadd.f32 %v3803_v63, %v1470_v0  ;;  %vm1895_vm15 = vcmp.eq.s32.totalorder %v4364_v45, %v4356_v34  ;;  %v3868_v28 = vsel %vm1765_vm13, 1.0, %v4049_v24  ;;  %vm2024_vm2 = vcmp.eq.s32.totalorder %v4361_v29, %v4358_v35 }
  0x6a   :  { %v1601_v27 = vadd.f32 %v3804_v1, %v1471_v2  ;;  %vm2025_vm3 = vcmp.eq.s32.totalorder %v4364_v45, %v4358_v35  ;;  %v3899_v41 = vsel %vm1894_vm14, 1.0, %v4049_v24  ;;  %v3900_v44 = vsel %vm1895_vm15, 1.0, %v4049_v24 }
  0x6b   :  { %v1730_v30 = vadd.f32 %v3835_v3, %v1600_v23  ;;  %v4580_v40 = vadd.s32 80, %v4102_v7  ;;  %v3931_v47 = vsel %vm2024_vm2, 1.0, %v4049_v24  ;;  %v3932_v48 = vsel %vm2025_vm3, 1.0, %v4049_v24 }
  0x6c   :  { %v1731_v46 = vadd.f32 %v3836_v25, %v1601_v27  ;;  %v4585_v49 = vadd.s32 88, %v4102_v7 }
  0x6d   :  { %v1860_v29 = vadd.f32 %v3867_v26, %v1730_v30  ;;  %vm56_vm4 = vcmp.eq.s32.totalorder %v4580_v40, %v4096_v4  ;;  %vm186_vm5 = vcmp.eq.s32.totalorder %v4580_v40, %v4098_v5  ;;  %vm316_vm6 = vcmp.eq.s32.totalorder %v4580_v40, %v4100_v6 }
  0x6e   :  { %v1861_v45 = vadd.f32 %v3868_v28, %v1731_v46  ;;  %vm57_vm7 = vcmp.eq.s32.totalorder %v4585_v49, %v4096_v4  ;;  %v3433_v50 = vsel %vm56_vm4, 1.0, %v4049_v24  ;;  %vm187_vm8 = vcmp.eq.s32.totalorder %v4585_v49, %v4098_v5 }
  0x6f   :  { %v1990_v56 = vadd.f32 %v3899_v41, %v1860_v29  ;;  %v3434_v57 = vsel %vm57_vm7, 1.0, %v4049_v24  ;;  %v3465_v58 = vsel %vm186_vm5, 1.0, %v4049_v24  ;;  %v3466_v59 = vsel %vm187_vm8, 1.0, %v4049_v24 }
  0x70   :  { %v1991_v15 = vadd.f32 %v3900_v44, %v1861_v45  ;;  %v282_v61 = vadd.f32 %v3465_v58, %v3433_v50  ;;  %v283_v16 = vadd.f32 %v3466_v59, %v3434_v57  ;;  %vm317_vm9 = vcmp.eq.s32.totalorder %v4585_v49, %v4100_v6 }
  0x71   :  { %v2120_v60 = vadd.f32 %v3931_v47, %v1990_v56  ;;  %v3497_v62 = vsel %vm316_vm6, 1.0, %v4049_v24  ;;  %v3498_v63 = vsel %vm317_vm9, 1.0, %v4049_v24  ;;  %vm446_vm10 = vcmp.eq.s32.totalorder %v4580_v40, %v4104_v8 }
  0x72   :  { %v2121_v0 = vadd.f32 %v3932_v48, %v1991_v15  ;;  %v412_v1 = vadd.f32 %v3497_v62, %v282_v61  ;;  %v413_v2 = vadd.f32 %v3498_v63, %v283_v16  ;;  %vm447_vm11 = vcmp.eq.s32.totalorder %v4585_v49, %v4104_v8 }
  0x73   :  { %v2152_v3 = vpack.c.bf16 %v2120_v60, %v2120_v60  ;;  %v3529_v23 = vsel %vm446_vm10, 1.0, %v4049_v24  ;;  %v3530_v25 = vsel %vm447_vm11, 1.0, %v4049_v24  ;;  %vm576_vm12 = vcmp.eq.s32.totalorder %v4580_v40, %v4106_v9 }
  0x74   :  { %v2153_v26 = vpack.c.bf16 %v2121_v0, %v2121_v0  ;;  %v542_v27 = vadd.f32 %v3529_v23, %v412_v1  ;;  %v543_v28 = vadd.f32 %v3530_v25, %v413_v2  ;;  %vm577_vm13 = vcmp.eq.s32.totalorder %v4585_v49, %v4106_v9 }
  0x75   :  { %v2245_v30 = vunpack.c.l.b16 %v2152_v3  ;;  %v3561_v41 = vsel %vm576_vm12, 1.0, %v4049_v24  ;;  %v3562_v44 = vsel %vm577_vm13, 1.0, %v4049_v24  ;;  %vm706_vm14 = vcmp.eq.s32.totalorder %v4580_v40, %v4108_v10 }
  0x76   :  { %v2246_v46 = vunpack.c.l.b16 %v2153_v26  ;;  %v672_v47 = vadd.f32 %v3561_v41, %v542_v27  ;;  %v673_v48 = vadd.f32 %v3562_v44, %v543_v28  ;;  %vm707_vm15 = vcmp.eq.s32.totalorder %v4585_v49, %v4108_v10 }
  0x77   :  { %v3593_v29 = vsel %vm706_vm14, 1.0, %v4049_v24  ;;  %v3594_v45 = vsel %vm707_vm15, 1.0, %v4049_v24  ;;  %vm836_vm2 = vcmp.eq.s32.totalorder %v4580_v40, %v4110_v11  ;;  %vm837_vm3 = vcmp.eq.s32.totalorder %v4585_v49, %v4110_v11 }
  0x78   :  { %v2255_v50 = vpack.c.b16 %v2246_v46, %v2245_v30  ;;  %v802_v56 = vadd.f32 %v3593_v29, %v672_v47  ;;  %v803_v57 = vadd.f32 %v3594_v45, %v673_v48  ;;  %v3625_v58 = vsel %vm836_vm2, 1.0, %v4049_v24 }
  0x79   :  { %v3626_v59 = vsel %vm837_vm3, 1.0, %v4049_v24  ;;  %vm966_vm4 = vcmp.eq.s32.totalorder %v4580_v40, %v4112_v12  ;;  %vm967_vm5 = vcmp.eq.s32.totalorder %v4585_v49, %v4112_v12  ;;  %vm1096_vm6 = vcmp.eq.s32.totalorder %v4580_v40, %v4114_v13 }
  0x7a   :  { %2266 = vmatpush.bf16.xpose.msra.mxu1 %v2255_v50  ;;  %v932_v15 = vadd.f32 %v3625_v58, %v802_v56  ;;  %v933_v61 = vadd.f32 %v3626_v59, %v803_v57  ;;  %v3657_v16 = vsel %vm966_vm4, 1.0, %v4049_v24  ;;  %v3658_v60 = vsel %vm967_vm5, 1.0, %v4049_v24  ;;  %2793 = vmatpush.bf16.msrb.mxu3 %v2255_v50 }
  0x7b   :  { %vm1097_vm7 = vcmp.eq.s32.totalorder %v4585_v49, %v4114_v13  ;;  %v3689_v62 = vsel %vm1096_vm6, 1.0, %v4049_v24  ;;  %vm1226_vm8 = vcmp.eq.s32.totalorder %v4580_v40, %v4116_v14  ;;  %vm1227_vm9 = vcmp.eq.s32.totalorder %v4585_v49, %v4116_v14 }
  0x7c   :  { %v1062_v63 = vadd.f32 %v3657_v16, %v932_v15  ;;  %v1063_v0 = vadd.f32 %v3658_v60, %v933_v61  ;;  %v3690_v1 = vsel %vm1097_vm7, 1.0, %v4049_v24  ;;  %v3721_v2 = vsel %vm1226_vm8, 1.0, %v4049_v24 }
  0x7d   :  { %v3722_v3 = vsel %vm1227_vm9, 1.0, %v4049_v24  ;;  %vm1356_vm10 = vcmp.eq.s32.totalorder %v4580_v40, %v4124_v17  ;;  %vm1357_vm11 = vcmp.eq.s32.totalorder %v4585_v49, %v4124_v17  ;;  %vm1486_vm12 = vcmp.eq.s32.totalorder %v4580_v40, %v4126_v18 }
  0x7e   :  { %v1192_v23 = vadd.f32 %v3689_v62, %v1062_v63  ;;  %v1193_v25 = vadd.f32 %v3690_v1, %v1063_v0  ;;  %v3753_v26 = vsel %vm1356_vm10, 1.0, %v4049_v24  ;;  %v3754_v27 = vsel %vm1357_vm11, 1.0, %v4049_v24 }
  0x7f   :  { %vm1487_vm13 = vcmp.eq.s32.totalorder %v4585_v49, %v4126_v18  ;;  %v3785_v28 = vsel %vm1486_vm12, 1.0, %v4049_v24  ;;  %vm1616_vm14 = vcmp.eq.s32.totalorder %v4580_v40, %v4128_v19  ;;  %vm1617_vm15 = vcmp.eq.s32.totalorder %v4585_v49, %v4128_v19 }
  0x80   :  { %v1322_v30 = vadd.f32 %v3721_v2, %v1192_v23  ;;  %v1323_v41 = vadd.f32 %v3722_v3, %v1193_v25  ;;  %v3786_v44 = vsel %vm1487_vm13, 1.0, %v4049_v24  ;;  %v3817_v46 = vsel %vm1616_vm14, 1.0, %v4049_v24 }
  0x81   :  { %v3818_v47 = vsel %vm1617_vm15, 1.0, %v4049_v24  ;;  %vm1746_vm2 = vcmp.eq.s32.totalorder %v4580_v40, %v4130_v20  ;;  %vm1747_vm3 = vcmp.eq.s32.totalorder %v4585_v49, %v4130_v20  ;;  %vm1876_vm4 = vcmp.eq.s32.totalorder %v4580_v40, %v4132_v21 }
  0x82   :  { %v1452_v48 = vadd.f32 %v3753_v26, %v1322_v30  ;;  %v1453_v29 = vadd.f32 %v3754_v27, %v1323_v41  ;;  %v3849_v45 = vsel %vm1746_vm2, 1.0, %v4049_v24  ;;  %v3850_v50 = vsel %vm1747_vm3, 1.0, %v4049_v24 }
  0x83   :  { %vm1877_vm5 = vcmp.eq.s32.totalorder %v4585_v49, %v4132_v21  ;;  %v3881_v56 = vsel %vm1876_vm4, 1.0, %v4049_v24  ;;  %vm2006_vm6 = vcmp.eq.s32.totalorder %v4580_v40, %v4134_v22  ;;  %vm2007_vm7 = vcmp.eq.s32.totalorder %v4585_v49, %v4134_v22 }
  0x84   :  { %v1582_v57 = vadd.f32 %v3785_v28, %v1452_v48  ;;  %v1583_v58 = vadd.f32 %v3786_v44, %v1453_v29  ;;  %v3882_v59 = vsel %vm1877_vm5, 1.0, %v4049_v24  ;;  %v3913_v15 = vsel %vm2006_vm6, 1.0, %v4049_v24 }
  0x85   :  { %v3914_v61 = vsel %vm2007_vm7, 1.0, %v4049_v24  ;;  %vm72_vm8 = vcmp.eq.s32.totalorder %v4580_v40, %v4242_v36  ;;  %vm73_vm9 = vcmp.eq.s32.totalorder %v4585_v49, %v4242_v36  ;;  %vm202_vm10 = vcmp.eq.s32.totalorder %v4580_v40, %v4244_v37 }
  0x86   :  { %v1712_v16 = vadd.f32 %v3817_v46, %v1582_v57  ;;  %v1713_v60 = vadd.f32 %v3818_v47, %v1583_v58  ;;  %v3449_v62 = vsel %vm72_vm8, 1.0, %v4049_v24  ;;  %v3450_v63 = vsel %vm73_vm9, 1.0, %v4049_v24  ;;  %v2281_v58 = vld [vmem:[%s6308_s2 + $0x18] sm:$0xff] }
  0x87   :  { %vm203_vm11 = vcmp.eq.s32.totalorder %v4585_v49, %v4244_v37  ;;  %v3481_v0 = vsel %vm202_vm10, 1.0, %v4049_v24  ;;  %vm332_vm12 = vcmp.eq.s32.totalorder %v4580_v40, %v4246_v38  ;;  %vm333_vm13 = vcmp.eq.s32.totalorder %v4585_v49, %v4246_v38  ;;  %3939 = vmatmul.msk.f32.gmra.mxu2 %vm2291_vm1, %v2281_v58  ;;  %3949 = vmatmul.msk.f32.gmra.mxu3 %vm2291_vm1, %v2281_v58 }
  0x88   :  { %v1842_v1 = vadd.f32 %v3849_v45, %v1712_v16  ;;  %v1843_v2 = vadd.f32 %v3850_v50, %v1713_v60  ;;  %v3482_v3 = vsel %vm203_vm11, 1.0, %v4049_v24  ;;  %v298_v23 = vadd.f32 %v3481_v0, %v3449_v62 }
  0x89   :  { %v299_v25 = vadd.f32 %v3482_v3, %v3450_v63  ;;  %v3513_v26 = vsel %vm332_vm12, 1.0, %v4049_v24  ;;  %v3514_v27 = vsel %vm333_vm13, 1.0, %v4049_v24  ;;  %vm462_vm14 = vcmp.eq.s32.totalorder %v4580_v40, %v4248_v39 }
  0x8a   :  { %v1972_v28 = vadd.f32 %v3881_v56, %v1842_v1  ;;  %v1973_v30 = vadd.f32 %v3882_v59, %v1843_v2  ;;  %v428_v41 = vadd.f32 %v3513_v26, %v298_v23  ;;  %vm463_vm15 = vcmp.eq.s32.totalorder %v4585_v49, %v4248_v39 }
  0x8b   :  { %v429_v44 = vadd.f32 %v3514_v27, %v299_v25  ;;  %v3545_v46 = vsel %vm462_vm14, 1.0, %v4049_v24  ;;  %v3546_v47 = vsel %vm463_vm15, 1.0, %v4049_v24  ;;  %vm592_vm2 = vcmp.eq.s32.totalorder %v4580_v40, %v4250_v42 }
  0x8c   :  { %v2102_v48 = vadd.f32 %v3913_v15, %v1972_v28  ;;  %v2103_v29 = vadd.f32 %v3914_v61, %v1973_v30  ;;  %v558_v45 = vadd.f32 %v3545_v46, %v428_v41  ;;  %vm593_vm3 = vcmp.eq.s32.totalorder %v4585_v49, %v4250_v42 }
  0x8d   :  { %v559_v50 = vadd.f32 %v3546_v47, %v429_v44  ;;  %v3577_v56 = vsel %vm592_vm2, 1.0, %v4049_v24  ;;  %v3578_v57 = vsel %vm593_vm3, 1.0, %v4049_v24  ;;  %vm722_vm4 = vcmp.eq.s32.totalorder %v4580_v40, %v4252_v43 }
  0x8e   :  { %v2134_v59 = vpack.c.bf16 %v2102_v48, %v2102_v48  ;;  %v2135_v16 = vpack.c.bf16 %v2103_v29, %v2103_v29  ;;  %v688_v15 = vadd.f32 %v3577_v56, %v558_v45  ;;  %vm723_vm5 = vcmp.eq.s32.totalorder %v4585_v49, %v4252_v43 }
  0x8f   :  { %v689_v61 = vadd.f32 %v3578_v57, %v559_v50  ;;  %v3609_v60 = vsel %vm722_vm4, 1.0, %v4049_v24  ;;  %v3610_v62 = vsel %vm723_vm5, 1.0, %v4049_v24  ;;  %vm852_vm6 = vcmp.eq.s32.totalorder %v4580_v40, %v4294_v32 }
  0x90   :  { %v2182_v63 = vunpack.c.l.b16 %v2134_v59  ;;  %v2183_v0 = vunpack.c.l.b16 %v2135_v16  ;;  %v818_v1 = vadd.f32 %v3609_v60, %v688_v15  ;;  %vm853_vm7 = vcmp.eq.s32.totalorder %v4585_v49, %v4294_v32 }
  0x91   :  { %v819_v2 = vadd.f32 %v3610_v62, %v689_v61  ;;  %v3641_v3 = vsel %vm852_vm6, 1.0, %v4049_v24  ;;  %v3642_v23 = vsel %vm853_vm7, 1.0, %v4049_v24  ;;  %vm982_vm8 = vcmp.eq.s32.totalorder %v4580_v40, %v4296_v33 }
  0x92   :  { %v2193_v25 = vpack.c.b16 %v2183_v0, %v2182_v63  ;;  %v948_v26 = vadd.f32 %v3641_v3, %v818_v1  ;;  %vm983_vm9 = vcmp.eq.s32.totalorder %v4585_v49, %v4296_v33  ;;  %v3673_v27 = vsel %vm982_vm8, 1.0, %v4049_v24 }
  0x93   :  { %v949_v28 = vadd.f32 %v3642_v23, %v819_v2  ;;  %v3674_v30 = vsel %vm983_vm9, 1.0, %v4049_v24  ;;  %vm1112_vm10 = vcmp.eq.s32.totalorder %v4580_v40, %v4314_v51  ;;  %vm1113_vm11 = vcmp.eq.s32.totalorder %v4585_v49, %v4314_v51 }
  0x94   :  { %2206 = vmatpush.bf16.xpose.msra.mxu0 %v2193_v25  ;;  %v1078_v41 = vadd.f32 %v3673_v27, %v948_v26  ;;  %v3705_v44 = vsel %vm1112_vm10, 1.0, %v4049_v24  ;;  %v3706_v46 = vsel %vm1113_vm11, 1.0, %v4049_v24  ;;  %vm1242_vm12 = vcmp.eq.s32.totalorder %v4580_v40, %v4316_v52  ;;  %2760 = vmatpush.bf16.msrb.mxu2 %v2193_v25 }
  0x95   :  { %v1079_v47 = vadd.f32 %v3674_v30, %v949_v28  ;;  %vm1243_vm13 = vcmp.eq.s32.totalorder %v4585_v49, %v4316_v52  ;;  %v3737_v48 = vsel %vm1242_vm12, 1.0, %v4049_v24  ;;  %vm1372_vm14 = vcmp.eq.s32.totalorder %v4580_v40, %v4318_v53 }
  0x96   :  { %v1208_v29 = vadd.f32 %v3705_v44, %v1078_v41  ;;  %v3738_v45 = vsel %vm1243_vm13, 1.0, %v4049_v24  ;;  %vm1373_vm15 = vcmp.eq.s32.totalorder %v4585_v49, %v4318_v53  ;;  %v3769_v56 = vsel %vm1372_vm14, 1.0, %v4049_v24 }
  0x97   :  { %v1209_v50 = vadd.f32 %v3706_v46, %v1079_v47  ;;  %vm1502_vm2 = vcmp.eq.s32.totalorder %v4580_v40, %v4320_v54  ;;  %vm1503_vm3 = vcmp.eq.s32.totalorder %v4585_v49, %v4320_v54  ;;  %v3770_v58 = vsel %vm1373_vm15, 1.0, %v4049_v24 }
  0x98   :  { %v1338_v57 = vadd.f32 %v3737_v48, %v1208_v29  ;;  %v3801_v59 = vsel %vm1502_vm2, 1.0, %v4049_v24  ;;  %vm1632_vm4 = vcmp.eq.s32.totalorder %v4580_v40, %v4322_v55  ;;  %v3802_v15 = vsel %vm1503_vm3, 1.0, %v4049_v24 }
  0x99   :  { %v1339_v16 = vadd.f32 %v3738_v45, %v1209_v50  ;;  %vm1633_vm5 = vcmp.eq.s32.totalorder %v4585_v49, %v4322_v55  ;;  %vm1762_vm6 = vcmp.eq.s32.totalorder %v4580_v40, %v4354_v31  ;;  %v3833_v60 = vsel %vm1632_vm4, 1.0, %v4049_v24 }
  0x9a   :  { %v1468_v61 = vadd.f32 %v3769_v56, %v1338_v57  ;;  %v3834_v62 = vsel %vm1633_vm5, 1.0, %v4049_v24  ;;  %vm1763_vm7 = vcmp.eq.s32.totalorder %v4585_v49, %v4354_v31  ;;  %v3865_v0 = vsel %vm1762_vm6, 1.0, %v4049_v24 }
  0x9b   :  { %v1469_v63 = vadd.f32 %v3770_v58, %v1339_v16  ;;  %vm1892_vm8 = vcmp.eq.s32.totalorder %v4580_v40, %v4356_v34  ;;  %vm1893_vm9 = vcmp.eq.s32.totalorder %v4585_v49, %v4356_v34  ;;  %v3866_v2 = vsel %vm1763_vm7, 1.0, %v4049_v24 }
  0x9c   :  { %v1598_v1 = vadd.f32 %v3801_v59, %v1468_v61  ;;  %v3897_v3 = vsel %vm1892_vm8, 1.0, %v4049_v24  ;;  %vm2022_vm10 = vcmp.eq.s32.totalorder %v4580_v40, %v4358_v35  ;;  %v3898_v25 = vsel %vm1893_vm9, 1.0, %v4049_v24 }
  0x9d   :  { %v1599_v23 = vadd.f32 %v3802_v15, %v1469_v63  ;;  %vm2023_vm11 = vcmp.eq.s32.totalorder %v4585_v49, %v4358_v35  ;;  %v4783_v26 = vadd.s32 64, %v4102_v7  ;;  %v3929_v28 = vsel %vm2022_vm10, 1.0, %v4049_v24 }
  0x9e   :  { %v1728_v27 = vadd.f32 %v3833_v60, %v1598_v1  ;;  %v3930_v30 = vsel %vm2023_vm11, 1.0, %v4049_v24  ;;  %v4788_v41 = vadd.s32 72, %v4102_v7 }
  0x9f   :  { %v1729_v44 = vadd.f32 %v3834_v62, %v1599_v23  ;;  %vm54_vm12 = vcmp.eq.s32.totalorder %v4783_v26, %v4096_v4  ;;  %vm184_vm13 = vcmp.eq.s32.totalorder %v4783_v26, %v4098_v5  ;;  %vm314_vm14 = vcmp.eq.s32.totalorder %v4783_v26, %v4100_v6 }
  0xa0   :  { %v1858_v40 = vadd.f32 %v3865_v0, %v1728_v27  ;;  %vm55_vm15 = vcmp.eq.s32.totalorder %v4788_v41, %v4096_v4  ;;  %v3431_v49 = vsel %vm54_vm12, 1.0, %v4049_v24  ;;  %vm185_vm2 = vcmp.eq.s32.totalorder %v4788_v41, %v4098_v5 }
  0xa1   :  { %v1859_v46 = vadd.f32 %v3866_v2, %v1729_v44  ;;  %v3432_v47 = vsel %vm55_vm15, 1.0, %v4049_v24  ;;  %v3463_v48 = vsel %vm184_vm13, 1.0, %v4049_v24  ;;  %v3464_v29 = vsel %vm185_vm2, 1.0, %v4049_v24 }
  0xa2   :  { %v1988_v45 = vadd.f32 %v3897_v3, %v1858_v40  ;;  %v280_v50 = vadd.f32 %v3463_v48, %v3431_v49  ;;  %v281_v56 = vadd.f32 %v3464_v29, %v3432_v47  ;;  %vm315_vm3 = vcmp.eq.s32.totalorder %v4788_v41, %v4100_v6 }
  0xa3   :  { %v1989_v57 = vadd.f32 %v3898_v25, %v1859_v46  ;;  %v3495_v58 = vsel %vm314_vm14, 1.0, %v4049_v24  ;;  %v3496_v59 = vsel %vm315_vm3, 1.0, %v4049_v24  ;;  %vm444_vm4 = vcmp.eq.s32.totalorder %v4783_v26, %v4104_v8 }
  0xa4   :  { %v2118_v16 = vadd.f32 %v3929_v28, %v1988_v45  ;;  %v410_v15 = vadd.f32 %v3495_v58, %v280_v50  ;;  %v411_v61 = vadd.f32 %v3496_v59, %v281_v56  ;;  %vm445_vm5 = vcmp.eq.s32.totalorder %v4788_v41, %v4104_v8 }
  0xa5   :  { %v2119_v60 = vadd.f32 %v3930_v30, %v1989_v57  ;;  %v3527_v62 = vsel %vm444_vm4, 1.0, %v4049_v24  ;;  %v3528_v63 = vsel %vm445_vm5, 1.0, %v4049_v24  ;;  %vm574_vm6 = vcmp.eq.s32.totalorder %v4783_v26, %v4106_v9 }
  0xa6   :  { %v2150_v0 = vpack.c.bf16 %v2118_v16, %v2118_v16  ;;  %v540_v1 = vadd.f32 %v3527_v62, %v410_v15  ;;  %v541_v2 = vadd.f32 %v3528_v63, %v411_v61  ;;  %vm575_vm7 = vcmp.eq.s32.totalorder %v4788_v41, %v4106_v9 }
  0xa7   :  { %v2151_v3 = vpack.c.bf16 %v2119_v60, %v2119_v60  ;;  %v3559_v23 = vsel %vm574_vm6, 1.0, %v4049_v24  ;;  %v3560_v25 = vsel %vm575_vm7, 1.0, %v4049_v24  ;;  %vm704_vm8 = vcmp.eq.s32.totalorder %v4783_v26, %v4108_v10 }
  0xa8   :  { %v2243_v27 = vunpack.c.l.b16 %v2150_v0  ;;  %v670_v28 = vadd.f32 %v3559_v23, %v540_v1  ;;  %v671_v30 = vadd.f32 %v3560_v25, %v541_v2  ;;  %vm705_vm9 = vcmp.eq.s32.totalorder %v4788_v41, %v4108_v10 }
  0xa9   :  { %v2244_v44 = vunpack.c.l.b16 %v2151_v3  ;;  %v3591_v40 = vsel %vm704_vm8, 1.0, %v4049_v24  ;;  %v3592_v49 = vsel %vm705_vm9, 1.0, %v4049_v24  ;;  %vm834_vm10 = vcmp.eq.s32.totalorder %v4783_v26, %v4110_v11 }
  0xaa   :  { %v800_v46 = vadd.f32 %v3591_v40, %v670_v28  ;;  %v801_v47 = vadd.f32 %v3592_v49, %v671_v30  ;;  %vm835_vm11 = vcmp.eq.s32.totalorder %v4788_v41, %v4110_v11  ;;  %v3623_v48 = vsel %vm834_vm10, 1.0, %v4049_v24 }
  0xab   :  { %v2254_v29 = vpack.c.b16 %v2244_v44, %v2243_v27  ;;  %v3624_v45 = vsel %vm835_vm11, 1.0, %v4049_v24  ;;  %vm964_vm12 = vcmp.eq.s32.totalorder %v4783_v26, %v4112_v12  ;;  %vm965_vm13 = vcmp.eq.s32.totalorder %v4788_v41, %v4112_v12 }
  0xac   :  { %v930_v50 = vadd.f32 %v3623_v48, %v800_v46  ;;  %v931_v56 = vadd.f32 %v3624_v45, %v801_v47  ;;  %v3655_v57 = vsel %vm964_vm12, 1.0, %v4049_v24  ;;  %v3656_v58 = vsel %vm965_vm13, 1.0, %v4049_v24 }
  0xad   :  { %2267 = vmatpush.bf16.xpose.msra.mxu1 %v2254_v29  ;;  %vm1094_vm14 = vcmp.eq.s32.totalorder %v4783_v26, %v4114_v13  ;;  %vm1095_vm15 = vcmp.eq.s32.totalorder %v4788_v41, %v4114_v13  ;;  %vm1224_vm2 = vcmp.eq.s32.totalorder %v4783_v26, %v4116_v14  ;;  %vm1225_vm3 = vcmp.eq.s32.totalorder %v4788_v41, %v4116_v14 }
  0xae   :  { %v1060_v59 = vadd.f32 %v3655_v57, %v930_v50  ;;  %v1061_v16 = vadd.f32 %v3656_v58, %v931_v56  ;;  %v3687_v15 = vsel %vm1094_vm14, 1.0, %v4049_v24  ;;  %v3688_v61 = vsel %vm1095_vm15, 1.0, %v4049_v24  ;;  %2794 = vmatpush.bf16.msrb.mxu3 %v2254_v29 }
  0xaf   :  { %v3719_v60 = vsel %vm1224_vm2, 1.0, %v4049_v24  ;;  %v3720_v62 = vsel %vm1225_vm3, 1.0, %v4049_v24  ;;  %vm1354_vm4 = vcmp.eq.s32.totalorder %v4783_v26, %v4124_v17  ;;  %vm1355_vm5 = vcmp.eq.s32.totalorder %v4788_v41, %v4124_v17 }
  0xb0   :  { %v1190_v63 = vadd.f32 %v3687_v15, %v1060_v59  ;;  %v1191_v0 = vadd.f32 %v3688_v61, %v1061_v16  ;;  %v3751_v1 = vsel %vm1354_vm4, 1.0, %v4049_v24  ;;  %v3752_v2 = vsel %vm1355_vm5, 1.0, %v4049_v24 }
  0xb1   :  { %vm1484_vm6 = vcmp.eq.s32.totalorder %v4783_v26, %v4126_v18  ;;  %vm1485_vm7 = vcmp.eq.s32.totalorder %v4788_v41, %v4126_v18  ;;  %vm1614_vm8 = vcmp.eq.s32.totalorder %v4783_v26, %v4128_v19  ;;  %vm1615_vm9 = vcmp.eq.s32.totalorder %v4788_v41, %v4128_v19 }
  0xb2   :  { %v1320_v3 = vadd.f32 %v3719_v60, %v1190_v63  ;;  %v1321_v23 = vadd.f32 %v3720_v62, %v1191_v0  ;;  %v3783_v25 = vsel %vm1484_vm6, 1.0, %v4049_v24  ;;  %v3784_v27 = vsel %vm1485_vm7, 1.0, %v4049_v24 }
  0xb3   :  { %v3815_v28 = vsel %vm1614_vm8, 1.0, %v4049_v24  ;;  %v3816_v30 = vsel %vm1615_vm9, 1.0, %v4049_v24  ;;  %vm1744_vm10 = vcmp.eq.s32.totalorder %v4783_v26, %v4130_v20  ;;  %vm1745_vm11 = vcmp.eq.s32.totalorder %v4788_v41, %v4130_v20 }
  0xb4   :  { %v1450_v44 = vadd.f32 %v3751_v1, %v1320_v3  ;;  %v1451_v40 = vadd.f32 %v3752_v2, %v1321_v23  ;;  %v3847_v49 = vsel %vm1744_vm10, 1.0, %v4049_v24  ;;  %v3848_v46 = vsel %vm1745_vm11, 1.0, %v4049_v24 }
  0xb5   :  { %vm1874_vm12 = vcmp.eq.s32.totalorder %v4783_v26, %v4132_v21  ;;  %vm1875_vm13 = vcmp.eq.s32.totalorder %v4788_v41, %v4132_v21  ;;  %vm2004_vm14 = vcmp.eq.s32.totalorder %v4783_v26, %v4134_v22  ;;  %vm2005_vm15 = vcmp.eq.s32.totalorder %v4788_v41, %v4134_v22 }
  0xb6   :  { %v1580_v47 = vadd.f32 %v3783_v25, %v1450_v44  ;;  %v1581_v48 = vadd.f32 %v3784_v27, %v1451_v40  ;;  %v3879_v29 = vsel %vm1874_vm12, 1.0, %v4049_v24  ;;  %v3880_v45 = vsel %vm1875_vm13, 1.0, %v4049_v24 }
  0xb7   :  { %v3911_v50 = vsel %vm2004_vm14, 1.0, %v4049_v24  ;;  %v3912_v56 = vsel %vm2005_vm15, 1.0, %v4049_v24  ;;  %vm70_vm2 = vcmp.eq.s32.totalorder %v4783_v26, %v4242_v36  ;;  %vm71_vm3 = vcmp.eq.s32.totalorder %v4788_v41, %v4242_v36 }
  0xb8   :  { %v1710_v57 = vadd.f32 %v3815_v28, %v1580_v47  ;;  %v1711_v58 = vadd.f32 %v3816_v30, %v1581_v48  ;;  %v3447_v59 = vsel %vm70_vm2, 1.0, %v4049_v24  ;;  %v3448_v16 = vsel %vm71_vm3, 1.0, %v4049_v24 }
  0xb9   :  { %vm200_vm4 = vcmp.eq.s32.totalorder %v4783_v26, %v4244_v37  ;;  %vm201_vm5 = vcmp.eq.s32.totalorder %v4788_v41, %v4244_v37  ;;  %vm330_vm6 = vcmp.eq.s32.totalorder %v4783_v26, %v4246_v38  ;;  %vm331_vm7 = vcmp.eq.s32.totalorder %v4788_v41, %v4246_v38 }
  0xba   :  { %v1840_v15 = vadd.f32 %v3847_v49, %v1710_v57  ;;  %v1841_v61 = vadd.f32 %v3848_v46, %v1711_v58  ;;  %v3479_v60 = vsel %vm200_vm4, 1.0, %v4049_v24  ;;  %v3480_v62 = vsel %vm201_vm5, 1.0, %v4049_v24 }
  0xbb   :  { %v296_v63 = vadd.f32 %v3479_v60, %v3447_v59  ;;  %v297_v0 = vadd.f32 %v3480_v62, %v3448_v16  ;;  %v3511_v1 = vsel %vm330_vm6, 1.0, %v4049_v24  ;;  %v3512_v2 = vsel %vm331_vm7, 1.0, %v4049_v24 }
  0xbc   :  { %v1970_v3 = vadd.f32 %v3879_v29, %v1840_v15  ;;  %v1971_v23 = vadd.f32 %v3880_v45, %v1841_v61  ;;  %vm460_vm8 = vcmp.eq.s32.totalorder %v4783_v26, %v4248_v39  ;;  %vm461_vm9 = vcmp.eq.s32.totalorder %v4788_v41, %v4248_v39  ;;  %v2282_v29 = vld [vmem:[%s6308_s2 + $0x20] sm:$0xff] }
  0xbd   :  { %v426_v25 = vadd.f32 %v3511_v1, %v296_v63  ;;  %v427_v27 = vadd.f32 %v3512_v2, %v297_v0  ;;  %v3543_v28 = vsel %vm460_vm8, 1.0, %v4049_v24  ;;  %v3544_v30 = vsel %vm461_vm9, 1.0, %v4049_v24  ;;  %3940 = vmatmul.msk.f32.gmra.mxu2 %vm2291_vm1, %v2282_v29  ;;  %3950 = vmatmul.msk.f32.gmra.mxu3 %vm2291_vm1, %v2282_v29 }
  0xbe   :  { %v2100_v44 = vadd.f32 %v3911_v50, %v1970_v3  ;;  %v2101_v40 = vadd.f32 %v3912_v56, %v1971_v23  ;;  %vm590_vm10 = vcmp.eq.s32.totalorder %v4783_v26, %v4250_v42  ;;  %vm591_vm11 = vcmp.eq.s32.totalorder %v4788_v41, %v4250_v42 }
  0xbf   :  { %v556_v49 = vadd.f32 %v3543_v28, %v426_v25  ;;  %v557_v46 = vadd.f32 %v3544_v30, %v427_v27  ;;  %v3575_v47 = vsel %vm590_vm10, 1.0, %v4049_v24  ;;  %v3576_v48 = vsel %vm591_vm11, 1.0, %v4049_v24 }
  0xc0   :  { %v2132_v45 = vpack.c.bf16 %v2100_v44, %v2100_v44  ;;  %v2133_v57 = vpack.c.bf16 %v2101_v40, %v2101_v40  ;;  %vm720_vm12 = vcmp.eq.s32.totalorder %v4783_v26, %v4252_v43  ;;  %vm721_vm13 = vcmp.eq.s32.totalorder %v4788_v41, %v4252_v43 }
  0xc1   :  { %v686_v50 = vadd.f32 %v3575_v47, %v556_v49  ;;  %v687_v56 = vadd.f32 %v3576_v48, %v557_v46  ;;  %v3607_v58 = vsel %vm720_vm12, 1.0, %v4049_v24  ;;  %v3608_v59 = vsel %vm721_vm13, 1.0, %v4049_v24 }
  0xc2   :  { %v2180_v16 = vunpack.c.l.b16 %v2132_v45  ;;  %v2181_v15 = vunpack.c.l.b16 %v2133_v57  ;;  %vm850_vm14 = vcmp.eq.s32.totalorder %v4783_v26, %v4294_v32  ;;  %vm851_vm15 = vcmp.eq.s32.totalorder %v4788_v41, %v4294_v32 }
  0xc3   :  { %v816_v61 = vadd.f32 %v3607_v58, %v686_v50  ;;  %v817_v60 = vadd.f32 %v3608_v59, %v687_v56  ;;  %v3639_v62 = vsel %vm850_vm14, 1.0, %v4049_v24  ;;  %v3640_v63 = vsel %vm851_vm15, 1.0, %v4049_v24 }
  0xc4   :  { %v2192_v0 = vpack.c.b16 %v2181_v15, %v2180_v16  ;;  %vm980_vm2 = vcmp.eq.s32.totalorder %v4783_v26, %v4296_v33  ;;  %vm981_vm3 = vcmp.eq.s32.totalorder %v4788_v41, %v4296_v33  ;;  %vm1110_vm4 = vcmp.eq.s32.totalorder %v4783_v26, %v4314_v51 }
  0xc5   :  { %v946_v1 = vadd.f32 %v3639_v62, %v816_v61  ;;  %v947_v2 = vadd.f32 %v3640_v63, %v817_v60  ;;  %v3671_v3 = vsel %vm980_vm2, 1.0, %v4049_v24  ;;  %v3672_v23 = vsel %vm981_vm3, 1.0, %v4049_v24 }
  0xc6   :  { %2207 = vmatpush.bf16.xpose.msra.mxu0 %v2192_v0  ;;  %vm1111_vm5 = vcmp.eq.s32.totalorder %v4788_v41, %v4314_v51  ;;  %v3703_v25 = vsel %vm1110_vm4, 1.0, %v4049_v24  ;;  %vm1240_vm6 = vcmp.eq.s32.totalorder %v4783_v26, %v4316_v52  ;;  %vm1241_vm7 = vcmp.eq.s32.totalorder %v4788_v41, %v4316_v52  ;;  %2761 = vmatpush.bf16.msrb.mxu2 %v2192_v0 }
  0xc7   :  { %v1076_v27 = vadd.f32 %v3671_v3, %v946_v1  ;;  %v1077_v28 = vadd.f32 %v3672_v23, %v947_v2  ;;  %v3704_v30 = vsel %vm1111_vm5, 1.0, %v4049_v24  ;;  %v3735_v44 = vsel %vm1240_vm6, 1.0, %v4049_v24 }
  0xc8   :  { %v3736_v40 = vsel %vm1241_vm7, 1.0, %v4049_v24  ;;  %vm1370_vm8 = vcmp.eq.s32.totalorder %v4783_v26, %v4318_v53  ;;  %vm1371_vm9 = vcmp.eq.s32.totalorder %v4788_v41, %v4318_v53  ;;  %vm1500_vm10 = vcmp.eq.s32.totalorder %v4783_v26, %v4320_v54 }
  0xc9   :  { %v1206_v49 = vadd.f32 %v3703_v25, %v1076_v27  ;;  %v1207_v46 = vadd.f32 %v3704_v30, %v1077_v28  ;;  %v3767_v47 = vsel %vm1370_vm8, 1.0, %v4049_v24  ;;  %v3768_v48 = vsel %vm1371_vm9, 1.0, %v4049_v24 }
  0xca   :  { %vm1501_vm11 = vcmp.eq.s32.totalorder %v4788_v41, %v4320_v54  ;;  %vm1630_vm12 = vcmp.eq.s32.totalorder %v4783_v26, %v4322_v55  ;;  %vm1631_vm13 = vcmp.eq.s32.totalorder %v4788_v41, %v4322_v55  ;;  %v3799_v57 = vsel %vm1500_vm10, 1.0, %v4049_v24 }
  0xcb   :  { %v1336_v29 = vadd.f32 %v3735_v44, %v1206_v49  ;;  %v1337_v45 = vadd.f32 %v3736_v40, %v1207_v46  ;;  %v3800_v50 = vsel %vm1501_vm11, 1.0, %v4049_v24  ;;  %vm1760_vm14 = vcmp.eq.s32.totalorder %v4783_v26, %v4354_v31 }
  0xcc   :  { %vm1761_vm15 = vcmp.eq.s32.totalorder %v4788_v41, %v4354_v31  ;;  %v3831_v59 = vsel %vm1630_vm12, 1.0, %v4049_v24  ;;  %vm1890_vm2 = vcmp.eq.s32.totalorder %v4783_v26, %v4356_v34  ;;  %v3832_v16 = vsel %vm1631_vm13, 1.0, %v4049_v24 }
  0xcd   :  { %v1466_v56 = vadd.f32 %v3767_v47, %v1336_v29  ;;  %v1467_v58 = vadd.f32 %v3768_v48, %v1337_v45  ;;  %vm1891_vm3 = vcmp.eq.s32.totalorder %v4788_v41, %v4356_v34  ;;  %vm2020_vm4 = vcmp.eq.s32.totalorder %v4783_v26, %v4358_v35 }
  0xce   :  { %vm2021_vm5 = vcmp.eq.s32.totalorder %v4788_v41, %v4358_v35  ;;  %v3863_v60 = vsel %vm1760_vm14, 1.0, %v4049_v24  ;;  %v3864_v62 = vsel %vm1761_vm15, 1.0, %v4049_v24  ;;  %v3895_v63 = vsel %vm1890_vm2, 1.0, %v4049_v24 }
  0xcf   :  { %v1596_v15 = vadd.f32 %v3799_v57, %v1466_v56  ;;  %v1597_v61 = vadd.f32 %v3800_v50, %v1467_v58  ;;  %v3896_v0 = vsel %vm1891_vm3, 1.0, %v4049_v24  ;;  %v4986_v1 = vadd.s32 48, %v4102_v7 }
  0xd0   :  { %v4989_v2 = vadd.s32 56, %v4102_v7  ;;  %v3927_v41 = vsel %vm2020_vm4, 1.0, %v4049_v24  ;;  %v3928_v23 = vsel %vm2021_vm5, 1.0, %v4049_v24 }
  0xd1   :  { %v1726_v26 = vadd.f32 %v3831_v59, %v1596_v15  ;;  %v1727_v3 = vadd.f32 %v3832_v16, %v1597_v61  ;;  %vm52_vm6 = vcmp.eq.s32.totalorder %v4986_v1, %v4096_v4  ;;  %vm182_vm8 = vcmp.eq.s32.totalorder %v4986_v1, %v4098_v5 }
  0xd2   :  { %vm53_vm7 = vcmp.eq.s32.totalorder %v4989_v2, %v4096_v4  ;;  %vm183_vm9 = vcmp.eq.s32.totalorder %v4989_v2, %v4098_v5  ;;  %v3429_v28 = vsel %vm52_vm6, 1.0, %v4049_v24  ;;  %v3461_v44 = vsel %vm182_vm8, 1.0, %v4049_v24 }
  0xd3   :  { %v1856_v25 = vadd.f32 %v3863_v60, %v1726_v26  ;;  %v1857_v27 = vadd.f32 %v3864_v62, %v1727_v3  ;;  %v3430_v30 = vsel %vm53_vm7, 1.0, %v4049_v24  ;;  %v3462_v40 = vsel %vm183_vm9, 1.0, %v4049_v24 }
  0xd4   :  { %vm312_vm10 = vcmp.eq.s32.totalorder %v4986_v1, %v4100_v6  ;;  %vm313_vm11 = vcmp.eq.s32.totalorder %v4989_v2, %v4100_v6  ;;  %v278_v47 = vadd.f32 %v3461_v44, %v3429_v28  ;;  %v279_v48 = vadd.f32 %v3462_v40, %v3430_v30 }
  0xd5   :  { %v1986_v49 = vadd.f32 %v3895_v63, %v1856_v25  ;;  %v1987_v46 = vadd.f32 %v3896_v0, %v1857_v27  ;;  %v3493_v29 = vsel %vm312_vm10, 1.0, %v4049_v24  ;;  %v3494_v45 = vsel %vm313_vm11, 1.0, %v4049_v24 }
  0xd6   :  { %vm442_vm12 = vcmp.eq.s32.totalorder %v4986_v1, %v4104_v8  ;;  %vm443_vm13 = vcmp.eq.s32.totalorder %v4989_v2, %v4104_v8  ;;  %v408_v56 = vadd.f32 %v3493_v29, %v278_v47  ;;  %v409_v58 = vadd.f32 %v3494_v45, %v279_v48 }
  0xd7   :  { %v2116_v57 = vadd.f32 %v3927_v41, %v1986_v49  ;;  %v2117_v50 = vadd.f32 %v3928_v23, %v1987_v46  ;;  %v3525_v59 = vsel %vm442_vm12, 1.0, %v4049_v24  ;;  %v3526_v16 = vsel %vm443_vm13, 1.0, %v4049_v24 }
  0xd8   :  { %vm572_vm14 = vcmp.eq.s32.totalorder %v4986_v1, %v4106_v9  ;;  %vm573_vm15 = vcmp.eq.s32.totalorder %v4989_v2, %v4106_v9  ;;  %v538_v60 = vadd.f32 %v3525_v59, %v408_v56  ;;  %v539_v62 = vadd.f32 %v3526_v16, %v409_v58 }
  0xd9   :  { %v2148_v15 = vpack.c.bf16 %v2116_v57, %v2116_v57  ;;  %v2149_v61 = vpack.c.bf16 %v2117_v50, %v2117_v50  ;;  %v3557_v63 = vsel %vm572_vm14, 1.0, %v4049_v24  ;;  %v3558_v0 = vsel %vm573_vm15, 1.0, %v4049_v24 }
  0xda   :  { %vm702_vm2 = vcmp.eq.s32.totalorder %v4986_v1, %v4108_v10  ;;  %vm703_vm3 = vcmp.eq.s32.totalorder %v4989_v2, %v4108_v10  ;;  %v668_v41 = vadd.f32 %v3557_v63, %v538_v60  ;;  %v669_v23 = vadd.f32 %v3558_v0, %v539_v62 }
  0xdb   :  { %v2241_v26 = vunpack.c.l.b16 %v2148_v15  ;;  %v2242_v3 = vunpack.c.l.b16 %v2149_v61  ;;  %v3589_v25 = vsel %vm702_vm2, 1.0, %v4049_v24  ;;  %v3590_v27 = vsel %vm703_vm3, 1.0, %v4049_v24 }
  0xdc   :  { %vm832_vm4 = vcmp.eq.s32.totalorder %v4986_v1, %v4110_v11  ;;  %vm833_vm5 = vcmp.eq.s32.totalorder %v4989_v2, %v4110_v11  ;;  %v798_v30 = vadd.f32 %v3589_v25, %v668_v41  ;;  %v799_v44 = vadd.f32 %v3590_v27, %v669_v23 }
  0xdd   :  { %v2253_v28 = vpack.c.b16 %v2242_v3, %v2241_v26  ;;  %v3621_v40 = vsel %vm832_vm4, 1.0, %v4049_v24  ;;  %v3622_v49 = vsel %vm833_vm5, 1.0, %v4049_v24  ;;  %vm962_vm6 = vcmp.eq.s32.totalorder %v4986_v1, %v4112_v12 }
  0xde   :  { %vm963_vm7 = vcmp.eq.s32.totalorder %v4989_v2, %v4112_v12  ;;  %vm1092_vm8 = vcmp.eq.s32.totalorder %v4986_v1, %v4114_v13  ;;  %v928_v46 = vadd.f32 %v3621_v40, %v798_v30  ;;  %v929_v47 = vadd.f32 %v3622_v49, %v799_v44 }
  0xdf   :  { %2268 = vmatpush.bf16.xpose.msra.mxu1 %v2253_v28  ;;  %v3653_v48 = vsel %vm962_vm6, 1.0, %v4049_v24  ;;  %v3654_v29 = vsel %vm963_vm7, 1.0, %v4049_v24  ;;  %2795 = vmatpush.bf16.msrb.mxu3 %v2253_v28  ;;  %vm1093_vm9 = vcmp.eq.s32.totalorder %v4989_v2, %v4114_v13  ;;  %v3685_v45 = vsel %vm1092_vm8, 1.0, %v4049_v24 }
  0xe0   :  { %vm1222_vm10 = vcmp.eq.s32.totalorder %v4986_v1, %v4116_v14  ;;  %vm1223_vm11 = vcmp.eq.s32.totalorder %v4989_v2, %v4116_v14  ;;  %v1058_v57 = vadd.f32 %v3653_v48, %v928_v46  ;;  %v1059_v50 = vadd.f32 %v3654_v29, %v929_v47 }
  0xe1   :  { %v3686_v56 = vsel %vm1093_vm9, 1.0, %v4049_v24  ;;  %v3717_v58 = vsel %vm1222_vm10, 1.0, %v4049_v24  ;;  %v3718_v59 = vsel %vm1223_vm11, 1.0, %v4049_v24  ;;  %vm1352_vm12 = vcmp.eq.s32.totalorder %v4986_v1, %v4124_v17 }
  0xe2   :  { %vm1353_vm13 = vcmp.eq.s32.totalorder %v4989_v2, %v4124_v17  ;;  %vm1482_vm14 = vcmp.eq.s32.totalorder %v4986_v1, %v4126_v18  ;;  %v1188_v16 = vadd.f32 %v3685_v45, %v1058_v57  ;;  %v1189_v15 = vadd.f32 %v3686_v56, %v1059_v50 }
  0xe3   :  { %v3749_v61 = vsel %vm1352_vm12, 1.0, %v4049_v24  ;;  %v3750_v60 = vsel %vm1353_vm13, 1.0, %v4049_v24  ;;  %vm1483_vm15 = vcmp.eq.s32.totalorder %v4989_v2, %v4126_v18  ;;  %v3781_v62 = vsel %vm1482_vm14, 1.0, %v4049_v24 }
  0xe4   :  { %vm1612_vm2 = vcmp.eq.s32.totalorder %v4986_v1, %v4128_v19  ;;  %vm1613_vm3 = vcmp.eq.s32.totalorder %v4989_v2, %v4128_v19  ;;  %v1318_v63 = vadd.f32 %v3717_v58, %v1188_v16  ;;  %v1319_v0 = vadd.f32 %v3718_v59, %v1189_v15 }
  0xe5   :  { %v3782_v26 = vsel %vm1483_vm15, 1.0, %v4049_v24  ;;  %v3813_v3 = vsel %vm1612_vm2, 1.0, %v4049_v24  ;;  %v3814_v41 = vsel %vm1613_vm3, 1.0, %v4049_v24  ;;  %vm1742_vm4 = vcmp.eq.s32.totalorder %v4986_v1, %v4130_v20 }
  0xe6   :  { %vm1743_vm5 = vcmp.eq.s32.totalorder %v4989_v2, %v4130_v20  ;;  %vm1872_vm6 = vcmp.eq.s32.totalorder %v4986_v1, %v4132_v21  ;;  %v1448_v23 = vadd.f32 %v3749_v61, %v1318_v63  ;;  %v1449_v25 = vadd.f32 %v3750_v60, %v1319_v0 }
  0xe7   :  { %v3845_v27 = vsel %vm1742_vm4, 1.0, %v4049_v24  ;;  %v3846_v28 = vsel %vm1743_vm5, 1.0, %v4049_v24  ;;  %vm1873_vm7 = vcmp.eq.s32.totalorder %v4989_v2, %v4132_v21  ;;  %v3877_v30 = vsel %vm1872_vm6, 1.0, %v4049_v24 }
  0xe8   :  { %vm2002_vm8 = vcmp.eq.s32.totalorder %v4986_v1, %v4134_v22  ;;  %vm2003_vm9 = vcmp.eq.s32.totalorder %v4989_v2, %v4134_v22  ;;  %v1578_v44 = vadd.f32 %v3781_v62, %v1448_v23  ;;  %v1579_v40 = vadd.f32 %v3782_v26, %v1449_v25 }
  0xe9   :  { %v3878_v49 = vsel %vm1873_vm7, 1.0, %v4049_v24  ;;  %v3909_v46 = vsel %vm2002_vm8, 1.0, %v4049_v24  ;;  %v3910_v47 = vsel %vm2003_vm9, 1.0, %v4049_v24  ;;  %vm68_vm10 = vcmp.eq.s32.totalorder %v4986_v1, %v4242_v36 }
  0xea   :  { %vm69_vm11 = vcmp.eq.s32.totalorder %v4989_v2, %v4242_v36  ;;  %vm198_vm12 = vcmp.eq.s32.totalorder %v4986_v1, %v4244_v37  ;;  %v1708_v48 = vadd.f32 %v3813_v3, %v1578_v44  ;;  %v1709_v29 = vadd.f32 %v3814_v41, %v1579_v40  ;;  %v2283_v40 = vld [vmem:[%s6308_s2 + $0x28] sm:$0xff] }
  0xeb   :  { %v3445_v45 = vsel %vm68_vm10, 1.0, %v4049_v24  ;;  %v3446_v57 = vsel %vm69_vm11, 1.0, %v4049_v24  ;;  %vm199_vm13 = vcmp.eq.s32.totalorder %v4989_v2, %v4244_v37  ;;  %v3477_v50 = vsel %vm198_vm12, 1.0, %v4049_v24  ;;  %3941 = vmatmul.msk.f32.gmra.mxu2 %vm2291_vm1, %v2283_v40  ;;  %3951 = vmatmul.msk.f32.gmra.mxu3 %vm2291_vm1, %v2283_v40 }
  0xec   :  { %vm328_vm14 = vcmp.eq.s32.totalorder %v4986_v1, %v4246_v38  ;;  %vm329_vm15 = vcmp.eq.s32.totalorder %v4989_v2, %v4246_v38  ;;  %v1838_v56 = vadd.f32 %v3845_v27, %v1708_v48  ;;  %v1839_v58 = vadd.f32 %v3846_v28, %v1709_v29 }
  0xed   :  { %v3478_v59 = vsel %vm199_vm13, 1.0, %v4049_v24  ;;  %v294_v16 = vadd.f32 %v3477_v50, %v3445_v45  ;;  %v3509_v61 = vsel %vm328_vm14, 1.0, %v4049_v24  ;;  %v3510_v60 = vsel %vm329_vm15, 1.0, %v4049_v24 }
  0xee   :  { %v295_v15 = vadd.f32 %v3478_v59, %v3446_v57  ;;  %vm458_vm2 = vcmp.eq.s32.totalorder %v4986_v1, %v4248_v39  ;;  %v1968_v62 = vadd.f32 %v3877_v30, %v1838_v56  ;;  %v1969_v63 = vadd.f32 %v3878_v49, %v1839_v58 }
  0xef   :  { %v424_v0 = vadd.f32 %v3509_v61, %v294_v16  ;;  %vm459_vm3 = vcmp.eq.s32.totalorder %v4989_v2, %v4248_v39  ;;  %v3541_v3 = vsel %vm458_vm2, 1.0, %v4049_v24  ;;  %vm588_vm4 = vcmp.eq.s32.totalorder %v4986_v1, %v4250_v42 }
  0xf0   :  { %v425_v26 = vadd.f32 %v3510_v60, %v295_v15  ;;  %v3542_v41 = vsel %vm459_vm3, 1.0, %v4049_v24  ;;  %v2098_v23 = vadd.f32 %v3909_v46, %v1968_v62  ;;  %v2099_v25 = vadd.f32 %v3910_v47, %v1969_v63 }
  0xf1   :  { %v554_v27 = vadd.f32 %v3541_v3, %v424_v0  ;;  %vm589_vm5 = vcmp.eq.s32.totalorder %v4989_v2, %v4250_v42  ;;  %v3573_v30 = vsel %vm588_vm4, 1.0, %v4049_v24  ;;  %vm718_vm6 = vcmp.eq.s32.totalorder %v4986_v1, %v4252_v43 }
  0xf2   :  { %v555_v28 = vadd.f32 %v3542_v41, %v425_v26  ;;  %v3574_v44 = vsel %vm589_vm5, 1.0, %v4049_v24  ;;  %v2130_v49 = vpack.c.bf16 %v2098_v23, %v2098_v23  ;;  %v2131_v48 = vpack.c.bf16 %v2099_v25, %v2099_v25 }
  0xf3   :  { %v684_v46 = vadd.f32 %v3573_v30, %v554_v27  ;;  %vm719_vm7 = vcmp.eq.s32.totalorder %v4989_v2, %v4252_v43  ;;  %v3605_v29 = vsel %vm718_vm6, 1.0, %v4049_v24  ;;  %vm848_vm8 = vcmp.eq.s32.totalorder %v4986_v1, %v4294_v32 }
  0xf4   :  { %v685_v47 = vadd.f32 %v3574_v44, %v555_v28  ;;  %v3606_v45 = vsel %vm719_vm7, 1.0, %v4049_v24  ;;  %v2178_v57 = vunpack.c.l.b16 %v2130_v49  ;;  %v2179_v50 = vunpack.c.l.b16 %v2131_v48 }
  0xf5   :  { %v814_v56 = vadd.f32 %v3605_v29, %v684_v46  ;;  %vm849_vm9 = vcmp.eq.s32.totalorder %v4989_v2, %v4294_v32  ;;  %v3637_v59 = vsel %vm848_vm8, 1.0, %v4049_v24  ;;  %vm978_vm10 = vcmp.eq.s32.totalorder %v4986_v1, %v4296_v33 }
  0xf6   :  { %v815_v58 = vadd.f32 %v3606_v45, %v685_v47  ;;  %v3638_v16 = vsel %vm849_vm9, 1.0, %v4049_v24  ;;  %v2191_v15 = vpack.c.b16 %v2179_v50, %v2178_v57  ;;  %vm979_vm11 = vcmp.eq.s32.totalorder %v4989_v2, %v4296_v33 }
  0xf7   :  { %v944_v61 = vadd.f32 %v3637_v59, %v814_v56  ;;  %v3669_v60 = vsel %vm978_vm10, 1.0, %v4049_v24  ;;  %v3670_v63 = vsel %vm979_vm11, 1.0, %v4049_v24  ;;  %vm1108_vm12 = vcmp.eq.s32.totalorder %v4986_v1, %v4314_v51 }
  0xf8   :  { %v945_v62 = vadd.f32 %v3638_v16, %v815_v58  ;;  %vm1109_vm13 = vcmp.eq.s32.totalorder %v4989_v2, %v4314_v51  ;;  %2208 = vmatpush.bf16.xpose.msra.mxu0 %v2191_v15  ;;  %v3701_v26 = vsel %vm1108_vm12, 1.0, %v4049_v24  ;;  %vm1238_vm14 = vcmp.eq.s32.totalorder %v4986_v1, %v4316_v52  ;;  %2762 = vmatpush.bf16.msrb.mxu2 %v2191_v15 }
  0xf9   :  { %v1074_v0 = vadd.f32 %v3669_v60, %v944_v61  ;;  %v3702_v3 = vsel %vm1109_vm13, 1.0, %v4049_v24  ;;  %vm1239_vm15 = vcmp.eq.s32.totalorder %v4989_v2, %v4316_v52  ;;  %v3733_v23 = vsel %vm1238_vm14, 1.0, %v4049_v24 }
  0xfa   :  { %v1075_v41 = vadd.f32 %v3670_v63, %v945_v62  ;;  %vm1368_vm2 = vcmp.eq.s32.totalorder %v4986_v1, %v4318_v53  ;;  %v3734_v27 = vsel %vm1239_vm15, 1.0, %v4049_v24  ;;  %vm1369_vm3 = vcmp.eq.s32.totalorder %v4989_v2, %v4318_v53 }
  0xfb   :  { %v1204_v25 = vadd.f32 %v3701_v26, %v1074_v0  ;;  %v3765_v30 = vsel %vm1368_vm2, 1.0, %v4049_v24  ;;  %vm1498_vm4 = vcmp.eq.s32.totalorder %v4986_v1, %v4320_v54  ;;  %vm1499_vm5 = vcmp.eq.s32.totalorder %v4989_v2, %v4320_v54 }
  0xfc   :  { %v1205_v28 = vadd.f32 %v3702_v3, %v1075_v41  ;;  %v3766_v40 = vsel %vm1369_vm3, 1.0, %v4049_v24  ;;  %v3797_v49 = vsel %vm1498_vm4, 1.0, %v4049_v24  ;;  %vm1628_vm6 = vcmp.eq.s32.totalorder %v4986_v1, %v4322_v55 }
  0xfd   :  { %v1334_v44 = vadd.f32 %v3733_v23, %v1204_v25  ;;  %v3798_v46 = vsel %vm1499_vm5, 1.0, %v4049_v24  ;;  %vm1629_vm7 = vcmp.eq.s32.totalorder %v4989_v2, %v4322_v55  ;;  %vm1758_vm8 = vcmp.eq.s32.totalorder %v4986_v1, %v4354_v31 }
  0xfe   :  { %v1335_v48 = vadd.f32 %v3734_v27, %v1205_v28  ;;  %v3829_v29 = vsel %vm1628_vm6, 1.0, %v4049_v24  ;;  %v3830_v45 = vsel %vm1629_vm7, 1.0, %v4049_v24  ;;  %vm1759_vm9 = vcmp.eq.s32.totalorder %v4989_v2, %v4354_v31 }
  0xff   :  { %v1464_v47 = vadd.f32 %v3765_v30, %v1334_v44  ;;  %v3861_v50 = vsel %vm1758_vm8, 1.0, %v4049_v24  ;;  %vm1888_vm10 = vcmp.eq.s32.totalorder %v4986_v1, %v4356_v34  ;;  %vm1889_vm11 = vcmp.eq.s32.totalorder %v4989_v2, %v4356_v34 }
 0x100   :  { %v1465_v57 = vadd.f32 %v3766_v40, %v1335_v48  ;;  %v3862_v58 = vsel %vm1759_vm9, 1.0, %v4049_v24  ;;  %v3893_v59 = vsel %vm1888_vm10, 1.0, %v4049_v24  ;;  %vm2018_vm12 = vcmp.eq.s32.totalorder %v4986_v1, %v4358_v35 }
 0x101   :  { %v1594_v56 = vadd.f32 %v3797_v49, %v1464_v47  ;;  %v3894_v15 = vsel %vm1889_vm11, 1.0, %v4049_v24  ;;  %vm2019_vm13 = vcmp.eq.s32.totalorder %v4989_v2, %v4358_v35  ;;  %v5189_v61 = vadd.s32 32, %v4102_v7 }
 0x102   :  { %v1595_v16 = vadd.f32 %v3798_v46, %v1465_v57  ;;  %v3925_v62 = vsel %vm2018_vm12, 1.0, %v4049_v24  ;;  %v3926_v63 = vsel %vm2019_vm13, 1.0, %v4049_v24  ;;  %v5194_v0 = vadd.s32 40, %v4102_v7 }
 0x103   :  { %v1724_v60 = vadd.f32 %v3829_v29, %v1594_v56  ;;  %vm50_vm14 = vcmp.eq.s32.totalorder %v5189_v61, %v4096_v4  ;;  %vm180_vm15 = vcmp.eq.s32.totalorder %v5189_v61, %v4098_v5  ;;  %vm310_vm2 = vcmp.eq.s32.totalorder %v5189_v61, %v4100_v6 }
 0x104   :  { %v1725_v26 = vadd.f32 %v3830_v45, %v1595_v16  ;;  %vm51_vm3 = vcmp.eq.s32.totalorder %v5194_v0, %v4096_v4  ;;  %v3427_v2 = vsel %vm50_vm14, 1.0, %v4049_v24  ;;  %vm181_vm4 = vcmp.eq.s32.totalorder %v5194_v0, %v4098_v5 }
 0x105   :  { %v1854_v1 = vadd.f32 %v3861_v50, %v1724_v60  ;;  %v3428_v41 = vsel %vm51_vm3, 1.0, %v4049_v24  ;;  %v3459_v23 = vsel %vm180_vm15, 1.0, %v4049_v24  ;;  %v3460_v25 = vsel %vm181_vm4, 1.0, %v4049_v24 }
 0x106   :  { %v1855_v3 = vadd.f32 %v3862_v58, %v1725_v26  ;;  %v276_v28 = vadd.f32 %v3459_v23, %v3427_v2  ;;  %v277_v30 = vadd.f32 %v3460_v25, %v3428_v41  ;;  %vm311_vm5 = vcmp.eq.s32.totalorder %v5194_v0, %v4100_v6 }
 0x107   :  { %v1984_v27 = vadd.f32 %v3893_v59, %v1854_v1  ;;  %v3491_v40 = vsel %vm310_vm2, 1.0, %v4049_v24  ;;  %v3492_v49 = vsel %vm311_vm5, 1.0, %v4049_v24  ;;  %vm440_vm6 = vcmp.eq.s32.totalorder %v5189_v61, %v4104_v8 }
 0x108   :  { %v1985_v44 = vadd.f32 %v3894_v15, %v1855_v3  ;;  %v406_v46 = vadd.f32 %v3491_v40, %v276_v28  ;;  %v407_v47 = vadd.f32 %v3492_v49, %v277_v30  ;;  %vm441_vm7 = vcmp.eq.s32.totalorder %v5194_v0, %v4104_v8 }
 0x109   :  { %v2114_v48 = vadd.f32 %v3925_v62, %v1984_v27  ;;  %v3523_v45 = vsel %vm440_vm6, 1.0, %v4049_v24  ;;  %v3524_v57 = vsel %vm441_vm7, 1.0, %v4049_v24  ;;  %vm570_vm8 = vcmp.eq.s32.totalorder %v5189_v61, %v4106_v9 }
 0x10a   :  { %v2115_v29 = vadd.f32 %v3926_v63, %v1985_v44  ;;  %v536_v56 = vadd.f32 %v3523_v45, %v406_v46  ;;  %v537_v58 = vadd.f32 %v3524_v57, %v407_v47  ;;  %vm571_vm9 = vcmp.eq.s32.totalorder %v5194_v0, %v4106_v9 }
 0x10b   :  { %v2146_v50 = vpack.c.bf16 %v2114_v48, %v2114_v48  ;;  %v3555_v16 = vsel %vm570_vm8, 1.0, %v4049_v24  ;;  %v3556_v15 = vsel %vm571_vm9, 1.0, %v4049_v24  ;;  %vm700_vm10 = vcmp.eq.s32.totalorder %v5189_v61, %v4108_v10 }
 0x10c   :  { %v2147_v59 = vpack.c.bf16 %v2115_v29, %v2115_v29  ;;  %v666_v62 = vadd.f32 %v3555_v16, %v536_v56  ;;  %v667_v63 = vadd.f32 %v3556_v15, %v537_v58  ;;  %vm701_vm11 = vcmp.eq.s32.totalorder %v5194_v0, %v4108_v10 }
 0x10d   :  { %v2239_v60 = vunpack.c.l.b16 %v2146_v50  ;;  %v3587_v1 = vsel %vm700_vm10, 1.0, %v4049_v24  ;;  %v3588_v2 = vsel %vm701_vm11, 1.0, %v4049_v24  ;;  %vm830_vm12 = vcmp.eq.s32.totalorder %v5189_v61, %v4110_v11 }
 0x10e   :  { %v2240_v26 = vunpack.c.l.b16 %v2147_v59  ;;  %v796_v3 = vadd.f32 %v3587_v1, %v666_v62  ;;  %v797_v41 = vadd.f32 %v3588_v2, %v667_v63  ;;  %vm831_vm13 = vcmp.eq.s32.totalorder %v5194_v0, %v4110_v11 }
 0x10f   :  { %v3619_v23 = vsel %vm830_vm12, 1.0, %v4049_v24  ;;  %v3620_v27 = vsel %vm831_vm13, 1.0, %v4049_v24  ;;  %vm960_vm14 = vcmp.eq.s32.totalorder %v5189_v61, %v4112_v12  ;;  %vm961_vm15 = vcmp.eq.s32.totalorder %v5194_v0, %v4112_v12 }
 0x110   :  { %v2252_v25 = vpack.c.b16 %v2240_v26, %v2239_v60  ;;  %v926_v28 = vadd.f32 %v3619_v23, %v796_v3  ;;  %v927_v30 = vadd.f32 %v3620_v27, %v797_v41  ;;  %v3651_v44 = vsel %vm960_vm14, 1.0, %v4049_v24 }
 0x111   :  { %v3652_v40 = vsel %vm961_vm15, 1.0, %v4049_v24  ;;  %vm1090_vm2 = vcmp.eq.s32.totalorder %v5189_v61, %v4114_v13  ;;  %vm1091_vm3 = vcmp.eq.s32.totalorder %v5194_v0, %v4114_v13  ;;  %vm1220_vm4 = vcmp.eq.s32.totalorder %v5189_v61, %v4116_v14 }
 0x112   :  { %2269 = vmatpush.bf16.xpose.msra.mxu1 %v2252_v25  ;;  %vm1221_vm5 = vcmp.eq.s32.totalorder %v5194_v0, %v4116_v14  ;;  %v1056_v49 = vadd.f32 %v3651_v44, %v926_v28  ;;  %v1057_v48 = vadd.f32 %v3652_v40, %v927_v30  ;;  %v3683_v46 = vsel %vm1090_vm2, 1.0, %v4049_v24  ;;  %2796 = vmatpush.bf16.msrb.mxu3 %v2252_v25 }
 0x113   :  { %v3684_v47 = vsel %vm1091_vm3, 1.0, %v4049_v24  ;;  %v3715_v29 = vsel %vm1220_vm4, 1.0, %v4049_v24  ;;  %v3716_v45 = vsel %vm1221_vm5, 1.0, %v4049_v24  ;;  %vm1350_vm6 = vcmp.eq.s32.totalorder %v5189_v61, %v4124_v17 }
 0x114   :  { %vm1351_vm7 = vcmp.eq.s32.totalorder %v5194_v0, %v4124_v17  ;;  %v1186_v57 = vadd.f32 %v3683_v46, %v1056_v49  ;;  %v1187_v50 = vadd.f32 %v3684_v47, %v1057_v48  ;;  %v3747_v56 = vsel %vm1350_vm6, 1.0, %v4049_v24 }
 0x115   :  { %v3748_v58 = vsel %vm1351_vm7, 1.0, %v4049_v24  ;;  %vm1480_vm8 = vcmp.eq.s32.totalorder %v5189_v61, %v4126_v18  ;;  %vm1481_vm9 = vcmp.eq.s32.totalorder %v5194_v0, %v4126_v18  ;;  %vm1610_vm10 = vcmp.eq.s32.totalorder %v5189_v61, %v4128_v19 }
 0x116   :  { %vm1611_vm11 = vcmp.eq.s32.totalorder %v5194_v0, %v4128_v19  ;;  %v1316_v59 = vadd.f32 %v3715_v29, %v1186_v57  ;;  %v1317_v16 = vadd.f32 %v3716_v45, %v1187_v50  ;;  %v3779_v15 = vsel %vm1480_vm8, 1.0, %v4049_v24 }
 0x117   :  { %v3780_v60 = vsel %vm1481_vm9, 1.0, %v4049_v24  ;;  %v3811_v62 = vsel %vm1610_vm10, 1.0, %v4049_v24  ;;  %v3812_v63 = vsel %vm1611_vm11, 1.0, %v4049_v24  ;;  %vm1740_vm12 = vcmp.eq.s32.totalorder %v5189_v61, %v4130_v20 }
 0x118   :  { %vm1741_vm13 = vcmp.eq.s32.totalorder %v5194_v0, %v4130_v20  ;;  %v1446_v26 = vadd.f32 %v3747_v56, %v1316_v59  ;;  %v1447_v1 = vadd.f32 %v3748_v58, %v1317_v16  ;;  %v3843_v2 = vsel %vm1740_vm12, 1.0, %v4049_v24 }
 0x119   :  { %v3844_v3 = vsel %vm1741_vm13, 1.0, %v4049_v24  ;;  %vm1870_vm14 = vcmp.eq.s32.totalorder %v5189_v61, %v4132_v21  ;;  %vm1871_vm15 = vcmp.eq.s32.totalorder %v5194_v0, %v4132_v21  ;;  %vm2000_vm2 = vcmp.eq.s32.totalorder %v5189_v61, %v4134_v22 }
 0x11a   :  { %vm2001_vm3 = vcmp.eq.s32.totalorder %v5194_v0, %v4134_v22  ;;  %v1576_v41 = vadd.f32 %v3779_v15, %v1446_v26  ;;  %v1577_v23 = vadd.f32 %v3780_v60, %v1447_v1  ;;  %v3875_v25 = vsel %vm1870_vm14, 1.0, %v4049_v24 }
 0x11b   :  { %v3876_v27 = vsel %vm1871_vm15, 1.0, %v4049_v24  ;;  %v3907_v28 = vsel %vm2000_vm2, 1.0, %v4049_v24  ;;  %v3908_v30 = vsel %vm2001_vm3, 1.0, %v4049_v24  ;;  %vm66_vm4 = vcmp.eq.s32.totalorder %v5189_v61, %v4242_v36 }
 0x11c   :  { %vm67_vm5 = vcmp.eq.s32.totalorder %v5194_v0, %v4242_v36  ;;  %v1706_v44 = vadd.f32 %v3811_v62, %v1576_v41  ;;  %v1707_v40 = vadd.f32 %v3812_v63, %v1577_v23  ;;  %v3443_v49 = vsel %vm66_vm4, 1.0, %v4049_v24 }
 0x11d   :  { %v3444_v48 = vsel %vm67_vm5, 1.0, %v4049_v24  ;;  %vm196_vm6 = vcmp.eq.s32.totalorder %v5189_v61, %v4244_v37  ;;  %vm197_vm7 = vcmp.eq.s32.totalorder %v5194_v0, %v4244_v37  ;;  %vm326_vm8 = vcmp.eq.s32.totalorder %v5189_v61, %v4246_v38 }
 0x11e   :  { %vm327_vm9 = vcmp.eq.s32.totalorder %v5194_v0, %v4246_v38  ;;  %v1836_v46 = vadd.f32 %v3843_v2, %v1706_v44  ;;  %v1837_v47 = vadd.f32 %v3844_v3, %v1707_v40  ;;  %v3475_v29 = vsel %vm196_vm6, 1.0, %v4049_v24 }
 0x11f   :  { %v3476_v45 = vsel %vm197_vm7, 1.0, %v4049_v24  ;;  %v292_v57 = vadd.f32 %v3475_v29, %v3443_v49  ;;  %v3507_v56 = vsel %vm326_vm8, 1.0, %v4049_v24  ;;  %v3508_v58 = vsel %vm327_vm9, 1.0, %v4049_v24 }
 0x120   :  { %v293_v50 = vadd.f32 %v3476_v45, %v3444_v48  ;;  %v1966_v59 = vadd.f32 %v3875_v25, %v1836_v46  ;;  %v1967_v16 = vadd.f32 %v3876_v27, %v1837_v47  ;;  %vm456_vm10 = vcmp.eq.s32.totalorder %v5189_v61, %v4248_v39  ;;  %v2284_v25 = vld [vmem:[%s6308_s2 + $0x30] sm:$0xff] }
 0x121   :  { %vm457_vm11 = vcmp.eq.s32.totalorder %v5194_v0, %v4248_v39  ;;  %v422_v15 = vadd.f32 %v3507_v56, %v292_v57  ;;  %v3539_v62 = vsel %vm456_vm10, 1.0, %v4049_v24  ;;  %vm586_vm12 = vcmp.eq.s32.totalorder %v5189_v61, %v4250_v42  ;;  %3942 = vmatmul.msk.f32.gmra.mxu2 %vm2291_vm1, %v2284_v25  ;;  %3952 = vmatmul.msk.f32.gmra.mxu3 %vm2291_vm1, %v2284_v25 }
 0x122   :  { %v423_v60 = vadd.f32 %v3508_v58, %v293_v50  ;;  %v3540_v63 = vsel %vm457_vm11, 1.0, %v4049_v24  ;;  %v2096_v26 = vadd.f32 %v3907_v28, %v1966_v59  ;;  %v2097_v1 = vadd.f32 %v3908_v30, %v1967_v16 }
 0x123   :  { %vm587_vm13 = vcmp.eq.s32.totalorder %v5194_v0, %v4250_v42  ;;  %v552_v2 = vadd.f32 %v3539_v62, %v422_v15  ;;  %v3571_v41 = vsel %vm586_vm12, 1.0, %v4049_v24  ;;  %vm716_vm14 = vcmp.eq.s32.totalorder %v5189_v61, %v4252_v43 }
 0x124   :  { %v553_v3 = vadd.f32 %v3540_v63, %v423_v60  ;;  %v3572_v23 = vsel %vm587_vm13, 1.0, %v4049_v24  ;;  %v2128_v27 = vpack.c.bf16 %v2096_v26, %v2096_v26  ;;  %v2129_v44 = vpack.c.bf16 %v2097_v1, %v2097_v1 }
 0x125   :  { %vm717_vm15 = vcmp.eq.s32.totalorder %v5194_v0, %v4252_v43  ;;  %v682_v28 = vadd.f32 %v3571_v41, %v552_v2  ;;  %v3603_v40 = vsel %vm716_vm14, 1.0, %v4049_v24  ;;  %vm846_vm2 = vcmp.eq.s32.totalorder %v5189_v61, %v4294_v32 }
 0x126   :  { %v683_v30 = vadd.f32 %v3572_v23, %v553_v3  ;;  %v3604_v49 = vsel %vm717_vm15, 1.0, %v4049_v24  ;;  %v2176_v48 = vunpack.c.l.b16 %v2128_v27  ;;  %v2177_v46 = vunpack.c.l.b16 %v2129_v44 }
 0x127   :  { %vm847_vm3 = vcmp.eq.s32.totalorder %v5194_v0, %v4294_v32  ;;  %v812_v47 = vadd.f32 %v3603_v40, %v682_v28  ;;  %v3635_v45 = vsel %vm846_vm2, 1.0, %v4049_v24  ;;  %vm976_vm4 = vcmp.eq.s32.totalorder %v5189_v61, %v4296_v33 }
 0x128   :  { %v813_v29 = vadd.f32 %v3604_v49, %v683_v30  ;;  %v3636_v57 = vsel %vm847_vm3, 1.0, %v4049_v24  ;;  %v2190_v50 = vpack.c.b16 %v2177_v46, %v2176_v48  ;;  %vm977_vm5 = vcmp.eq.s32.totalorder %v5194_v0, %v4296_v33 }
 0x129   :  { %vm1106_vm6 = vcmp.eq.s32.totalorder %v5189_v61, %v4314_v51  ;;  %v942_v56 = vadd.f32 %v3635_v45, %v812_v47  ;;  %v3667_v59 = vsel %vm976_vm4, 1.0, %v4049_v24  ;;  %v3668_v16 = vsel %vm977_vm5, 1.0, %v4049_v24 }
 0x12a   :  { %v943_v58 = vadd.f32 %v3636_v57, %v813_v29  ;;  %2209 = vmatpush.bf16.xpose.msra.mxu0 %v2190_v50  ;;  %vm1107_vm7 = vcmp.eq.s32.totalorder %v5194_v0, %v4314_v51  ;;  %v3699_v15 = vsel %vm1106_vm6, 1.0, %v4049_v24  ;;  %vm1236_vm8 = vcmp.eq.s32.totalorder %v5189_v61, %v4316_v52  ;;  %2763 = vmatpush.bf16.msrb.mxu2 %v2190_v50 }
 0x12b   :  { %vm1237_vm9 = vcmp.eq.s32.totalorder %v5194_v0, %v4316_v52  ;;  %v1072_v60 = vadd.f32 %v3667_v59, %v942_v56  ;;  %v3700_v63 = vsel %vm1107_vm7, 1.0, %v4049_v24  ;;  %v3731_v26 = vsel %vm1236_vm8, 1.0, %v4049_v24 }
 0x12c   :  { %v1073_v62 = vadd.f32 %v3668_v16, %v943_v58  ;;  %v3732_v1 = vsel %vm1237_vm9, 1.0, %v4049_v24  ;;  %vm1366_vm10 = vcmp.eq.s32.totalorder %v5189_v61, %v4318_v53  ;;  %vm1367_vm11 = vcmp.eq.s32.totalorder %v5194_v0, %v4318_v53 }
 0x12d   :  { %v1202_v2 = vadd.f32 %v3699_v15, %v1072_v60  ;;  %vm1496_vm12 = vcmp.eq.s32.totalorder %v5189_v61, %v4320_v54  ;;  %v3763_v41 = vsel %vm1366_vm10, 1.0, %v4049_v24  ;;  %v3764_v23 = vsel %vm1367_vm11, 1.0, %v4049_v24 }
 0x12e   :  { %v1203_v3 = vadd.f32 %v3700_v63, %v1073_v62  ;;  %vm1497_vm13 = vcmp.eq.s32.totalorder %v5194_v0, %v4320_v54  ;;  %vm1626_vm14 = vcmp.eq.s32.totalorder %v5189_v61, %v4322_v55  ;;  %vm1627_vm15 = vcmp.eq.s32.totalorder %v5194_v0, %v4322_v55 }
 0x12f   :  { %v1332_v25 = vadd.f32 %v3731_v26, %v1202_v2  ;;  %v3795_v44 = vsel %vm1496_vm12, 1.0, %v4049_v24  ;;  %v3796_v28 = vsel %vm1497_vm13, 1.0, %v4049_v24  ;;  %vm1756_vm2 = vcmp.eq.s32.totalorder %v5189_v61, %v4354_v31 }
 0x130   :  { %v1333_v27 = vadd.f32 %v3732_v1, %v1203_v3  ;;  %vm1757_vm3 = vcmp.eq.s32.totalorder %v5194_v0, %v4354_v31  ;;  %v3827_v49 = vsel %vm1626_vm14, 1.0, %v4049_v24  ;;  %vm1886_vm4 = vcmp.eq.s32.totalorder %v5189_v61, %v4356_v34 }
 0x131   :  { %v1462_v30 = vadd.f32 %v3763_v41, %v1332_v25  ;;  %v3828_v48 = vsel %vm1627_vm15, 1.0, %v4049_v24  ;;  %vm1887_vm5 = vcmp.eq.s32.totalorder %v5194_v0, %v4356_v34  ;;  %vm2016_vm6 = vcmp.eq.s32.totalorder %v5189_v61, %v4358_v35 }
 0x132   :  { %v1463_v40 = vadd.f32 %v3764_v23, %v1333_v27  ;;  %vm2017_vm7 = vcmp.eq.s32.totalorder %v5194_v0, %v4358_v35  ;;  %v3859_v29 = vsel %vm1756_vm2, 1.0, %v4049_v24  ;;  %v3860_v45 = vsel %vm1757_vm3, 1.0, %v4049_v24 }
 0x133   :  { %v1592_v46 = vadd.f32 %v3795_v44, %v1462_v30  ;;  %v3891_v57 = vsel %vm1886_vm4, 1.0, %v4049_v24  ;;  %v3892_v50 = vsel %vm1887_vm5, 1.0, %v4049_v24  ;;  %v5392_v56 = vadd.s32 16, %v4102_v7 }
 0x134   :  { %v1593_v47 = vadd.f32 %v3796_v28, %v1463_v40  ;;  %v5395_v58 = vadd.s32 24, %v4102_v7  ;;  %v3923_v0 = vsel %vm2016_vm6, 1.0, %v4049_v24  ;;  %v3924_v16 = vsel %vm2017_vm7, 1.0, %v4049_v24 }
 0x135   :  { %v1722_v61 = vadd.f32 %v3827_v49, %v1592_v46  ;;  %vm48_vm8 = vcmp.eq.s32.totalorder %v5392_v56, %v4096_v4  ;;  %vm178_vm10 = vcmp.eq.s32.totalorder %v5392_v56, %v4098_v5  ;;  %vm308_vm12 = vcmp.eq.s32.totalorder %v5392_v56, %v4100_v6 }
 0x136   :  { %v1723_v59 = vadd.f32 %v3828_v48, %v1593_v47  ;;  %vm49_vm9 = vcmp.eq.s32.totalorder %v5395_v58, %v4096_v4  ;;  %vm179_vm11 = vcmp.eq.s32.totalorder %v5395_v58, %v4098_v5  ;;  %v3425_v62 = vsel %vm48_vm8, 1.0, %v4049_v24 }
 0x137   :  { %v1852_v15 = vadd.f32 %v3859_v29, %v1722_v61  ;;  %v3426_v63 = vsel %vm49_vm9, 1.0, %v4049_v24  ;;  %v3457_v26 = vsel %vm178_vm10, 1.0, %v4049_v24  ;;  %v3458_v1 = vsel %vm179_vm11, 1.0, %v4049_v24 }
 0x138   :  { %v1853_v60 = vadd.f32 %v3860_v45, %v1723_v59  ;;  %vm309_vm13 = vcmp.eq.s32.totalorder %v5395_v58, %v4100_v6  ;;  %v274_v41 = vadd.f32 %v3457_v26, %v3425_v62  ;;  %v275_v23 = vadd.f32 %v3458_v1, %v3426_v63 }
 0x139   :  { %v1982_v2 = vadd.f32 %v3891_v57, %v1852_v15  ;;  %v3489_v25 = vsel %vm308_vm12, 1.0, %v4049_v24  ;;  %v3490_v27 = vsel %vm309_vm13, 1.0, %v4049_v24  ;;  %vm438_vm14 = vcmp.eq.s32.totalorder %v5392_v56, %v4104_v8 }
 0x13a   :  { %v1983_v3 = vadd.f32 %v3892_v50, %v1853_v60  ;;  %vm439_vm15 = vcmp.eq.s32.totalorder %v5395_v58, %v4104_v8  ;;  %v404_v30 = vadd.f32 %v3489_v25, %v274_v41  ;;  %v405_v40 = vadd.f32 %v3490_v27, %v275_v23 }
 0x13b   :  { %v2112_v44 = vadd.f32 %v3923_v0, %v1982_v2  ;;  %v3521_v49 = vsel %vm438_vm14, 1.0, %v4049_v24  ;;  %v3522_v48 = vsel %vm439_vm15, 1.0, %v4049_v24  ;;  %vm568_vm2 = vcmp.eq.s32.totalorder %v5392_v56, %v4106_v9 }
 0x13c   :  { %v2113_v28 = vadd.f32 %v3924_v16, %v1983_v3  ;;  %vm569_vm3 = vcmp.eq.s32.totalorder %v5395_v58, %v4106_v9  ;;  %v534_v29 = vadd.f32 %v3521_v49, %v404_v30  ;;  %v535_v45 = vadd.f32 %v3522_v48, %v405_v40 }
 0x13d   :  { %v2144_v46 = vpack.c.bf16 %v2112_v44, %v2112_v44  ;;  %v3553_v57 = vsel %vm568_vm2, 1.0, %v4049_v24  ;;  %v3554_v50 = vsel %vm569_vm3, 1.0, %v4049_v24  ;;  %vm698_vm4 = vcmp.eq.s32.totalorder %v5392_v56, %v4108_v10 }
 0x13e   :  { %v2145_v47 = vpack.c.bf16 %v2113_v28, %v2113_v28  ;;  %vm699_vm5 = vcmp.eq.s32.totalorder %v5395_v58, %v4108_v10  ;;  %v664_v0 = vadd.f32 %v3553_v57, %v534_v29  ;;  %v665_v16 = vadd.f32 %v3554_v50, %v535_v45 }
 0x13f   :  { %v2237_v61 = vunpack.c.l.b16 %v2144_v46  ;;  %v3585_v15 = vsel %vm698_vm4, 1.0, %v4049_v24  ;;  %v3586_v60 = vsel %vm699_vm5, 1.0, %v4049_v24  ;;  %vm828_vm6 = vcmp.eq.s32.totalorder %v5392_v56, %v4110_v11 }
 0x140   :  { %v2238_v59 = vunpack.c.l.b16 %v2145_v47  ;;  %vm829_vm7 = vcmp.eq.s32.totalorder %v5395_v58, %v4110_v11  ;;  %v794_v63 = vadd.f32 %v3585_v15, %v664_v0  ;;  %v795_v26 = vadd.f32 %v3586_v60, %v665_v16 }
 0x141   :  { %v3617_v1 = vsel %vm828_vm6, 1.0, %v4049_v24  ;;  %v3618_v2 = vsel %vm829_vm7, 1.0, %v4049_v24  ;;  %vm958_vm8 = vcmp.eq.s32.totalorder %v5392_v56, %v4112_v12  ;;  %vm959_vm9 = vcmp.eq.s32.totalorder %v5395_v58, %v4112_v12 }
 0x142   :  { %v2251_v62 = vpack.c.b16 %v2238_v59, %v2237_v61  ;;  %vm1088_vm10 = vcmp.eq.s32.totalorder %v5392_v56, %v4114_v13  ;;  %v924_v3 = vadd.f32 %v3617_v1, %v794_v63  ;;  %v925_v41 = vadd.f32 %v3618_v2, %v795_v26 }
 0x143   :  { %v3649_v23 = vsel %vm958_vm8, 1.0, %v4049_v24  ;;  %v3650_v25 = vsel %vm959_vm9, 1.0, %v4049_v24  ;;  %vm1089_vm11 = vcmp.eq.s32.totalorder %v5395_v58, %v4114_v13  ;;  %v3681_v27 = vsel %vm1088_vm10, 1.0, %v4049_v24 }
 0x144   :  { %2270 = vmatpush.bf16.xpose.msra.mxu1 %v2251_v62  ;;  %2797 = vmatpush.bf16.msrb.mxu3 %v2251_v62  ;;  %vm1218_vm12 = vcmp.eq.s32.totalorder %v5392_v56, %v4116_v14  ;;  %vm1219_vm13 = vcmp.eq.s32.totalorder %v5395_v58, %v4116_v14  ;;  %v1054_v44 = vadd.f32 %v3649_v23, %v924_v3  ;;  %v3682_v30 = vsel %vm1089_vm11, 1.0, %v4049_v24 }
 0x145   :  { %v1055_v28 = vadd.f32 %v3650_v25, %v925_v41  ;;  %v3713_v40 = vsel %vm1218_vm12, 1.0, %v4049_v24  ;;  %v3714_v49 = vsel %vm1219_vm13, 1.0, %v4049_v24  ;;  %vm1348_vm14 = vcmp.eq.s32.totalorder %v5392_v56, %v4124_v17 }
 0x146   :  { %vm1349_vm15 = vcmp.eq.s32.totalorder %v5395_v58, %v4124_v17  ;;  %vm1478_vm2 = vcmp.eq.s32.totalorder %v5392_v56, %v4126_v18  ;;  %v1184_v48 = vadd.f32 %v3681_v27, %v1054_v44  ;;  %v3745_v47 = vsel %vm1348_vm14, 1.0, %v4049_v24 }
 0x147   :  { %v1185_v46 = vadd.f32 %v3682_v30, %v1055_v28  ;;  %v3746_v29 = vsel %vm1349_vm15, 1.0, %v4049_v24  ;;  %vm1479_vm3 = vcmp.eq.s32.totalorder %v5395_v58, %v4126_v18  ;;  %v3777_v45 = vsel %vm1478_vm2, 1.0, %v4049_v24 }
 0x148   :  { %vm1608_vm4 = vcmp.eq.s32.totalorder %v5392_v56, %v4128_v19  ;;  %vm1609_vm5 = vcmp.eq.s32.totalorder %v5395_v58, %v4128_v19  ;;  %v1314_v57 = vadd.f32 %v3713_v40, %v1184_v48  ;;  %v3778_v61 = vsel %vm1479_vm3, 1.0, %v4049_v24 }
 0x149   :  { %v1315_v50 = vadd.f32 %v3714_v49, %v1185_v46  ;;  %v3809_v59 = vsel %vm1608_vm4, 1.0, %v4049_v24  ;;  %v3810_v0 = vsel %vm1609_vm5, 1.0, %v4049_v24  ;;  %vm1738_vm6 = vcmp.eq.s32.totalorder %v5392_v56, %v4130_v20 }
 0x14a   :  { %vm1739_vm7 = vcmp.eq.s32.totalorder %v5395_v58, %v4130_v20  ;;  %vm1868_vm8 = vcmp.eq.s32.totalorder %v5392_v56, %v4132_v21  ;;  %v1444_v16 = vadd.f32 %v3745_v47, %v1314_v57  ;;  %v3841_v60 = vsel %vm1738_vm6, 1.0, %v4049_v24 }
 0x14b   :  { %v1445_v15 = vadd.f32 %v3746_v29, %v1315_v50  ;;  %v3842_v62 = vsel %vm1739_vm7, 1.0, %v4049_v24  ;;  %vm1869_vm9 = vcmp.eq.s32.totalorder %v5395_v58, %v4132_v21  ;;  %v3873_v63 = vsel %vm1868_vm8, 1.0, %v4049_v24 }
 0x14c   :  { %vm1998_vm10 = vcmp.eq.s32.totalorder %v5392_v56, %v4134_v22  ;;  %vm1999_vm11 = vcmp.eq.s32.totalorder %v5395_v58, %v4134_v22  ;;  %v1574_v26 = vadd.f32 %v3777_v45, %v1444_v16  ;;  %v3874_v2 = vsel %vm1869_vm9, 1.0, %v4049_v24 }
 0x14d   :  { %v1575_v1 = vadd.f32 %v3778_v61, %v1445_v15  ;;  %v3905_v3 = vsel %vm1998_vm10, 1.0, %v4049_v24  ;;  %v3906_v41 = vsel %vm1999_vm11, 1.0, %v4049_v24  ;;  %vm64_vm12 = vcmp.eq.s32.totalorder %v5392_v56, %v4242_v36 }
 0x14e   :  { %vm65_vm13 = vcmp.eq.s32.totalorder %v5395_v58, %v4242_v36  ;;  %vm194_vm14 = vcmp.eq.s32.totalorder %v5392_v56, %v4244_v37  ;;  %v1704_v23 = vadd.f32 %v3809_v59, %v1574_v26  ;;  %v3441_v27 = vsel %vm64_vm12, 1.0, %v4049_v24 }
 0x14f   :  { %v1705_v25 = vadd.f32 %v3810_v0, %v1575_v1  ;;  %v3442_v44 = vsel %vm65_vm13, 1.0, %v4049_v24  ;;  %vm195_vm15 = vcmp.eq.s32.totalorder %v5395_v58, %v4244_v37  ;;  %v3473_v28 = vsel %vm194_vm14, 1.0, %v4049_v24  ;;  %v2285_v1 = vld [vmem:[%s6308_s2 + $0x38] sm:$0xff] }
 0x150   :  { %vm324_vm2 = vcmp.eq.s32.totalorder %v5392_v56, %v4246_v38  ;;  %vm325_vm3 = vcmp.eq.s32.totalorder %v5395_v58, %v4246_v38  ;;  %v1834_v30 = vadd.f32 %v3841_v60, %v1704_v23  ;;  %v3474_v49 = vsel %vm195_vm15, 1.0, %v4049_v24  ;;  %3943 = vmatmul.msk.f32.gmra.mxu2 %vm2291_vm1, %v2285_v1  ;;  %3953 = vmatmul.msk.f32.gmra.mxu3 %vm2291_vm1, %v2285_v1 }
 0x151   :  { %v1835_v40 = vadd.f32 %v3842_v62, %v1705_v25  ;;  %v290_v48 = vadd.f32 %v3473_v28, %v3441_v27  ;;  %v291_v46 = vadd.f32 %v3474_v49, %v3442_v44  ;;  %v3505_v47 = vsel %vm324_vm2, 1.0, %v4049_v24 }
 0x152   :  { %v3506_v29 = vsel %vm325_vm3, 1.0, %v4049_v24  ;;  %vm454_vm4 = vcmp.eq.s32.totalorder %v5392_v56, %v4248_v39  ;;  %v1964_v45 = vadd.f32 %v3873_v63, %v1834_v30  ;;  %vm455_vm5 = vcmp.eq.s32.totalorder %v5395_v58, %v4248_v39 }
 0x153   :  { %v1965_v57 = vadd.f32 %v3874_v2, %v1835_v40  ;;  %v420_v50 = vadd.f32 %v3505_v47, %v290_v48  ;;  %v421_v61 = vadd.f32 %v3506_v29, %v291_v46  ;;  %v3537_v59 = vsel %vm454_vm4, 1.0, %v4049_v24 }
 0x154   :  { %v3538_v0 = vsel %vm455_vm5, 1.0, %v4049_v24  ;;  %vm584_vm6 = vcmp.eq.s32.totalorder %v5392_v56, %v4250_v42  ;;  %v2094_v16 = vadd.f32 %v3905_v3, %v1964_v45  ;;  %vm585_vm7 = vcmp.eq.s32.totalorder %v5395_v58, %v4250_v42 }
 0x155   :  { %v2095_v15 = vadd.f32 %v3906_v41, %v1965_v57  ;;  %v550_v60 = vadd.f32 %v3537_v59, %v420_v50  ;;  %v551_v62 = vadd.f32 %v3538_v0, %v421_v61  ;;  %v3569_v63 = vsel %vm584_vm6, 1.0, %v4049_v24 }
 0x156   :  { %v3570_v26 = vsel %vm585_vm7, 1.0, %v4049_v24  ;;  %vm714_vm8 = vcmp.eq.s32.totalorder %v5392_v56, %v4252_v43  ;;  %v2126_v2 = vpack.c.bf16 %v2094_v16, %v2094_v16  ;;  %vm715_vm9 = vcmp.eq.s32.totalorder %v5395_v58, %v4252_v43 }
 0x157   :  { %v2127_v23 = vpack.c.bf16 %v2095_v15, %v2095_v15  ;;  %v680_v3 = vadd.f32 %v3569_v63, %v550_v60  ;;  %v681_v41 = vadd.f32 %v3570_v26, %v551_v62  ;;  %v3601_v25 = vsel %vm714_vm8, 1.0, %v4049_v24 }
 0x158   :  { %v3602_v27 = vsel %vm715_vm9, 1.0, %v4049_v24  ;;  %vm844_vm10 = vcmp.eq.s32.totalorder %v5392_v56, %v4294_v32  ;;  %v2174_v44 = vunpack.c.l.b16 %v2126_v2  ;;  %vm845_vm11 = vcmp.eq.s32.totalorder %v5395_v58, %v4294_v32 }
 0x159   :  { %v2175_v28 = vunpack.c.l.b16 %v2127_v23  ;;  %v810_v30 = vadd.f32 %v3601_v25, %v680_v3  ;;  %v811_v40 = vadd.f32 %v3602_v27, %v681_v41  ;;  %v3633_v49 = vsel %vm844_vm10, 1.0, %v4049_v24 }
 0x15a   :  { %v3634_v48 = vsel %vm845_vm11, 1.0, %v4049_v24  ;;  %vm974_vm12 = vcmp.eq.s32.totalorder %v5392_v56, %v4296_v33  ;;  %vm975_vm13 = vcmp.eq.s32.totalorder %v5395_v58, %v4296_v33  ;;  %vm1104_vm14 = vcmp.eq.s32.totalorder %v5392_v56, %v4314_v51 }
 0x15b   :  { %v2189_v46 = vpack.c.b16 %v2175_v28, %v2174_v44  ;;  %v940_v47 = vadd.f32 %v3633_v49, %v810_v30  ;;  %v3665_v29 = vsel %vm974_vm12, 1.0, %v4049_v24  ;;  %v941_v45 = vadd.f32 %v3634_v48, %v811_v40 }
 0x15c   :  { %v3666_v57 = vsel %vm975_vm13, 1.0, %v4049_v24  ;;  %vm1105_vm15 = vcmp.eq.s32.totalorder %v5395_v58, %v4314_v51  ;;  %v3697_v61 = vsel %vm1104_vm14, 1.0, %v4049_v24  ;;  %vm1234_vm2 = vcmp.eq.s32.totalorder %v5392_v56, %v4316_v52 }
 0x15d   :  { %2210 = vmatpush.bf16.xpose.msra.mxu0 %v2189_v46  ;;  %v1070_v50 = vadd.f32 %v3665_v29, %v940_v47  ;;  %v3698_v59 = vsel %vm1105_vm15, 1.0, %v4049_v24  ;;  %2764 = vmatpush.bf16.msrb.mxu2 %v2189_v46  ;;  %v1071_v0 = vadd.f32 %v3666_v57, %v941_v45  ;;  %vm1235_vm3 = vcmp.eq.s32.totalorder %v5395_v58, %v4316_v52 }
 0x15e   :  { %v3729_v16 = vsel %vm1234_vm2, 1.0, %v4049_v24  ;;  %vm1364_vm4 = vcmp.eq.s32.totalorder %v5392_v56, %v4318_v53  ;;  %v3730_v60 = vsel %vm1235_vm3, 1.0, %v4049_v24  ;;  %vm1365_vm5 = vcmp.eq.s32.totalorder %v5395_v58, %v4318_v53 }
 0x15f   :  { %v1200_v15 = vadd.f32 %v3697_v61, %v1070_v50  ;;  %v3761_v62 = vsel %vm1364_vm4, 1.0, %v4049_v24  ;;  %v1201_v63 = vadd.f32 %v3698_v59, %v1071_v0  ;;  %v3762_v26 = vsel %vm1365_vm5, 1.0, %v4049_v24 }
 0x160   :  { %vm1494_vm6 = vcmp.eq.s32.totalorder %v5392_v56, %v4320_v54  ;;  %vm1495_vm7 = vcmp.eq.s32.totalorder %v5395_v58, %v4320_v54  ;;  %vm1624_vm8 = vcmp.eq.s32.totalorder %v5392_v56, %v4322_v55  ;;  %vm1625_vm9 = vcmp.eq.s32.totalorder %v5395_v58, %v4322_v55 }
 0x161   :  { %v1330_v1 = vadd.f32 %v3729_v16, %v1200_v15  ;;  %v3793_v2 = vsel %vm1494_vm6, 1.0, %v4049_v24  ;;  %v3794_v23 = vsel %vm1495_vm7, 1.0, %v4049_v24  ;;  %v1331_v3 = vadd.f32 %v3730_v60, %v1201_v63 }
 0x162   :  { %v3825_v41 = vsel %vm1624_vm8, 1.0, %v4049_v24  ;;  %vm1754_vm10 = vcmp.eq.s32.totalorder %v5392_v56, %v4354_v31  ;;  %v3826_v27 = vsel %vm1625_vm9, 1.0, %v4049_v24  ;;  %vm1755_vm11 = vcmp.eq.s32.totalorder %v5395_v58, %v4354_v31 }
 0x163   :  { %v1460_v25 = vadd.f32 %v3761_v62, %v1330_v1  ;;  %v3857_v44 = vsel %vm1754_vm10, 1.0, %v4049_v24  ;;  %v1461_v28 = vadd.f32 %v3762_v26, %v1331_v3  ;;  %v3858_v30 = vsel %vm1755_vm11, 1.0, %v4049_v24 }
 0x164   :  { %vm1884_vm12 = vcmp.eq.s32.totalorder %v5392_v56, %v4356_v34  ;;  %vm1885_vm13 = vcmp.eq.s32.totalorder %v5395_v58, %v4356_v34  ;;  %vm2014_vm14 = vcmp.eq.s32.totalorder %v5392_v56, %v4358_v35  ;;  %vm2015_vm15 = vcmp.eq.s32.totalorder %v5395_v58, %v4358_v35 }
 0x165   :  { %v1590_v40 = vadd.f32 %v3793_v2, %v1460_v25  ;;  %v3889_v49 = vsel %vm1884_vm12, 1.0, %v4049_v24  ;;  %v3890_v48 = vsel %vm1885_vm13, 1.0, %v4049_v24  ;;  %v1591_v46 = vadd.f32 %v3794_v23, %v1461_v28 }
 0x166   :  { %v3921_v47 = vsel %vm2014_vm14, 1.0, %v4049_v24  ;;  %v5596_v29 = vadd.s32 8, %v4102_v7  ;;  %v3922_v57 = vsel %vm2015_vm15, 1.0, %v4049_v24  ;;  %vm46_vm2 = vcmp.eq.s32.totalorder %v4102_v7, %v4096_v4 }
 0x167   :  { %v1720_v45 = vadd.f32 %v3825_v41, %v1590_v40  ;;  %vm176_vm3 = vcmp.eq.s32.totalorder %v4102_v7, %v4098_v5  ;;  %v1721_v50 = vadd.f32 %v3826_v27, %v1591_v46  ;;  %v3423_v56 = vsel %vm46_vm2, 1.0, %v4049_v24 }
 0x168   :  { %vm47_vm4 = vcmp.eq.s32.totalorder %v5596_v29, %v4096_v4  ;;  %vm177_vm5 = vcmp.eq.s32.totalorder %v5596_v29, %v4098_v5  ;;  %v3455_v59 = vsel %vm176_vm3, 1.0, %v4049_v24  ;;  %vm306_vm6 = vcmp.eq.s32.totalorder %v4102_v7, %v4100_v6 }
 0x169   :  { %v1850_v58 = vadd.f32 %v3857_v44, %v1720_v45  ;;  %v3424_v61 = vsel %vm47_vm4, 1.0, %v4049_v24  ;;  %v3456_v0 = vsel %vm177_vm5, 1.0, %v4049_v24  ;;  %v1851_v16 = vadd.f32 %v3858_v30, %v1721_v50 }
 0x16a   :  { %v272_v15 = vadd.f32 %v3455_v59, %v3423_v56  ;;  %v273_v60 = vadd.f32 %v3456_v0, %v3424_v61  ;;  %vm307_vm7 = vcmp.eq.s32.totalorder %v5596_v29, %v4100_v6  ;;  %v3487_v4 = vsel %vm306_vm6, 1.0, %v4049_v24 }
 0x16b   :  { %v1980_v62 = vadd.f32 %v3889_v49, %v1850_v58  ;;  %vm436_vm8 = vcmp.eq.s32.totalorder %v4102_v7, %v4104_v8  ;;  %v1981_v5 = vadd.f32 %v3890_v48, %v1851_v16  ;;  %v3488_v63 = vsel %vm307_vm7, 1.0, %v4049_v24 }
 0x16c   :  { %v402_v26 = vadd.f32 %v3487_v4, %v272_v15  ;;  %vm437_vm9 = vcmp.eq.s32.totalorder %v5596_v29, %v4104_v8  ;;  %v403_v2 = vadd.f32 %v3488_v63, %v273_v60  ;;  %v3519_v23 = vsel %vm436_vm8, 1.0, %v4049_v24 }
 0x16d   :  { %v2110_v1 = vadd.f32 %v3921_v47, %v1980_v62  ;;  %v3520_v3 = vsel %vm437_vm9, 1.0, %v4049_v24  ;;  %v2111_v41 = vadd.f32 %v3922_v57, %v1981_v5  ;;  %vm566_vm10 = vcmp.eq.s32.totalorder %v4102_v7, %v4106_v9 }
 0x16e   :  { %v532_v6 = vadd.f32 %v3519_v23, %v402_v26  ;;  %vm567_vm11 = vcmp.eq.s32.totalorder %v5596_v29, %v4106_v9  ;;  %v533_v27 = vadd.f32 %v3520_v3, %v403_v2  ;;  %v3551_v44 = vsel %vm566_vm10, 1.0, %v4049_v24 }
 0x16f   :  { %v2142_v25 = vpack.c.bf16 %v2110_v1, %v2110_v1  ;;  %v3552_v8 = vsel %vm567_vm11, 1.0, %v4049_v24  ;;  %v2143_v28 = vpack.c.bf16 %v2111_v41, %v2111_v41  ;;  %vm696_vm12 = vcmp.eq.s32.totalorder %v4102_v7, %v4108_v10 }
 0x170   :  { %v662_v30 = vadd.f32 %v3551_v44, %v532_v6  ;;  %vm697_vm13 = vcmp.eq.s32.totalorder %v5596_v29, %v4108_v10  ;;  %v663_v49 = vadd.f32 %v3552_v8, %v533_v27  ;;  %v3583_v48 = vsel %vm696_vm12, 1.0, %v4049_v24 }
 0x171   :  { %v2235_v40 = vunpack.c.l.b16 %v2142_v25  ;;  %v3584_v9 = vsel %vm697_vm13, 1.0, %v4049_v24  ;;  %v2236_v46 = vunpack.c.l.b16 %v2143_v28  ;;  %vm826_vm14 = vcmp.eq.s32.totalorder %v4102_v7, %v4110_v11 }
 0x172   :  { %v792_v47 = vadd.f32 %v3583_v48, %v662_v30  ;;  %vm827_vm15 = vcmp.eq.s32.totalorder %v5596_v29, %v4110_v11  ;;  %v793_v45 = vadd.f32 %v3584_v9, %v663_v49  ;;  %v3615_v57 = vsel %vm826_vm14, 1.0, %v4049_v24 }
 0x173   :  { %v3616_v50 = vsel %vm827_vm15, 1.0, %v4049_v24  ;;  %vm956_vm2 = vcmp.eq.s32.totalorder %v4102_v7, %v4112_v12  ;;  %v2250_v10 = vpack.c.b16 %v2236_v46, %v2235_v40  ;;  %vm957_vm3 = vcmp.eq.s32.totalorder %v5596_v29, %v4112_v12 }
 0x174   :  { %v922_v56 = vadd.f32 %v3615_v57, %v792_v47  ;;  %v3647_v58 = vsel %vm956_vm2, 1.0, %v4049_v24  ;;  %v923_v61 = vadd.f32 %v3616_v50, %v793_v45  ;;  %v3648_v59 = vsel %vm957_vm3, 1.0, %v4049_v24 }
 0x175   :  { %vm1086_vm4 = vcmp.eq.s32.totalorder %v4102_v7, %v4114_v13  ;;  %vm1087_vm5 = vcmp.eq.s32.totalorder %v5596_v29, %v4114_v13  ;;  %2271 = vmatpush.bf16.xpose.msra.mxu1 %v2250_v10  ;;  %vm1216_vm6 = vcmp.eq.s32.totalorder %v4102_v7, %v4116_v14  ;;  %2798 = vmatpush.bf16.msrb.mxu3 %v2250_v10 }
 0x176   :  { %v1052_v11 = vadd.f32 %v3647_v58, %v922_v56  ;;  %v3679_v0 = vsel %vm1086_vm4, 1.0, %v4049_v24  ;;  %v3680_v16 = vsel %vm1087_vm5, 1.0, %v4049_v24  ;;  %v1053_v12 = vadd.f32 %v3648_v59, %v923_v61 }
 0x177   :  { %vm1217_vm7 = vcmp.eq.s32.totalorder %v5596_v29, %v4116_v14  ;;  %v3711_v15 = vsel %vm1216_vm6, 1.0, %v4049_v24  ;;  %vm1346_vm8 = vcmp.eq.s32.totalorder %v4102_v7, %v4124_v17  ;;  %vm1347_vm9 = vcmp.eq.s32.totalorder %v5596_v29, %v4124_v17 }
 0x178   :  { %v1182_v13 = vadd.f32 %v3679_v0, %v1052_v11  ;;  %v3712_v60 = vsel %vm1217_vm7, 1.0, %v4049_v24  ;;  %v3743_v62 = vsel %vm1346_vm8, 1.0, %v4049_v24  ;;  %v1183_v4 = vadd.f32 %v3680_v16, %v1053_v12  ;;  %v2286_v11 = vld [vmem:[%s6308_s2 + $0x40] sm:$0xf] }
 0x179   :  { %v3744_v5 = vsel %vm1347_vm9, 1.0, %v4049_v24  ;;  %vm1476_vm10 = vcmp.eq.s32.totalorder %v4102_v7, %v4126_v18  ;;  %vm1477_vm11 = vcmp.eq.s32.totalorder %v5596_v29, %v4126_v18  ;;  %vm1606_vm12 = vcmp.eq.s32.totalorder %v4102_v7, %v4128_v19  ;;  %3944 = vmatmul.msk.f32.gmra.mxu2 %vm2291_vm1, %v2286_v11  ;;  %3954 = vmatmul.msk.f32.gmra.mxu3 %vm2291_vm1, %v2286_v11 }
 0x17a   :  { %v1312_v14 = vadd.f32 %v3711_v15, %v1182_v13  ;;  %v3775_v63 = vsel %vm1476_vm10, 1.0, %v4049_v24  ;;  %v3776_v26 = vsel %vm1477_vm11, 1.0, %v4049_v24  ;;  %v1313_v17 = vadd.f32 %v3712_v60, %v1183_v4 }
 0x17b   :  { %vm1607_vm13 = vcmp.eq.s32.totalorder %v5596_v29, %v4128_v19  ;;  %v3807_v1 = vsel %vm1606_vm12, 1.0, %v4049_v24  ;;  %vm1736_vm14 = vcmp.eq.s32.totalorder %v4102_v7, %v4130_v20  ;;  %vm1737_vm15 = vcmp.eq.s32.totalorder %v5596_v29, %v4130_v20 }
 0x17c   :  { %v1442_v2 = vadd.f32 %v3743_v62, %v1312_v14  ;;  %v3808_v18 = vsel %vm1607_vm13, 1.0, %v4049_v24  ;;  %v3839_v23 = vsel %vm1736_vm14, 1.0, %v4049_v24  ;;  %v1443_v3 = vadd.f32 %v3744_v5, %v1313_v17 }
 0x17d   :  { %v3840_v41 = vsel %vm1737_vm15, 1.0, %v4049_v24  ;;  %vm1866_vm2 = vcmp.eq.s32.totalorder %v4102_v7, %v4132_v21  ;;  %vm1867_vm3 = vcmp.eq.s32.totalorder %v5596_v29, %v4132_v21  ;;  %vm1996_vm4 = vcmp.eq.s32.totalorder %v4102_v7, %v4134_v22 }
 0x17e   :  { %v1572_v19 = vadd.f32 %v3775_v63, %v1442_v2  ;;  %v3871_v6 = vsel %vm1866_vm2, 1.0, %v4049_v24  ;;  %v3872_v25 = vsel %vm1867_vm3, 1.0, %v4049_v24  ;;  %v1573_v20 = vadd.f32 %v3776_v26, %v1443_v3 }
 0x17f   :  { %vm1997_vm5 = vcmp.eq.s32.totalorder %v5596_v29, %v4134_v22  ;;  %v3903_v27 = vsel %vm1996_vm4, 1.0, %v4049_v24  ;;  %vm62_vm6 = vcmp.eq.s32.totalorder %v4102_v7, %v4242_v36  ;;  %vm63_vm7 = vcmp.eq.s32.totalorder %v5596_v29, %v4242_v36 }
 0x180   :  { %v1702_v44 = vadd.f32 %v3807_v1, %v1572_v19  ;;  %v3904_v21 = vsel %vm1997_vm5, 1.0, %v4049_v24  ;;  %v3439_v8 = vsel %vm62_vm6, 1.0, %v4049_v24  ;;  %v1703_v28 = vadd.f32 %v3808_v18, %v1573_v20 }
 0x181   :  { %v3440_v30 = vsel %vm63_vm7, 1.0, %v4049_v24  ;;  %vm192_vm8 = vcmp.eq.s32.totalorder %v4102_v7, %v4244_v37  ;;  %vm193_vm9 = vcmp.eq.s32.totalorder %v5596_v29, %v4244_v37  ;;  %vm322_vm10 = vcmp.eq.s32.totalorder %v4102_v7, %v4246_v38 }
 0x182   :  { %v1832_v22 = vadd.f32 %v3839_v23, %v1702_v44  ;;  %v3471_v40 = vsel %vm192_vm8, 1.0, %v4049_v24  ;;  %v3472_v49 = vsel %vm193_vm9, 1.0, %v4049_v24  ;;  %v1833_v36 = vadd.f32 %v3840_v41, %v1703_v28  ;;  %v5756_v23 = vpop.f32.mrf.mxu3 }
 0x183   :  { %v288_v48 = vadd.f32 %v3471_v40, %v3439_v8  ;;  %v289_v9 = vadd.f32 %v3472_v49, %v3440_v30  ;;  %vm323_vm11 = vcmp.eq.s32.totalorder %v5596_v29, %v4246_v38  ;;  %v3503_v47 = vsel %vm322_vm10, 1.0, %v4049_v24 }
 0x184   :  { %v1962_v46 = vadd.f32 %v3871_v6, %v1832_v22  ;;  %v3504_v45 = vsel %vm323_vm11, 1.0, %v4049_v24  ;;  %vm452_vm12 = vcmp.eq.s32.totalorder %v4102_v7, %v4248_v39  ;;  %v1963_v37 = vadd.f32 %v3872_v25, %v1833_v36 }
 0x185   :  { %v418_v57 = vadd.f32 %v3503_v47, %v288_v48  ;;  %v419_v50 = vadd.f32 %v3504_v45, %v289_v9  ;;  %vm453_vm13 = vcmp.eq.s32.totalorder %v5596_v29, %v4248_v39  ;;  %v3535_v56 = vsel %vm452_vm12, 1.0, %v4049_v24 }
 0x186   :  { %v2092_v10 = vadd.f32 %v3903_v27, %v1962_v46  ;;  %v3536_v58 = vsel %vm453_vm13, 1.0, %v4049_v24  ;;  %vm582_vm14 = vcmp.eq.s32.totalorder %v4102_v7, %v4250_v42  ;;  %v2093_v38 = vadd.f32 %v3904_v21, %v1963_v37 }
 0x187   :  { %v548_v61 = vadd.f32 %v3535_v56, %v418_v57  ;;  %v549_v59 = vadd.f32 %v3536_v58, %v419_v50  ;;  %vm583_vm15 = vcmp.eq.s32.totalorder %v5596_v29, %v4250_v42  ;;  %v3567_v39 = vsel %vm582_vm14, 1.0, %v4049_v24 }
 0x188   :  { %v2124_v0 = vpack.c.bf16 %v2092_v10, %v2092_v10  ;;  %v3568_v16 = vsel %vm583_vm15, 1.0, %v4049_v24  ;;  %vm712_vm2 = vcmp.eq.s32.totalorder %v4102_v7, %v4252_v43  ;;  %v2125_v12 = vpack.c.bf16 %v2093_v38, %v2093_v38 }
 0x189   :  { %v678_v15 = vadd.f32 %v3567_v39, %v548_v61  ;;  %v679_v13 = vadd.f32 %v3568_v16, %v549_v59  ;;  %vm713_vm3 = vcmp.eq.s32.totalorder %v5596_v29, %v4252_v43  ;;  %v3599_v60 = vsel %vm712_vm2, 1.0, %v4049_v24 }
 0x18a   :  { %v2172_v42 = vunpack.c.l.b16 %v2124_v0  ;;  %v3600_v62 = vsel %vm713_vm3, 1.0, %v4049_v24  ;;  %vm842_vm4 = vcmp.eq.s32.totalorder %v4102_v7, %v4294_v32  ;;  %v2173_v4 = vunpack.c.l.b16 %v2125_v12  ;;  %v5788_v49 = vpop.f32.mrf.mxu3 }
 0x18b   :  { %v808_v5 = vadd.f32 %v3599_v60, %v678_v15  ;;  %v809_v14 = vadd.f32 %v3600_v62, %v679_v13  ;;  %vm843_vm5 = vcmp.eq.s32.totalorder %v5596_v29, %v4294_v32  ;;  %v3631_v63 = vsel %vm842_vm4, 1.0, %v4049_v24  ;;  %v5754_v32 = vpop.f32.mrf.mxu2 }
 0x18c   :  { %v3632_v26 = vsel %vm843_vm5, 1.0, %v4049_v24  ;;  %vm972_vm6 = vcmp.eq.s32.totalorder %v4102_v7, %v4296_v33  ;;  %vm973_vm7 = vcmp.eq.s32.totalorder %v5596_v29, %v4296_v33  ;;  %v2188_v43 = vpack.c.b16 %v2173_v4, %v2172_v42 }
 0x18d   :  { %v938_v17 = vadd.f32 %v3631_v63, %v808_v5  ;;  %v939_v1 = vadd.f32 %v3632_v26, %v809_v14  ;;  %v3663_v2 = vsel %vm972_vm6, 1.0, %v4049_v24  ;;  %v3664_v18 = vsel %vm973_vm7, 1.0, %v4049_v24 }
 0x18e   :  { %vm1102_vm8 = vcmp.eq.s32.totalorder %v4102_v7, %v4314_v51  ;;  %vm1103_vm9 = vcmp.eq.s32.totalorder %v5596_v29, %v4314_v51  ;;  %vm1232_vm10 = vcmp.eq.s32.totalorder %v4102_v7, %v4316_v52  ;;  %2211 = vmatpush.bf16.xpose.msra.mxu0 %v2188_v43  ;;  %2765 = vmatpush.bf16.msrb.mxu2 %v2188_v43  ;;  %v4050_v47 = vmov 1065369472  }
 0x18f   :  { %v1068_v33 = vadd.f32 %v3663_v2, %v938_v17  ;;  %v1069_v3 = vadd.f32 %v3664_v18, %v939_v1  ;;  %v3695_v41 = vsel %vm1102_vm8, 1.0, %v4049_v24  ;;  %v3696_v19 = vsel %vm1103_vm9, 1.0, %v4049_v24 }
 0x190   :  { %vm1233_vm11 = vcmp.eq.s32.totalorder %v5596_v29, %v4316_v52  ;;  %v3727_v51 = vsel %vm1232_vm10, 1.0, %v4049_v24  ;;  %vm1362_vm12 = vcmp.eq.s32.totalorder %v4102_v7, %v4318_v53  ;;  %vm1363_vm13 = vcmp.eq.s32.totalorder %v5596_v29, %v4318_v53 }
 0x191   :  { %v1198_v6 = vadd.f32 %v3695_v41, %v1068_v33  ;;  %v1199_v25 = vadd.f32 %v3696_v19, %v1069_v3  ;;  %v3728_v20 = vsel %vm1233_vm11, 1.0, %v4049_v24  ;;  %v3759_v27 = vsel %vm1362_vm12, 1.0, %v4049_v24 }
 0x192   :  { %v3760_v44 = vsel %vm1363_vm13, 1.0, %v4049_v24  ;;  %vm1492_vm14 = vcmp.eq.s32.totalorder %v4102_v7, %v4320_v54  ;;  %vm1493_vm15 = vcmp.eq.s32.totalorder %v5596_v29, %v4320_v54  ;;  %vm1622_vm2 = vcmp.eq.s32.totalorder %v4102_v7, %v4322_v55 }
 0x193   :  { %v1328_v52 = vadd.f32 %v3727_v51, %v1198_v6  ;;  %v1329_v21 = vadd.f32 %v3728_v20, %v1199_v25  ;;  %v3791_v53 = vsel %vm1492_vm14, 1.0, %v4049_v24  ;;  %v3792_v8 = vsel %vm1493_vm15, 1.0, %v4049_v24  ;;  %v5786_v40 = vpop.f32.mrf.mxu2 }
 0x194   :  { %vm1623_vm3 = vcmp.eq.s32.totalorder %v5596_v29, %v4322_v55  ;;  %vm1752_vm4 = vcmp.eq.s32.totalorder %v4102_v7, %v4354_v31  ;;  %vm1753_vm5 = vcmp.eq.s32.totalorder %v5596_v29, %v4354_v31  ;;  %v3823_v54 = vsel %vm1622_vm2, 1.0, %v4049_v24 }
 0x195   :  { %v1458_v28 = vadd.f32 %v3759_v27, %v1328_v52  ;;  %v1459_v30 = vadd.f32 %v3760_v44, %v1329_v21  ;;  %v3824_v22 = vsel %vm1623_vm3, 1.0, %v4049_v24  ;;  %vm1882_vm6 = vcmp.eq.s32.totalorder %v4102_v7, %v4356_v34  ;;  %2212 = vmatmul.bf16.vlgmr.msra.gmra.mxu0 %v4050_v47 }
 0x196   :  { %vm1883_vm7 = vcmp.eq.s32.totalorder %v5596_v29, %v4356_v34  ;;  %v3855_v55 = vsel %vm1752_vm4, 1.0, %v4049_v24  ;;  %v3856_v31 = vsel %vm1753_vm5, 1.0, %v4049_v24  ;;  %vm2012_vm8 = vcmp.eq.s32.totalorder %v4102_v7, %v4358_v35  ;;  %v5806_v7 = vpop.f32.mrf.mxu3 }
 0x197   :  { %v1588_v36 = vadd.f32 %v3791_v53, %v1458_v28  ;;  %v1589_v48 = vadd.f32 %v3792_v8, %v1459_v30  ;;  %vm2013_vm9 = vcmp.eq.s32.totalorder %v5596_v29, %v4358_v35  ;;  %v3887_v45 = vsel %vm1882_vm6, 1.0, %v4049_v24 }
 0x198   :  { %v3888_v37 = vsel %vm1883_vm7, 1.0, %v4049_v24  ;;  %v3919_v50 = vsel %vm2012_vm8, 1.0, %v4049_v24  ;;  %v3920_v10 = vsel %vm2013_vm9, 1.0, %v4049_v24 }
 0x199   :  { %v1718_v9 = vadd.f32 %v3823_v54, %v1588_v36  ;;  %v1719_v46 = vadd.f32 %v3824_v22, %v1589_v48 }
 0x19b   :  { %v1848_v57 = vadd.f32 %v3855_v55, %v1718_v9  ;;  %v1849_v34 = vadd.f32 %v3856_v31, %v1719_v46  ;;  %v5804_v38 = vpop.f32.mrf.mxu2 }
 0x19d   :  { %v1978_v56 = vadd.f32 %v3887_v45, %v1848_v57  ;;  %v1979_v58 = vadd.f32 %v3888_v37, %v1849_v34 }
 0x19e   :  { %v5810_v12 = vpop.f32.mrf.mxu3 }
 0x19f   :  { %v2108_v61 = vadd.f32 %v3919_v50, %v1978_v56  ;;  %v2109_v35 = vadd.f32 %v3920_v10, %v1979_v58 }
 0x1a1   :  { %v2140_v29 = vpack.c.bf16 %v2108_v61, %v2108_v61  ;;  %v2141_v59 = vpack.c.bf16 %v2109_v35, %v2109_v35 }
 0x1a3   :  { %v2233_v11 = vunpack.c.l.b16 %v2140_v29  ;;  %v2234_v0 = vunpack.c.l.b16 %v2141_v59  ;;  %v5808_v16 = vpop.f32.mrf.mxu2 }
 0x1a5   :  { %v2249_v39 = vpack.c.b16 %v2234_v0, %v2233_v11  ;;  %v2909_v0 = vadd.f32 %v5806_v7, %v5804_v38 }
 0x1a6   :  { %v5814_v15 = vpop.f32.mrf.mxu3 }
 0x1a7   :  { %2272 = vmatpush.bf16.xpose.msra.mxu1 %v2249_v39  ;;  %2799 = vmatpush.bf16.msrb.mxu3 %v2249_v39  ;;  %v2413_v60 = vmul.f32 %v5814_v15, %v5814_v15 }
 0x1ab   :  { %v5812_v24 = vpop.f32.mrf.mxu2 }
 0x1ac   :  { %v2478_v13 = vadd.f32 %v5814_v15, %v5812_v24  ;;  %v2412_v42 = vmul.f32 %v5812_v24, %v5812_v24 }
 0x1ae   :  { %2273 = vmatmul.bf16.vlgmr.msra.gmra.mxu1 %v4050_v47  ;;  %2479 = vadd.xlane.f32.xlu1 %v2478_v13  ;;  %v2495_v62 = vadd.f32 %v2413_v60, %v2412_v42  ;;  %v5824_v5 = vpop.f32.mrf.mxu3 }
 0x1af   :  { %v2415_v26 = vmul.f32 %v5824_v5, %v5824_v5 }
 0x1b0   :  { %2496 = vadd.xlane.f32.xlu0 %v2495_v62 }
 0x1b3   :  { %v5822_v4 = vpop.f32.mrf.mxu2 }
 0x1b4   :  { %v2481_v14 = vadd.f32 %v5824_v5, %v5822_v4  ;;  %v2414_v63 = vmul.f32 %v5822_v4, %v5822_v4 }
 0x1b6   :  { %2482 = vadd.xlane.f32.xlu1 %v2481_v14  ;;  %v2498_v43 = vadd.f32 %v2415_v26, %v2414_v63  ;;  %v5834_v1 = vpop.f32.mrf.mxu3 }
 0x1b7   :  { %v2417_v13 = vmul.f32 %v5834_v1, %v5834_v1 }
 0x1bb   :  { %v5832_v17 = vpop.f32.mrf.mxu2 }
 0x1bc   :  { %v2484_v2 = vadd.f32 %v5834_v1, %v5832_v17  ;;  %v2416_v39 = vmul.f32 %v5832_v17, %v5832_v17 }
 0x1be   :  { %2499 = vadd.xlane.f32.xlu1 %v2498_v43  ;;  %v2906_v43 = vadd.f32 %v5788_v49, %v5786_v40 }
 0x1c6   :  { %2485 = vadd.xlane.f32.xlu1 %v2484_v2 }
 0x1d3   :  { %v5838_v18 = vpop.f32.mrf.mxu2  ;;  %v5840_v33 = vpop.f32.mrf.mxu3 }
 0x1d4   :  { %v2487_v3 = vadd.f32 %v5840_v33, %v5838_v18  ;;  %v2418_v6 = vmul.f32 %v5838_v18, %v5838_v18  ;;  %v2419_v25 = vmul.f32 %v5840_v33, %v5840_v33 }
 0x1d6   :  { %2488 = vadd.xlane.f32.xlu2 %v2487_v3 }
 0x1fc   :  { %v5850_v36 = vpop.f32.mrf.mxu2  ;;  %v5852_v48 = vpop.f32.mrf.mxu3 }
 0x1fd   :  { %v2420_v62 = vmul.f32 %v5850_v36, %v5850_v36  ;;  %v2421_v14 = vmul.f32 %v5852_v48, %v5852_v48 }
 0x212   :  { %v2213_v41 = vpop.f32.mrf.mxu0 }
 0x213   :  { %v2422_v51 = vperm.slane %v2213_v41, 0  ;;  %v2944_v41 = vmul.f32 %v5786_v40, %v5786_v40 }
 0x215   :  { %v2424_v44 = vmul.f32 %v2422_v51, %v5812_v24  ;;  %v2451_v52 = vmul.f32 %v2422_v51, %v2412_v42  ;;  %v2457_v21 = vmul.f32 %v2422_v51, %v2418_v6  ;;  %v2432_v55 = vmul.f32 %v2422_v51, %v5850_v36 }
 0x216   :  { %v2426_v46 = vmul.f32 %v2422_v51, %v5822_v4  ;;  %v2453_v45 = vmul.f32 %v2422_v51, %v2414_v63  ;;  %v2428_v58 = vmul.f32 %v2422_v51, %v5832_v17  ;;  %v2430_v35 = vmul.f32 %v2422_v51, %v5838_v18 }
 0x217   :  { %v2446_v57 = vsel %vm2319_vm0, %v2432_v55, 0.0  ;;  %v2455_v42 = vmul.f32 %v2422_v51, %v2416_v39  ;;  %v2501_v63 = vadd.f32 %v2417_v13, %v2416_v39  ;;  %v2459_v2 = vmul.f32 %v2422_v51, %v2420_v62 }
 0x218   :  { %v2912_v51 = vadd.f32 %v5810_v12, %v5808_v16  ;;  %v4051_v55 = vmov 4352.0  }
 0x219   :  { %3983 = vrcp.f32 %v4051_v55 }
 0x21a   :  { %v2215_v19 = vpop.f32.mrf.mxu0 }
 0x21b   :  { %v2945_v19 = vmul.f32 %v5788_v49, %v5788_v49 }
 0x22b   :  { %v2274_v20 = vpop.f32.mrf.mxu1 }
 0x22c   :  { %v2423_v27 = vperm.slane %v2274_v20, 0  ;;  %v2473_v20 = vsel %vm2319_vm0, %v2459_v2, 0.0 }
 0x22e   :  { %v2425_v53 = vmul.f32 %v2423_v27, %v5814_v15  ;;  %v2452_v8 = vmul.f32 %v2423_v27, %v2413_v60  ;;  %v2458_v28 = vmul.f32 %v2423_v27, %v2419_v25  ;;  %v2433_v31 = vmul.f32 %v2423_v27, %v5852_v48 }
 0x22f   :  { %v2427_v47 = vmul.f32 %v2423_v27, %v5824_v5  ;;  %v2454_v37 = vmul.f32 %v2423_v27, %v2415_v26  ;;  %v2429_v61 = vmul.f32 %v2423_v27, %v5834_v1  ;;  %v2431_v29 = vmul.f32 %v2423_v27, %v5840_v33 }
 0x230   :  { %v2434_v30 = vadd.f32 %v2425_v53, %v2424_v44  ;;  %v2461_v54 = vadd.f32 %v2452_v8, %v2451_v52  ;;  %v2470_v22 = vadd.f32 %v2458_v28, %v2457_v21  ;;  %v2447_v34 = vsel %vm2319_vm0, %v2433_v31, 0.0  ;;  %v3984_v31 = vpop.eup %3983 }
 0x231   :  { %v2437_v50 = vadd.f32 %v2427_v47, %v2426_v46  ;;  %v2464_v10 = vadd.f32 %v2454_v37, %v2453_v45  ;;  %v2448_v56 = vadd.f32 %v2447_v34, %v2446_v57  ;;  %v2440_v59 = vadd.f32 %v2429_v61, %v2428_v58  ;;  %v2497_v37 = vpop.xlane.xlu0 %2496 }
 0x232   :  { %2435 = vadd.xlane.f32.xlu0 %v2434_v30  ;;  %2462 = vadd.xlane.f32.xlu2 %v2461_v54  ;;  %v2443_v11 = vadd.f32 %v2431_v29, %v2430_v35  ;;  %v2456_v60 = vmul.f32 %v2423_v27, %v2417_v13  ;;  %v2460_v3 = vmul.f32 %v2423_v27, %v2421_v14  ;;  %vm2538_vm10 = vweird.f32 %v3984_v31 }
 0x233   :  { %2471 = vadd.xlane.f32.xlu1 %v2470_v22  ;;  %v2276_v9 = vpop.f32.mrf.mxu1  ;;  %v2504_v52 = vadd.f32 %v2419_v25, %v2418_v6  ;;  %v2961_v53 = vadd.f32 %v2945_v19, %v2944_v41  ;;  %v2903_v27 = vadd.f32 %v5756_v23, %v5754_v32  ;;  %v2948_v8 = vmul.f32 %v5808_v16, %v5808_v16  ;;  %v2480_v22 = vpop.xlane.xlu1 %2479 }
 0x234   :  { %v2467_v26 = vadd.f32 %v2456_v60, %v2455_v42  ;;  %v2474_v44 = vsel %vm2319_vm0, %v2460_v3, 0.0  ;;  %v2949_v28 = vmul.f32 %v5810_v12, %v5810_v12  ;;  %v2946_v25 = vmul.f32 %v5804_v38, %v5804_v38 }
 0x235   :  { %v2475_v21 = vadd.f32 %v2474_v44, %v2473_v20  ;;  %v2947_v30 = vmul.f32 %v5806_v7, %v5806_v7  ;;  %v2533_v9 = vmul.f32 4352.0, %v3984_v31  ;;  %v4052_v29 = vmov 4096.0  }
 0x236   :  { %v2967_v6 = vadd.f32 %v2949_v28, %v2948_v8  ;;  %3985 = vrcp.f32 %v4052_v29 }
 0x237   :  { %v2964_v54 = vadd.f32 %v2947_v30, %v2946_v25  ;;  %v2534_v47 = vsub.f32 1.0, %v2533_v9 }
 0x239   :  { %v2535_v57 = vmul.f32 %v3984_v31, %v2534_v47 }
 0x23a   :  { %2438 = vadd.xlane.f32.xlu0 %v2437_v50  ;;  %2465 = vadd.xlane.f32.xlu2 %v2464_v10 }
 0x23b   :  { %2449 = vadd.xlane.f32.xlu1 %v2448_v56  ;;  %v2483_v46 = vpop.xlane.xlu1 %2482  ;;  %v2536_v50 = vadd.f32 %v3984_v31, %v2535_v57 }
 0x23c   :  { %v3986_v13 = vpop.eup %3985 }
 0x23d   :  { %v5894_v10 = vsel %vm2538_vm10, %v3984_v31, %v2536_v50  ;;  %vm2598_vm11 = vweird.f32 %v3986_v13 }
 0x242   :  { %2441 = vadd.xlane.f32.xlu2 %v2440_v59  ;;  %2444 = vadd.xlane.f32.xlu0 %v2443_v11 }
 0x243   :  { %2910 = vadd.xlane.f32.xlu1 %v2909_v0  ;;  %v2500_v34 = vpop.xlane.xlu1 %2499 }
 0x249   :  { %v2489_v45 = vpop.xlane.xlu2 %2488 }
 0x24a   :  { %2502 = vadd.xlane.f32.xlu2 %v2501_v63  ;;  %2468 = vadd.xlane.f32.xlu0 %v2467_v26 }
 0x24b   :  { %2907 = vadd.xlane.f32.xlu1 %v2906_v43  ;;  %v2486_v11 = vpop.xlane.xlu1 %2485  ;;  %v2593_v43 = vmul.f32 4096.0, %v3986_v13 }
 0x24d   :  { %v2594_v19 = vsub.f32 1.0, %v2593_v43 }
 0x24f   :  { %v2595_v8 = vmul.f32 %v3986_v13, %v2594_v19 }
 0x251   :  { %v2596_v30 = vadd.f32 %v3986_v13, %v2595_v8 }
 0x252   :  { %2505 = vadd.xlane.f32.xlu0 %v2504_v52  ;;  %2476 = vadd.xlane.f32.xlu2 %v2475_v21 }
 0x253   :  { %2962 = vadd.xlane.f32.xlu1 %v2961_v53  ;;  %v2600_v57 = vsel %vm2598_vm11, %v3986_v13, %v2596_v30 }
 0x25a   :  { %2913 = vadd.xlane.f32.xlu0 %v2912_v51  ;;  %2904 = vadd.xlane.f32.xlu2 %v2903_v27 }
 0x262   :  { %2968 = vadd.xlane.f32.xlu0 %v2967_v6 }
 0x26a   :  { %2965 = vadd.xlane.f32.xlu0 %v2964_v54 }
 0x2a5   :  { %v2436_v56 = vpop.xlane.xlu0 %2435  ;;  %v2463_v58 = vpop.xlane.xlu2 %2462 }
 0x2a6   :  { %v2527_v61 = vadd.f32 %v2480_v22, %v2436_v56  ;;  %v2612_v35 = vadd.f32 %v2497_v37, %v2463_v58  ;;  %v2472_v20 = vpop.xlane.xlu1 %2471 }
 0x2a8   :  { %v2546_v59 = vmul.f32 %v5894_v10, %v2527_v61  ;;  %v2617_v39 = vmul.f32 %v2612_v35, %v5894_v10 }
 0x2aa   :  { %v2622_v0 = vmul.f32 %v2546_v59, %v2546_v59 }
 0x2ac   :  { %v2627_v42 = vsub.f32 %v2617_v39, %v2622_v0  ;;  %v2687_v0 = vsub.f32 %v5812_v24, %v2546_v59  ;;  %v2688_v39 = vsub.f32 %v5814_v15, %v2546_v59 }
 0x2ad   :  { %v2439_v60 = vpop.xlane.xlu0 %2438  ;;  %v2466_v62 = vpop.xlane.xlu2 %2465 }
 0x2ae   :  { %v2632_v14 = vadd.f32 1e-06, %v2627_v42  ;;  %v2528_v63 = vadd.f32 %v2483_v46, %v2439_v60  ;;  %v2613_v26 = vadd.f32 %v2500_v34, %v2466_v62  ;;  %v2450_v34 = vpop.xlane.xlu1 %2449 }
 0x2af   :  { %v5910_v29 = vmul.f32 %v2600_v57, %v2450_v34 }
 0x2b0   :  { %3987 = vrsqrt.f32 %v2632_v14  ;;  %v5899_v2 = vmul.f32 %v5894_v10, %v2528_v63  ;;  %v2618_v41 = vmul.f32 %v2613_v26, %v5894_v10  ;;  %vm2643_vm13 = vweird.f32 %v2632_v14 }
 0x2b2   :  { %v2623_v3 = vmul.f32 %v5899_v2, %v5899_v2  ;;  %v2689_v24 = vsub.f32 %v5822_v4, %v5899_v2  ;;  %v2690_v59 = vsub.f32 %v5824_v5, %v5899_v2 }
 0x2b4   :  { %v2628_v44 = vsub.f32 %v2618_v41, %v2623_v3  ;;  %v2626_v3 = vmul.f32 %v5910_v29, %v5910_v29 }
 0x2b5   :  { %v2442_v52 = vpop.xlane.xlu2 %2441  ;;  %v2445_v21 = vpop.xlane.xlu0 %2444 }
 0x2b6   :  { %v3988_v53 = vpop.eup %3987  ;;  %v2633_v51 = vadd.f32 1e-06, %v2628_v44  ;;  %v2529_v28 = vadd.f32 %v2486_v11, %v2442_v52  ;;  %v2530_v50 = vadd.f32 %v2489_v45, %v2445_v21 }
 0x2b7   :  { %v2638_v27 = vmul.f32 %v3988_v53, %v2632_v14  ;;  %vm2644_vm12 = vweird.f32 %v3988_v53 }
 0x2b8   :  { %3989 = vrsqrt.f32 %v2633_v51  ;;  %v5905_v54 = vmul.f32 %v5894_v10, %v2529_v28  ;;  %vm2645_vm14 = vmor %vm2643_vm13, %vm2644_vm12  ;;  %v5915_v13 = vmul.f32 %v5894_v10, %v2530_v50  ;;  %vm2653_vm2 = vweird.f32 %v2633_v51 }
 0x2b9   :  { %v2639_v6 = vmul.f32 %v3988_v53, %v2638_v27 }
 0x2ba   :  { %v2624_v56 = vmul.f32 %v5905_v54, %v5905_v54  ;;  %v2625_v19 = vmul.f32 %v5915_v13, %v5915_v13 }
 0x2bb   :  { %v2640_v25 = vmul.f32 0.5, %v2639_v6 }
 0x2bd   :  { %v2641_v22 = vsub.f32 1.5, %v2640_v25  ;;  %v2503_v55 = vpop.xlane.xlu2 %2502  ;;  %v2469_v31 = vpop.xlane.xlu0 %2468 }
 0x2be   :  { %v3990_v9 = vpop.eup %3989  ;;  %v2614_v46 = vadd.f32 %v2503_v55, %v2469_v31 }
 0x2bf   :  { %v2642_v47 = vmul.f32 %v3988_v53, %v2641_v22  ;;  %v2648_v37 = vmul.f32 %v3990_v9, %v2633_v51  ;;  %vm2654_vm15 = vweird.f32 %v3990_v9 }
 0x2c0   :  { %v2619_v58 = vmul.f32 %v2614_v46, %v5894_v10  ;;  %vm2655_vm3 = vmor %vm2653_vm2, %vm2654_vm15 }
 0x2c1   :  { %v2649_v61 = vmul.f32 %v3990_v9, %v2648_v37  ;;  %v2646_v35 = vsel %vm2645_vm14, %v3988_v53, %v2642_v47 }
 0x2c2   :  { %v2629_v11 = vsub.f32 %v2619_v58, %v2624_v56  ;;  %v2697_v63 = vmul.f32 %v2687_v0, %v2646_v35  ;;  %v2698_v26 = vmul.f32 %v2688_v39, %v2646_v35 }
 0x2c3   :  { %v2650_v42 = vmul.f32 0.5, %v2649_v61 }
 0x2c4   :  { %v2634_v45 = vadd.f32 1e-06, %v2629_v11  ;;  %vm2707_vm4 = vcmp.gt.f32.partialorder %v2697_v63, 0.0  ;;  %v2717_v21 = vmul.f32 0.2, %v2697_v63  ;;  %vm2708_vm5 = vcmp.gt.f32.partialorder %v2698_v26, 0.0 }
 0x2c5   :  { %v2651_v60 = vsub.f32 1.5, %v2650_v42  ;;  %v2506_v62 = vpop.xlane.xlu0 %2505  ;;  %v2477_v14 = vpop.xlane.xlu2 %2476  ;;  %v2718_v53 = vmul.f32 0.2, %v2698_v26 }
 0x2c6   :  { %3991 = vrsqrt.f32 %v2634_v45  ;;  %v2615_v43 = vadd.f32 %v2506_v62, %v2472_v20  ;;  %v2621_v41 = vmul.f32 %v2600_v57, %v2477_v14  ;;  %v5929_v2 = vsel %vm2707_vm4, %v2697_v63, %v2717_v21 }
 0x2c7   :  { %v2652_v15 = vmul.f32 %v3990_v9, %v2651_v60  ;;  %v5931_v25 = vsel %vm2708_vm5, %v2698_v26, %v2718_v53  ;;  %vm2663_vm9 = vweird.f32 %v2634_v45  ;;  %v2691_v62 = vsub.f32 %v5832_v17, %v5905_v54 }
 0x2c8   :  { %v2620_v44 = vmul.f32 %v2615_v43, %v5894_v10  ;;  %v2631_v52 = vsub.f32 %v2621_v41, %v2626_v3  ;;  %6313 = vst [vmem:[#allocation5_spill] sm:$0xff] %v5931_v25  ;;  %v2737_v55 = vpack.c.bf16 %v5931_v25, %v5929_v2  ;;  %v2692_v14 = vsub.f32 %v5834_v1, %v5905_v54 }
 0x2c9   :  { %v2656_v20 = vsel %vm2655_vm3, %v3990_v9, %v2652_v15  ;;  %v2693_v17 = vsub.f32 %v5838_v18, %v5915_v13  ;;  %v2694_v1 = vsub.f32 %v5840_v33, %v5915_v13 }
 0x2ca   :  { %v2630_v27 = vsub.f32 %v2620_v44, %v2625_v19  ;;  %v5926_v8 = vadd.f32 1e-06, %v2631_v52  ;;  %v2699_v4 = vmul.f32 %v2689_v24, %v2656_v20  ;;  %v2700_v51 = vmul.f32 %v2690_v59, %v2656_v20 }
 0x2cb   :  { %v2747_v56 = vunpack.c.l.b16 %v2737_v55  ;;  %v2781_v61 = vunpack.c.h.b16 %v2737_v55 }
 0x2cc   :  { %v3992_v28 = vpop.eup %3991  ;;  %v2635_v6 = vadd.f32 1e-06, %v2630_v27  ;;  %3993 = vrsqrt.f32 %v5926_v8  ;;  %vm2709_vm6 = vcmp.gt.f32.partialorder %v2699_v4, 0.0  ;;  %vm2710_vm7 = vcmp.gt.f32.partialorder %v2700_v51, 0.0 }
 0x2cd   :  { %v2658_v5 = vmul.f32 %v3992_v28, %v2634_v45  ;;  %v2719_v30 = vmul.f32 0.2, %v2699_v4  ;;  %v2720_v22 = vmul.f32 0.2, %v2700_v51  ;;  %vm2664_vm8 = vweird.f32 %v3992_v28 }
 0x2ce   :  { %3995 = vrsqrt.f32 %v2635_v6  ;;  %vm2665_vm10 = vmor %vm2663_vm9, %vm2664_vm8  ;;  %vm2673_vm12 = vweird.f32 %v2635_v6  ;;  %vm2683_vm3 = vweird.f32 %v5926_v8 }
 0x2cf   :  { %v2659_v10 = vmul.f32 %v3992_v28, %v2658_v5  ;;  %v5935_v9 = vsel %vm2709_vm6, %v2699_v4, %v2719_v30  ;;  %v5937_v46 = vsel %vm2710_vm7, %v2700_v51, %v2720_v22 }
 0x2d0   :  { %v2738_v37 = vpack.c.bf16 %v5937_v46, %v5935_v9 }
 0x2d1   :  { %v2660_v31 = vmul.f32 0.5, %v2659_v10 }
 0x2d2   :  { %v3994_v47 = vpop.eup %3993  ;;  %v2748_v58 = vunpack.c.l.b16 %v2738_v37  ;;  %v2782_v35 = vunpack.c.h.b16 %v2738_v37 }
 0x2d3   :  { %v2661_v57 = vsub.f32 1.5, %v2660_v31  ;;  %v2678_v34 = vmul.f32 %v3994_v47, %v5926_v8  ;;  %vm2684_vm2 = vweird.f32 %v3994_v47 }
 0x2d4   :  { %v3996_v50 = vpop.eup %3995  ;;  %v2752_v42 = vpack.c.b16 %v2748_v58, %v2747_v56  ;;  %v2786_v60 = vpack.c.b16 %v2782_v35, %v2781_v61  ;;  %vm2685_vm6 = vmor %vm2683_vm3, %vm2684_vm2 }
 0x2d5   :  { %v2662_v11 = vmul.f32 %v3992_v28, %v2661_v57  ;;  %v2668_v0 = vmul.f32 %v3996_v50, %v2635_v6  ;;  %v2679_v39 = vmul.f32 %v3994_v47, %v2678_v34  ;;  %vm2674_vm11 = vweird.f32 %v3996_v50 }
 0x2d6   :  { %2766 = vmatmul.bf16.vlgmr.msrb.gmra.mxu2 %v2752_v42  ;;  %2800 = vmatmul.bf16.vlgmr.msrb.gmra.mxu3 %v2786_v60  ;;  %vm2675_vm13 = vmor %vm2673_vm12, %vm2674_vm11  ;;  %v2696_v6 = vsub.f32 %v5852_v48, %v5910_v29 }
 0x2d7   :  { %v2669_v63 = vmul.f32 %v3996_v50, %v2668_v0  ;;  %v2666_v26 = vsel %vm2665_vm10, %v3992_v28, %v2662_v11  ;;  %v2680_v43 = vmul.f32 0.5, %v2679_v39  ;;  %v2695_v28 = vsub.f32 %v5850_v36, %v5910_v29 }
 0x2d8   :  { %v2701_v41 = vmul.f32 %v2691_v62, %v2666_v26  ;;  %v2702_v24 = vmul.f32 %v2692_v14, %v2666_v26 }
 0x2d9   :  { %v2670_v3 = vmul.f32 0.5, %v2669_v63  ;;  %v2681_v15 = vsub.f32 1.5, %v2680_v43 }
 0x2da   :  { %v2721_v19 = vmul.f32 0.2, %v2701_v41  ;;  %v2722_v44 = vmul.f32 0.2, %v2702_v24  ;;  %vm2711_vm14 = vcmp.gt.f32.partialorder %v2701_v41, 0.0  ;;  %vm2712_vm15 = vcmp.gt.f32.partialorder %v2702_v24, 0.0 }
 0x2db   :  { %v2671_v45 = vsub.f32 1.5, %v2670_v3  ;;  %v2682_v52 = vmul.f32 %v3994_v47, %v2681_v15  ;;  %v2823_v3 = vld [vmem:[%s6309_s3] sm:$0xff]  ;;  %v2824_v15 = vld [vmem:[%s6309_s3 + $0x8] sm:$0xff] }
 0x2dc   :  { %v5950_v53 = vsel %vm2711_vm14, %v2701_v41, %v2721_v19  ;;  %v5952_v27 = vsel %vm2712_vm15, %v2702_v24, %v2722_v44  ;;  %v2826_v41 = vld [vmem:[%s6309_s3 + $0x18] sm:$0xff] }
 0x2dd   :  { %v2672_v59 = vmul.f32 %v3996_v50, %v2671_v45  ;;  %v2739_v13 = vpack.c.bf16 %v5952_v27, %v5950_v53  ;;  %v2686_v51 = vsel %vm2685_vm6, %v3994_v47, %v2682_v52 }
 0x2de   :  { %v2705_v10 = vmul.f32 %v2695_v28, %v2686_v51  ;;  %v2706_v30 = vmul.f32 %v2696_v6, %v2686_v51 }
 0x2df   :  { %v2676_v54 = vsel %vm2675_vm13, %v3996_v50, %v2672_v59  ;;  %v2749_v22 = vunpack.c.l.b16 %v2739_v13  ;;  %v2783_v31 = vunpack.c.h.b16 %v2739_v13  ;;  %v2825_v59 = vld [vmem:[%s6309_s3 + $0x10] sm:$0xff] }
 0x2e0   :  { %v2703_v20 = vmul.f32 %v2693_v17, %v2676_v54  ;;  %v2704_v21 = vmul.f32 %v2694_v1, %v2676_v54  ;;  %v2725_v47 = vmul.f32 0.2, %v2705_v10  ;;  %v2726_v50 = vmul.f32 0.2, %v2706_v30 }
 0x2e1   :  { %vm2715_vm7 = vcmp.gt.f32.partialorder %v2705_v10, 0.0  ;;  %vm2716_vm8 = vcmp.gt.f32.partialorder %v2706_v30, 0.0 }
 0x2e2   :  { %vm2713_vm4 = vcmp.gt.f32.partialorder %v2703_v20, 0.0  ;;  %vm2714_vm5 = vcmp.gt.f32.partialorder %v2704_v21, 0.0  ;;  %v2723_v18 = vmul.f32 0.2, %v2703_v20  ;;  %v2724_v4 = vmul.f32 0.2, %v2704_v21 }
 0x2e3   :  { %v2735_v36 = vsel %vm2715_vm7, %v2705_v10, %v2725_v47  ;;  %v2736_v48 = vsel %vm2716_vm8, %v2706_v30, %v2726_v50  ;;  %v2943_v10 = vmul.f32 %v5756_v23, %v5756_v23 }
 0x2e4   :  { %v5955_v33 = vsel %vm2713_vm4, %v2703_v20, %v2723_v18  ;;  %v5963_v5 = vsel %vm2714_vm5, %v2704_v21, %v2724_v4  ;;  %v2741_v29 = vpack.c.bf16 %v2736_v48, %v2735_v36 }
 0x2e5   :  { %v2740_v8 = vpack.c.bf16 %v5963_v5, %v5955_v33 }
 0x2e6   :  { %v2751_v56 = vunpack.c.l.b16 %v2741_v29  ;;  %v2785_v58 = vunpack.c.h.b16 %v2741_v29  ;;  %v4053_v29 = vmov 256.0  }
 0x2e7   :  { %v2750_v55 = vunpack.c.l.b16 %v2740_v8  ;;  %v2784_v37 = vunpack.c.h.b16 %v2740_v8  ;;  %v2942_v8 = vmul.f32 %v5754_v32, %v5754_v32  ;;  %3997 = vrcp.f32 %v4053_v29 }
 0x2e8   :  { %v2754_v61 = vpack.c.b16 %v2751_v56, %v2751_v56  ;;  %v2788_v35 = vpack.c.b16 %v2785_v58, %v2785_v58  ;;  %v2911_v58 = vpop.xlane.xlu1 %2910 }
 0x2e9   :  { %v2753_v57 = vpack.c.b16 %v2750_v55, %v2749_v22  ;;  %v2787_v34 = vpack.c.b16 %v2784_v37, %v2783_v31  ;;  %v2958_v31 = vadd.f32 %v2943_v10, %v2942_v8 }
 0x2eb   :  { %2771 = vmatmul.bf16.gmra.mxu2 %v2753_v57  ;;  %2805 = vmatmul.bf16.gmra.mxu3 %v2787_v34 }
 0x2ed   :  { %v3998_v56 = vpop.eup %3997 }
 0x2fb   :  { %2776 = vmatmul.bf16.gmra.mxu2 %v2754_v61  ;;  %2810 = vmatmul.bf16.gmra.mxu3 %v2788_v35  ;;  %v2928_v61 = vmul.f32 256.0, %v3998_v56 }
 0x2fd   :  { %v2929_v35 = vsub.f32 1.0, %v2928_v61 }
 0x359   :  { %v5967_v11 = vpop.f32.mrf.mxu2  ;;  %v5969_v0 = vpop.f32.mrf.mxu3 }
 0x35a   :  { %6314 = vst [vmem:[#allocation6_spill] sm:$0xff] %v5969_v0 }
 0x361   :  { %v5971_v39 = vpop.f32.mrf.mxu2  ;;  %v5973_v42 = vpop.f32.mrf.mxu3 }
 0x36e   :  { %v5975_v60 = vpop.f32.mrf.mxu2  ;;  %v5977_v62 = vpop.f32.mrf.mxu3 }
 0x376   :  { %v5979_v14 = vpop.f32.mrf.mxu2  ;;  %v5981_v63 = vpop.f32.mrf.mxu3 }
 0x37e   :  { %v2777_v26 = vpop.f32.mrf.mxu2  ;;  %v2811_v43 = vpop.f32.mrf.mxu3 }
 0x37f   :  { %3955 = vmatpush.msk.msrb.mxu0 %vm2319_vm0, %v2777_v26  ;;  %3973 = vmatpush.msk.msra.mxu2 %vm2319_vm0, %v2777_v26  ;;  %v2914_v26 = vpop.xlane.xlu0 %2913 }
 0x380   :  { %3960 = vmatpush.msk.msrb.mxu1 %vm2319_vm0, %v2811_v43  ;;  %3974 = vmatpush.msk.msra.mxu3 %vm2319_vm0, %v2811_v43  ;;  %v2930_v43 = vmul.f32 %v3998_v56, %v2929_v35  ;;  %vm2932_vm0 = vweird.f32 %v3998_v56 }
 0x381   :  { %3956 = vmatmul.msk.f32.vlgmr.msrb.gmra.mxu0 %vm2291_vm1, %v2823_v3  ;;  %3959 = vmatmul.msk.f32.vlgmr.msra.gmra.mxu2 %vm2291_vm1, %v2826_v41 }
 0x382   :  { %3961 = vmatmul.msk.f32.vlgmr.msrb.gmra.mxu1 %vm2291_vm1, %v2823_v3  ;;  %3964 = vmatmul.msk.f32.vlgmr.msra.gmra.mxu3 %vm2291_vm1, %v2826_v41  ;;  %v2908_v3 = vpop.xlane.xlu1 %2907  ;;  %v2931_v41 = vadd.f32 %v3998_v56, %v2930_v43 }
 0x386   :  { %v2779_v24 = vpop.f32.mrf.mxu2  ;;  %v2813_v45 = vpop.f32.mrf.mxu3 }
 0x387   :  { %v2969_v24 = vpop.xlane.xlu0 %2968  ;;  %v6051_v45 = vsel %vm2932_vm0, %v3998_v56, %v2931_v41 }
 0x389   :  { %3957 = vmatmul.msk.f32.gmra.mxu0 %vm2291_vm1, %v2824_v15 }
 0x38a   :  { %3962 = vmatmul.msk.f32.gmra.mxu1 %vm2291_vm1, %v2824_v15  ;;  %v6054_v15 = vmul.f32 %v6051_v45, %v2914_v26 }
 0x391   :  { %3958 = vmatmul.msk.f32.gmra.mxu0 %vm2291_vm1, %v2825_v59 }
 0x392   :  { %3963 = vmatmul.msk.f32.gmra.mxu1 %vm2291_vm1, %v2825_v59  ;;  %v2963_v59 = vpop.xlane.xlu1 %2962 }
 0x3fe   :  { %v6007_v19 = vpop.f32.mrf.mxu0 }
 0x3ff   :  { %v6009_v44 = vpop.f32.mrf.mxu1  ;;  %v2950_v28 = vmul.f32 %v6007_v19, %v6007_v19 }
 0x400   :  { %v2915_v17 = vadd.f32 %v6009_v44, %v6007_v19  ;;  %v2951_v6 = vmul.f32 %v6009_v44, %v6009_v44 }
 0x402   :  { %2916 = vadd.xlane.f32.xlu0 %v2915_v17  ;;  %v2970_v55 = vadd.f32 %v2951_v6, %v2950_v28  ;;  %v2985_v17 = vmul.f32 %v2969_v24, %v6051_v45  ;;  %v2966_v28 = vpop.xlane.xlu0 %2965  ;;  %v6066_v6 = vmul.f32 %v6051_v45, %v2911_v58 }
 0x404   :  { %v6013_v1 = vpop.f32.mrf.mxu2 }
 0x405   :  { %v2956_v54 = vmul.f32 %v6013_v1, %v6013_v1  ;;  %v6017_v52 = vpop.f32.mrf.mxu3 }
 0x406   :  { %v2957_v20 = vmul.f32 %v6017_v52, %v6017_v52  ;;  %v6021_v21 = vpop.f32.mrf.mxu0  ;;  %v2924_v18 = vadd.f32 %v6017_v52, %v6013_v1 }
 0x407   :  { %v6025_v4 = vpop.f32.mrf.mxu1  ;;  %v2952_v50 = vmul.f32 %v6021_v21, %v6021_v21 }
 0x408   :  { %2925 = vadd.xlane.f32.xlu2 %v2924_v18  ;;  %v2918_v13 = vadd.f32 %v6025_v4, %v6021_v21  ;;  %v2979_v51 = vadd.f32 %v2957_v20, %v2956_v54  ;;  %v2953_v36 = vmul.f32 %v6025_v4, %v6025_v4  ;;  %v6058_v54 = vmul.f32 %v6051_v45, %v2908_v3 }
 0x409   :  { %v2993_v20 = vmul.f32 %v6054_v15, %v6054_v15  ;;  %v2983_v18 = vmul.f32 %v2963_v59, %v6051_v45 }
 0x40a   :  { %2919 = vadd.xlane.f32.xlu0 %v2918_v13  ;;  %2980 = vadd.xlane.f32.xlu1 %v2979_v51  ;;  %v2973_v48 = vadd.f32 %v2953_v36, %v2952_v50  ;;  %v2991_v51 = vmul.f32 %v6058_v54, %v6058_v54 }
 0x40b   :  { %v3001_v13 = vsub.f32 %v2985_v17, %v2993_v20 }
 0x40c   :  { %v2999_v8 = vsub.f32 %v2983_v18, %v2991_v51 }
 0x40d   :  { %v3009_v10 = vadd.f32 1e-06, %v3001_v13 }
 0x40e   :  { %v6037_v30 = vpop.f32.mrf.mxu0 }
 0x40f   :  { %v6039_v22 = vpop.f32.mrf.mxu1  ;;  %v2954_v57 = vmul.f32 %v6037_v30, %v6037_v30  ;;  %3999 = vrsqrt.f32 %v3009_v10  ;;  %vm3050_vm9 = vweird.f32 %v3009_v10 }
 0x410   :  { %v2921_v37 = vadd.f32 %v6039_v22, %v6037_v30  ;;  %v2955_v34 = vmul.f32 %v6039_v22, %v6039_v22 }
 0x412   :  { %2971 = vadd.xlane.f32.xlu0 %v2970_v55  ;;  %2959 = vadd.xlane.f32.xlu1 %v2958_v31  ;;  %v2976_v47 = vadd.f32 %v2955_v34, %v2954_v57  ;;  %v2984_v55 = vmul.f32 %v2966_v28, %v6051_v45  ;;  %v3007_v31 = vadd.f32 1e-06, %v2999_v8  ;;  %v2905_v34 = vpop.xlane.xlu2 %2904 }
 0x413   :  { %2922 = vadd.xlane.f32.xlu2 %v2921_v37  ;;  %v2992_v37 = vmul.f32 %v6066_v6, %v6066_v6  ;;  %v6087_v18 = vmul.f32 %v6051_v45, %v2905_v34 }
 0x414   :  { %4001 = vrsqrt.f32 %v3007_v31  ;;  %vm3030_vm12 = vweird.f32 %v3007_v31 }
 0x415   :  { %v3000_v57 = vsub.f32 %v2984_v55, %v2992_v37  ;;  %v4000_v50 = vpop.eup %3999 }
 0x416   :  { %v3045_v29 = vmul.f32 %v4000_v50, %v3009_v10  ;;  %vm3051_vm1 = vweird.f32 %v4000_v50  ;;  %v3101_v10 = vsub.f32 %v5810_v12, %v6054_v15  ;;  %v3099_v12 = vsub.f32 %v5806_v7, %v6066_v6 }
 0x417   :  { %vm3052_vm11 = vmor %vm3050_vm9, %vm3051_vm1 }
 0x418   :  { %v3046_v58 = vmul.f32 %v4000_v50, %v3045_v29 }
 0x41a   :  { %v3047_v59 = vmul.f32 0.5, %v3046_v58 }
 0x41b   :  { %2977 = vadd.xlane.f32.xlu2 %v2976_v47  ;;  %v6071_v47 = vadd.f32 1e-06, %v3000_v57 }
 0x41c   :  { %v3048_v8 = vsub.f32 1.5, %v3047_v59 }
 0x41d   :  { %4003 = vrsqrt.f32 %v6071_v47  ;;  %vm3040_vm15 = vweird.f32 %v6071_v47 }
 0x423   :  { %2974 = vadd.xlane.f32.xlu2 %v2973_v48  ;;  %v4002_v48 = vpop.eup %4001 }
 0x424   :  { %v3025_v56 = vmul.f32 %v4002_v48, %v3007_v31  ;;  %v6077_v26 = vpop.eup %4003  ;;  %vm3031_vm10 = vweird.f32 %v4002_v48  ;;  %v3098_v31 = vsub.f32 %v5804_v38, %v6066_v6 }
 0x425   :  { %v3035_v20 = vmul.f32 %v6077_v26, %v6071_v47  ;;  %vm3032_vm13 = vmor %vm3030_vm12, %vm3031_vm10  ;;  %vm3041_vm14 = vweird.f32 %v6077_v26 }
 0x426   :  { %v3026_v41 = vmul.f32 %v4002_v48, %v3025_v56  ;;  %v2990_v56 = vmul.f32 %v6087_v18, %v6087_v18  ;;  %vm3042_vm4 = vmor %vm3040_vm15, %vm3041_vm14 }
 0x427   :  { %v3036_v37 = vmul.f32 %v6077_v26, %v3035_v20 }
 0x428   :  { %v3027_v51 = vmul.f32 0.5, %v3026_v41  ;;  %v3049_v41 = vmul.f32 %v4000_v50, %v3048_v8  ;;  %v3100_v8 = vsub.f32 %v5808_v16, %v6054_v15  ;;  %v3096_v16 = vsub.f32 %v5786_v40, %v6058_v54 }
 0x42a   :  { %v3028_v58 = vsub.f32 1.5, %v3027_v51  ;;  %v3053_v25 = vsel %vm3052_vm11, %v4000_v50, %v3049_v41 }
 0x42c   :  { %v3029_v20 = vmul.f32 %v4002_v48, %v3028_v58 }
 0x42e   :  { %v6118_v50 = vsel %vm3032_vm13, %v4002_v48, %v3029_v20  ;;  %v3097_v48 = vsub.f32 %v5788_v49, %v6058_v54 }
 0x42f   :  { %v6133_v40 = vmul.f32 %v3096_v16, %v6118_v50 }
 0x431   :  { %vm3128_vm13 = vcmp.gt.f32.partialorder %v6133_v40, 0.0 }
 0x475   :  { %v2917_v36 = vpop.xlane.xlu0 %2916 }
 0x476   :  { %v6090_v28 = vmul.f32 %v6051_v45, %v2917_v36 }
 0x478   :  { %v2994_v34 = vmul.f32 %v6090_v28, %v6090_v28 }
 0x47b   :  { %v2926_v61 = vpop.xlane.xlu2 %2925 }
 0x47c   :  { %v6075_v35 = vmul.f32 %v6051_v45, %v2926_v61 }
 0x47d   :  { %v6079_v43 = vpop.xlane.xlu0 %2919  ;;  %v2981_v3 = vpop.xlane.xlu1 %2980 }
 0x47e   :  { %v2989_v24 = vmul.f32 %v2981_v3, %v6051_v45  ;;  %v2997_v17 = vmul.f32 %v6075_v35, %v6075_v35  ;;  %v6141_v6 = vmul.f32 %v6051_v45, %v6079_v43  ;;  %v3109_v43 = vsub.f32 %v6017_v52, %v6075_v35 }
 0x480   :  { %v3005_v13 = vsub.f32 %v2989_v24, %v2997_v17  ;;  %v3037_v24 = vmul.f32 0.5, %v3036_v37 }
 0x482   :  { %v6092_v55 = vadd.f32 1e-06, %v3005_v13  ;;  %v3038_v37 = vsub.f32 1.5, %v3037_v24 }
 0x484   :  { %4005 = vrsqrt.f32 %v6092_v55  ;;  %v3039_v15 = vmul.f32 %v6077_v26, %v3038_v37  ;;  %vm3090_vm6 = vweird.f32 %v6092_v55 }
 0x485   :  { %v2972_v57 = vpop.xlane.xlu0 %2971  ;;  %v2960_v29 = vpop.xlane.xlu1 %2959 }
 0x486   :  { %v2986_v61 = vmul.f32 %v2972_v57, %v6051_v45  ;;  %v2982_v36 = vmul.f32 %v2960_v29, %v6051_v45  ;;  %v2923_v3 = vpop.xlane.xlu2 %2922  ;;  %v3043_v47 = vsel %vm3042_vm4, %v6077_v26, %v3039_v15  ;;  %v2821_v26 = vadd.f32 %v5979_v14, %v5955_v33 }
 0x487   :  { %v6107_v57 = vmul.f32 %v6051_v45, %v2923_v3 }
 0x488   :  { %v3002_v59 = vsub.f32 %v2986_v61, %v2994_v34  ;;  %v2998_v17 = vsub.f32 %v2982_v36, %v2990_v56  ;;  %v3116_v56 = vmul.f32 %v3100_v8, %v3053_v25  ;;  %v3117_v61 = vmul.f32 %v3101_v10, %v3053_v25 }
 0x489   :  { %v2996_v36 = vmul.f32 %v6107_v57, %v6107_v57  ;;  %v3108_v8 = vsub.f32 %v6013_v1, %v6075_v35  ;;  %v2995_v1 = vmul.f32 %v6141_v6, %v6141_v6  ;;  %v3114_v35 = vmul.f32 %v3098_v31, %v3043_v47 }
 0x48a   :  { %v6102_v13 = vadd.f32 1e-06, %v3002_v59  ;;  %v6104_v51 = vadd.f32 1e-06, %v2998_v17  ;;  %v4006_v0 = vpop.eup %4005  ;;  %vm3132_vm2 = vcmp.gt.f32.partialorder %v3116_v56, 0.0  ;;  %vm3133_vm5 = vcmp.gt.f32.partialorder %v3117_v61, 0.0 }
 0x48b   :  { %v3085_v29 = vmul.f32 %v4006_v0, %v6092_v55  ;;  %v3148_v24 = vmul.f32 0.2, %v3116_v56  ;;  %vm3091_vm3 = vweird.f32 %v4006_v0  ;;  %vm3130_vm1 = vcmp.gt.f32.partialorder %v3114_v35, 0.0 }
 0x48c   :  { %4007 = vrsqrt.f32 %v6102_v13  ;;  %vm3092_vm7 = vmor %vm3090_vm6, %vm3091_vm3  ;;  %vm3020_vm12 = vweird.f32 %v6104_v51  ;;  %vm3060_vm3 = vweird.f32 %v6102_v13 }
 0x48d   :  { %4009 = vrsqrt.f32 %v6104_v51  ;;  %v3086_v58 = vmul.f32 %v4006_v0, %v3085_v29  ;;  %v3149_v29 = vmul.f32 0.2, %v3117_v61 }
 0x48e   :  { %v2978_v34 = vpop.xlane.xlu2 %2977 }
 0x48f   :  { %v2988_v3 = vmul.f32 %v2978_v34, %v6051_v45  ;;  %v3087_v38 = vmul.f32 0.5, %v3086_v58 }
 0x491   :  { %v3004_v25 = vsub.f32 %v2988_v3, %v2996_v36  ;;  %v3088_v59 = vsub.f32 1.5, %v3087_v38  ;;  %v3164_v36 = vsel %vm3132_vm2, %v3116_v56, %v3148_v24  ;;  %v2822_v3 = vadd.f32 %v5981_v63, %v5963_v5 }
 0x492   :  { %v6135_v41 = vpop.eup %4007  ;;  %v3115_v38 = vmul.f32 %v3099_v12, %v3043_v47  ;;  %v6170_v56 = vmul.f32 %v3097_v48, %v6118_v50  ;;  %v3094_v12 = vsub.f32 %v5754_v32, %v6087_v18  ;;  %v3095_v48 = vsub.f32 %v5756_v23, %v6087_v18 }
 0x493   :  { %v6137_v7 = vpop.eup %4009  ;;  %v3055_v49 = vmul.f32 %v6135_v41, %v6102_v13  ;;  %v6145_v54 = vadd.f32 1e-06, %v3004_v25  ;;  %v3089_v17 = vmul.f32 %v4006_v0, %v3088_v59  ;;  %v3180_v25 = vadd.f32 %v3164_v36, %v2821_v26 }
 0x494   :  { %v3015_v20 = vmul.f32 %v6137_v7, %v6104_v51  ;;  %vm3131_vm9 = vcmp.gt.f32.partialorder %v3115_v38, 0.0  ;;  %vm3021_vm10 = vweird.f32 %v6137_v7  ;;  %v3144_v32 = vmul.f32 0.2, %v6133_v40 }
 0x495   :  { %v3056_v37 = vmul.f32 %v6135_v41, %v3055_v49  ;;  %4011 = vrsqrt.f32 %v6145_v54  ;;  %v3093_v10 = vsel %vm3092_vm7, %v4006_v0, %v3089_v17  ;;  %v3165_v17 = vsel %vm3133_vm5, %v3117_v61, %v3149_v29  ;;  %vm3022_vm15 = vmor %vm3020_vm12, %vm3021_vm10 }
 0x496   :  { %v3016_v55 = vmul.f32 %v6137_v7, %v3015_v20  ;;  %v2975_v58 = vpop.xlane.xlu2 %2974  ;;  %v3124_v34 = vmul.f32 %v3108_v8, %v3093_v10  ;;  %v3125_v16 = vmul.f32 %v3109_v43, %v3093_v10  ;;  %v3181_v5 = vadd.f32 %v3165_v17, %v2822_v3 }
 0x497   :  { %v2987_v52 = vmul.f32 %v2975_v58, %v6051_v45  ;;  %v3057_v33 = vmul.f32 0.5, %v3056_v37  ;;  %v3146_v37 = vmul.f32 0.2, %v3114_v35  ;;  %v3147_v61 = vmul.f32 0.2, %v3115_v38 }
 0x498   :  { %v3017_v15 = vmul.f32 0.5, %v3016_v55  ;;  %vm3140_vm8 = vcmp.gt.f32.partialorder %v3124_v34, 0.0  ;;  %v3156_v0 = vmul.f32 0.2, %v3124_v34  ;;  %vm3141_vm0 = vcmp.gt.f32.partialorder %v3125_v16, 0.0 }
 0x499   :  { %v3003_v14 = vsub.f32 %v2987_v52, %v2995_v1  ;;  %v3157_v59 = vmul.f32 0.2, %v3125_v16  ;;  %v3058_v47 = vsub.f32 1.5, %v3057_v33  ;;  %v3145_v10 = vmul.f32 0.2, %v6170_v56 }
 0x49a   :  { %v3018_v20 = vsub.f32 1.5, %v3017_v15  ;;  %v3172_v31 = vsel %vm3140_vm8, %v3124_v34, %v3156_v0  ;;  %v2819_v58 = vadd.f32 %v5975_v60, %v5950_v53  ;;  %vm3061_vm11 = vweird.f32 %v6135_v41 }
 0x49b   :  { %v4012_v49 = vpop.eup %4011  ;;  %v6167_v8 = vadd.f32 1e-06, %v3003_v14  ;;  %v3188_v24 = vadd.f32 %v3180_v25, %v3172_v31  ;;  %v3173_v43 = vsel %vm3141_vm0, %v3125_v16, %v3157_v59  ;;  %v3059_v34 = vmul.f32 %v6135_v41, %v3058_v47  ;;  %vm3062_vm4 = vmor %vm3060_vm3, %vm3061_vm11  ;;  %v6316_v47 = vld [vmem:[#allocation6_spill] sm:$0xff] }
 0x49c   :  { %v3075_v63 = vmul.f32 %v4012_v49, %v6145_v54  ;;  %v3189_v29 = vadd.f32 %v3181_v5, %v3173_v43  ;;  %v3019_v50 = vmul.f32 %v6137_v7, %v3018_v20  ;;  %vm3129_vm14 = vcmp.gt.f32.partialorder %v6170_v56, 0.0 }
 0x49d   :  { %4013 = vrsqrt.f32 %v6167_v8  ;;  %3219 = vmatpush.msra.mxu0 %v3188_v24  ;;  %v3162_v23 = vsel %vm3130_vm1, %v3114_v35, %v3146_v37  ;;  %v3163_v18 = vsel %vm3131_vm9, %v3115_v38, %v3147_v61  ;;  %vm3081_vm2 = vweird.f32 %v4012_v49 }
 0x49e   :  { %v3076_v26 = vmul.f32 %v4012_v49, %v3075_v63  ;;  %3248 = vmatpush.msra.mxu1 %v3189_v29  ;;  %v2817_v52 = vadd.f32 %v5971_v39, %v5935_v9  ;;  %v2820_v53 = vadd.f32 %v5977_v62, %v5952_v27  ;;  %v3023_v60 = vsel %vm3022_vm15, %v6137_v7, %v3019_v50 }
 0x49f   :  { %v2818_v51 = vadd.f32 %v5973_v42, %v5937_v46  ;;  %vm3080_vm5 = vweird.f32 %v6145_v54  ;;  %v3178_v3 = vadd.f32 %v3162_v23, %v2819_v58  ;;  %v3106_v9 = vsub.f32 %v6037_v30, %v6107_v57 }
 0x4a0   :  { %v3077_v55 = vmul.f32 0.5, %v3076_v26  ;;  %v3107_v27 = vsub.f32 %v6039_v22, %v6107_v57  ;;  %vm3082_vm6 = vmor %vm3080_vm5, %vm3081_vm2  ;;  %v3063_v39 = vsel %vm3062_vm4, %v6135_v41, %v3059_v34  ;;  %v3102_v46 = vsub.f32 %v6007_v19, %v6090_v28 }
 0x4a1   :  { %v3110_v13 = vmul.f32 %v3094_v12, %v3023_v60  ;;  %v3179_v7 = vadd.f32 %v3163_v18, %v2820_v53  ;;  %v3111_v33 = vmul.f32 %v3095_v48, %v3023_v60  ;;  %v3103_v14 = vsub.f32 %v6009_v44, %v6090_v28  ;;  %v6315_v12 = vld [vmem:[#allocation5_spill] sm:$0xff]  ;;  %v3193_v53 = vld [vmem:[%s6310_s4 + $0x18] sm:$0xff] }
 0x4a2   :  { %v3078_v16 = vsub.f32 1.5, %v3077_v55  ;;  %vm3070_vm7 = vweird.f32 %v6167_v8  ;;  %v3118_v22 = vmul.f32 %v3102_v46, %v3063_v39  ;;  %v3160_v44 = vsel %vm3128_vm13, %v6133_v40, %v3144_v32 }
 0x4a3   :  { %v4014_v1 = vpop.eup %4013  ;;  %vm3126_vm9 = vcmp.gt.f32.partialorder %v3110_v13, 0.0  ;;  %v3119_v19 = vmul.f32 %v3103_v14, %v3063_v39  ;;  %v3142_v59 = vmul.f32 0.2, %v3110_v13  ;;  %vm3127_vm10 = vcmp.gt.f32.partialorder %v3111_v33, 0.0 }
 0x4a4   :  { %v3079_v35 = vmul.f32 %v4012_v49, %v3078_v16  ;;  %v3065_v36 = vmul.f32 %v4014_v1, %v6167_v8  ;;  %vm3071_vm1 = vweird.f32 %v4014_v1  ;;  %v3161_v28 = vsel %vm3129_vm14, %v6170_v56, %v3145_v10  ;;  %v3190_v16 = vld [vmem:[%s6310_s4] sm:$0xff] }
 0x4a5   :  { %v3104_v5 = vsub.f32 %v6021_v21, %v6141_v6  ;;  %v3105_v63 = vsub.f32 %v6025_v4, %v6141_v6  ;;  %vm3072_vm11 = vmor %vm3070_vm7, %vm3071_vm1  ;;  %v2815_v24 = vadd.f32 %v5967_v11, %v5929_v2  ;;  %v2816_v40 = vadd.f32 %v6316_v47, %v6315_v12 }
 0x4a6   :  { %v3066_v42 = vmul.f32 %v4014_v1, %v3065_v36  ;;  %v3083_v62 = vsel %vm3082_vm6, %v4012_v49, %v3079_v35  ;;  %v3143_v49 = vmul.f32 0.2, %v3111_v33  ;;  %v3158_v21 = vsel %vm3126_vm9, %v3110_v13, %v3142_v59 }
 0x4a7   :  { %v3122_v54 = vmul.f32 %v3106_v9, %v3083_v62  ;;  %v3123_v15 = vmul.f32 %v3107_v27, %v3083_v62  ;;  %v3176_v26 = vadd.f32 %v3160_v44, %v2817_v52  ;;  %v3177_v4 = vadd.f32 %v3161_v28, %v2818_v51  ;;  %v3192_v52 = vld [vmem:[%s6310_s4 + $0x10] sm:$0xff] }
 0x4a8   :  { %v3067_v30 = vmul.f32 0.5, %v3066_v42  ;;  %v3159_v61 = vsel %vm3127_vm10, %v3111_v33, %v3143_v49  ;;  %v3150_v6 = vmul.f32 0.2, %v3118_v22  ;;  %v3151_v29 = vmul.f32 0.2, %v3119_v19 }
 0x4a9   :  { %vm3138_vm8 = vcmp.gt.f32.partialorder %v3122_v54, 0.0  ;;  %v3154_v57 = vmul.f32 0.2, %v3122_v54  ;;  %vm3139_vm0 = vcmp.gt.f32.partialorder %v3123_v15, 0.0  ;;  %v3155_v41 = vmul.f32 0.2, %v3123_v15 }
 0x4aa   :  { %v3068_v0 = vsub.f32 1.5, %v3067_v30  ;;  %vm3134_vm14 = vcmp.gt.f32.partialorder %v3118_v22, 0.0  ;;  %v3174_v2 = vadd.f32 %v3158_v21, %v2815_v24  ;;  %vm3135_vm15 = vcmp.gt.f32.partialorder %v3119_v19, 0.0 }
 0x4ab   :  { %v3170_v38 = vsel %vm3138_vm8, %v3122_v54, %v3154_v57  ;;  %v3171_v25 = vsel %vm3139_vm0, %v3123_v15, %v3155_v41  ;;  %v3175_v11 = vadd.f32 %v3159_v61, %v2816_v40  ;;  %v3166_v58 = vsel %vm3134_vm14, %v3118_v22, %v3150_v6 }
 0x4ac   :  { %v3069_v17 = vmul.f32 %v4014_v1, %v3068_v0  ;;  %v3186_v20 = vadd.f32 %v3178_v3, %v3170_v38  ;;  %v3187_v31 = vadd.f32 %v3179_v7, %v3171_v25  ;;  %v3167_v34 = vsel %vm3135_vm15, %v3119_v19, %v3151_v29 }
 0x4ad   :  { %v3182_v23 = vadd.f32 %v3174_v2, %v3166_v58  ;;  %v3183_v18 = vadd.f32 %v3175_v11, %v3167_v34  ;;  %vm3194_vm2 = vcmask 261120  }
 0x4ae   :  { %3220 = vmatpush.msra.mxu0 %v3186_v20  ;;  %3249 = vmatpush.msra.mxu1 %v3187_v31  ;;  %v3073_v43 = vsel %vm3072_vm11, %v4014_v1, %v3069_v17  ;;  %v3191_v1 = vld [vmem:[%s6310_s4 + $0x8] sm:$0xff]  ;;  %s4054_s4 = smov [#allocation2]  }
 0x4af   :  { %v3120_v56 = vmul.f32 %v3104_v5, %v3073_v43  ;;  %v3121_v37 = vmul.f32 %v3105_v63, %v3073_v43  ;;  %s3409_s6 = sshll.u32 %s4054_s4, 4  ;;  %s3410_s6 = int_to_ptr.vmem [resolvable:$true] %s3409_s6 }
 0x4b1   :  { %vm3136_vm12 = vcmp.gt.f32.partialorder %v3120_v56, 0.0  ;;  %v3152_v8 = vmul.f32 0.2, %v3120_v56  ;;  %vm3137_vm13 = vcmp.gt.f32.partialorder %v3121_v37, 0.0  ;;  %v3153_v50 = vmul.f32 0.2, %v3121_v37 }
 0x4b3   :  { %v3168_v48 = vsel %vm3136_vm12, %v3120_v56, %v3152_v8  ;;  %v3169_v32 = vsel %vm3137_vm13, %v3121_v37, %v3153_v50 }
 0x4b4   :  { %v3184_v10 = vadd.f32 %v3176_v26, %v3168_v48  ;;  %v3185_v55 = vadd.f32 %v3177_v4, %v3169_v32 }
 0x4b6   :  { %3221 = vmatpush.msra.mxu0 %v3184_v10  ;;  %3250 = vmatpush.msra.mxu1 %v3185_v55 }
 0x4b8   :  { %3222 = vmatpush.msra.mxu0 %v3182_v23  ;;  %3251 = vmatpush.msra.mxu1 %v3183_v18 }
 0x4b9   :  { %3965 = vmatmul.msk.f32.vlgmr.msra.gmra.mxu0 %vm3194_vm2, %v3190_v16  ;;  %3969 = vmatmul.msk.f32.vlgmr.msra.gmra.mxu1 %vm3194_vm2, %v3190_v16 }
 0x4c1   :  { %3966 = vmatmul.msk.f32.gmra.mxu0 %vm3194_vm2, %v3191_v1  ;;  %3970 = vmatmul.msk.f32.gmra.mxu1 %vm3194_vm2, %v3191_v1 }
 0x4c9   :  { %3967 = vmatmul.msk.f32.gmra.mxu0 %vm3194_vm2, %v3192_v52  ;;  %3971 = vmatmul.msk.f32.gmra.mxu1 %vm3194_vm2, %v3192_v52 }
 0x4d1   :  { %3968 = vmatmul.msk.f32.gmra.mxu0 %vm3194_vm2, %v3193_v53  ;;  %3972 = vmatmul.msk.f32.gmra.mxu1 %vm3194_vm2, %v3193_v53 }
 0x536   :  { %v3224_v60 = vpop.f32.mrf.mxu0  ;;  %v3253_v51 = vpop.f32.mrf.mxu1 }
 0x537   :  { %v3265_v35 = vadd.f32 %v3253_v51, %v3224_v60  ;;  %v3281_v36 = vmul.f32 %v3224_v60, %v3224_v60  ;;  %v3282_v3 = vmul.f32 %v3253_v51, %v3253_v51 }
 0x539   :  { %3266 = vadd.xlane.f32.xlu1 %v3265_v35  ;;  %v3289_v9 = vadd.f32 %v3282_v3, %v3281_v36 }
 0x53b   :  { %3290 = vadd.xlane.f32.xlu2 %v3289_v9 }
 0x53e   :  { %v6241_v27 = vpop.f32.mrf.mxu0  ;;  %v6243_v39 = vpop.f32.mrf.mxu1 }
 0x53f   :  { %v3268_v46 = vadd.f32 %v6243_v39, %v6241_v27  ;;  %v3283_v7 = vmul.f32 %v6241_v27, %v6241_v27  ;;  %v3284_v54 = vmul.f32 %v6243_v39, %v6243_v39 }
 0x541   :  { %v3292_v22 = vadd.f32 %v3284_v54, %v3283_v7 }
 0x543   :  { %3269 = vadd.xlane.f32.xlu2 %v3268_v46 }
 0x546   :  { %v6247_v42 = vpop.f32.mrf.mxu0  ;;  %v6249_v62 = vpop.f32.mrf.mxu1 }
 0x547   :  { %v3271_v13 = vadd.f32 %v6249_v62, %v6247_v42  ;;  %v3285_v0 = vmul.f32 %v6247_v42, %v6247_v42  ;;  %v3286_v19 = vmul.f32 %v6249_v62, %v6249_v62 }
 0x549   :  { %3272 = vadd.xlane.f32.xlu0 %v3271_v13  ;;  %v3295_v38 = vadd.f32 %v3286_v19, %v3285_v0 }
 0x54e   :  { %v6257_v15 = vpop.f32.mrf.mxu0  ;;  %v6259_v33 = vpop.f32.mrf.mxu1 }
 0x54f   :  { %v3287_v14 = vmul.f32 %v6257_v15, %v6257_v15  ;;  %v3288_v30 = vmul.f32 %v6259_v33, %v6259_v33  ;;  %v3274_v57 = vadd.f32 %v6259_v33, %v6257_v15 }
 0x551   :  { %3293 = vadd.xlane.f32.xlu0 %v3292_v22  ;;  %3275 = vadd.xlane.f32.xlu1 %v3274_v57  ;;  %v3298_v41 = vadd.f32 %v3288_v30, %v3287_v14 }
 0x553   :  { %3299 = vadd.xlane.f32.xlu2 %v3298_v41 }
 0x559   :  { %3296 = vadd.xlane.f32.xlu1 %v3295_v38 }
 0x5ac   :  { %v3267_v25 = vpop.xlane.xlu1 %3266 }
 0x5ad   :  { %v3277_v59 = vmul.f32 %v3267_v25, %v6051_v45 }
 0x5ae   :  { %v3291_v49 = vpop.xlane.xlu2 %3290 }
 0x5af   :  { %v3301_v17 = vmul.f32 %v3291_v49, %v6051_v45  ;;  %v3305_v20 = vmul.f32 %v3277_v59, %v3277_v59  ;;  %v3357_v56 = vsub.f32 %v3224_v60, %v3277_v59  ;;  %v3358_v26 = vsub.f32 %v3253_v51, %v3277_v59 }
 0x5b1   :  { %v3309_v31 = vsub.f32 %v3301_v17, %v3305_v20 }
 0x5b3   :  { %v3313_v44 = vadd.f32 1e-06, %v3309_v31 }
 0x5b5   :  { %4015 = vrsqrt.f32 %v3313_v44  ;;  %vm3323_vm4 = vweird.f32 %v3313_v44 }
 0x5b6   :  { %v3270_v12 = vpop.xlane.xlu2 %3269 }
 0x5b7   :  { %v6274_v40 = vmul.f32 %v3270_v12, %v6051_v45 }
 0x5b9   :  { %v3306_v4 = vmul.f32 %v6274_v40, %v6274_v40  ;;  %v3360_v38 = vsub.f32 %v6243_v39, %v6274_v40 }
 0x5bb   :  { %v4016_v28 = vpop.eup %4015 }
 0x5bc   :  { %v3318_v5 = vmul.f32 %v4016_v28, %v3313_v44  ;;  %v3273_v63 = vpop.xlane.xlu0 %3272  ;;  %vm3324_vm3 = vweird.f32 %v4016_v28 }
 0x5bd   :  { %vm3325_vm5 = vmor %vm3323_vm4, %vm3324_vm3  ;;  %v6283_v32 = vmul.f32 %v3273_v63, %v6051_v45 }
 0x5be   :  { %v3319_v24 = vmul.f32 %v4016_v28, %v3318_v5 }
 0x5bf   :  { %v3307_v60 = vmul.f32 %v6283_v32, %v6283_v32 }
 0x5c0   :  { %v3320_v47 = vmul.f32 0.5, %v3319_v24 }
 0x5c2   :  { %v3321_v43 = vsub.f32 1.5, %v3320_v47 }
 0x5c4   :  { %v3322_v37 = vmul.f32 %v4016_v28, %v3321_v43  ;;  %v3294_v21 = vpop.xlane.xlu0 %3293  ;;  %v3276_v61 = vpop.xlane.xlu1 %3275 }
 0x5c5   :  { %v3302_v6 = vmul.f32 %v3294_v21, %v6051_v45  ;;  %v6280_v29 = vmul.f32 %v3276_v61, %v6051_v45 }
 0x5c6   :  { %v3326_v8 = vsel %vm3325_vm5, %v4016_v28, %v3322_v37  ;;  %v3300_v50 = vpop.xlane.xlu2 %3299 }
 0x5c7   :  { %v3365_v2 = vmul.f32 %v3357_v56, %v3326_v8  ;;  %v3366_v11 = vmul.f32 %v3358_v26, %v3326_v8  ;;  %v3310_v48 = vsub.f32 %v3302_v6, %v3306_v4  ;;  %v3304_v10 = vmul.f32 %v3300_v50, %v6051_v45 }
 0x5c8   :  { %v3308_v55 = vmul.f32 %v6280_v29, %v6280_v29  ;;  %v3363_v44 = vsub.f32 %v6257_v15, %v6280_v29  ;;  %v3364_v28 = vsub.f32 %v6259_v33, %v6280_v29  ;;  %v3361_v33 = vsub.f32 %v6247_v42, %v6283_v32 }
 0x5c9   :  { %vm3373_vm6 = vcmp.gt.f32.partialorder %v3365_v2, 0.0  ;;  %vm3374_vm7 = vcmp.gt.f32.partialorder %v3366_v11, 0.0  ;;  %v3381_v58 = vmul.f32 0.2, %v3365_v2  ;;  %v3382_v34 = vmul.f32 0.2, %v3366_v11 }
 0x5ca   :  { %v3314_v23 = vadd.f32 1e-06, %v3310_v48  ;;  %v3312_v18 = vsub.f32 %v3304_v10, %v3308_v55  ;;  %v3362_v56 = vsub.f32 %v6249_v62, %v6283_v32 }
 0x5cb   :  { %v3389_v16 = vsel %vm3373_vm6, %v3365_v2, %v3381_v58  ;;  %v3390_v1 = vsel %vm3374_vm7, %v3366_v11, %v3382_v34 }
 0x5cc   :  { %3397 = vst [vmem:[#allocation2] sm:$0xff] %v3389_v16  ;;  %4017 = vrsqrt.f32 %v3314_v23  ;;  %v3316_v52 = vadd.f32 1e-06, %v3312_v18  ;;  %v3297_v53 = vpop.xlane.xlu1 %3296  ;;  %vm3333_vm0 = vweird.f32 %v3314_v23 }
 0x5cd   :  { %3398 = vst [vmem:[#allocation2 + $0x8] sm:$0xff] %v3390_v1  ;;  %v3303_v51 = vmul.f32 %v3297_v53, %v6051_v45  ;;  %v3359_v45 = vsub.f32 %v6241_v27, %v6274_v40 }
 0x5ce   :  { %4019 = vrsqrt.f32 %v3316_v52  ;;  %vm3353_vm10 = vweird.f32 %v3316_v52 }
 0x5cf   :  { %v3311_v35 = vsub.f32 %v3303_v51, %v3307_v60 }
 0x5d1   :  { %v3315_v36 = vadd.f32 1e-06, %v3311_v35 }
 0x5d2   :  { %v4018_v3 = vpop.eup %4017 }
 0x5d3   :  { %v3328_v9 = vmul.f32 %v4018_v3, %v3314_v23  ;;  %4021 = vrsqrt.f32 %v3315_v36  ;;  %vm3334_vm8 = vweird.f32 %v4018_v3  ;;  %vm3343_vm15 = vweird.f32 %v3315_v36 }
 0x5d4   :  { %v4020_v46 = vpop.eup %4019  ;;  %vm3335_vm9 = vmor %vm3333_vm0, %vm3334_vm8 }
 0x5d5   :  { %v3329_v13 = vmul.f32 %v4018_v3, %v3328_v9  ;;  %v3348_v7 = vmul.f32 %v4020_v46, %v3316_v52  ;;  %vm3354_vm1 = vweird.f32 %v4020_v46 }
 0x5d6   :  { %vm3355_vm11 = vmor %vm3353_vm10, %vm3354_vm1 }
 0x5d7   :  { %v3330_v54 = vmul.f32 0.5, %v3329_v13  ;;  %v3349_v14 = vmul.f32 %v4020_v46, %v3348_v7 }
 0x5d9   :  { %v4022_v30 = vpop.eup %4021  ;;  %v3331_v22 = vsub.f32 1.5, %v3330_v54  ;;  %v3350_v57 = vmul.f32 0.5, %v3349_v14 }
 0x5da   :  { %v3338_v41 = vmul.f32 %v4022_v30, %v3315_v36  ;;  %vm3344_vm14 = vweird.f32 %v4022_v30 }
 0x5db   :  { %v3332_v0 = vmul.f32 %v4018_v3, %v3331_v22  ;;  %v3351_v19 = vsub.f32 1.5, %v3350_v57  ;;  %vm3345_vm4 = vmor %vm3343_vm15, %vm3344_vm14 }
 0x5dc   :  { %v3339_v25 = vmul.f32 %v4022_v30, %v3338_v41 }
 0x5dd   :  { %v3336_v59 = vsel %vm3335_vm9, %v4018_v3, %v3332_v0  ;;  %v3352_v49 = vmul.f32 %v4020_v46, %v3351_v19 }
 0x5de   :  { %v3367_v17 = vmul.f32 %v3359_v45, %v3336_v59  ;;  %v3368_v20 = vmul.f32 %v3360_v38, %v3336_v59  ;;  %v3340_v31 = vmul.f32 0.5, %v3339_v25 }
 0x5df   :  { %v3356_v5 = vsel %vm3355_vm11, %v4020_v46, %v3352_v49 }
 0x5e0   :  { %vm3375_vm12 = vcmp.gt.f32.partialorder %v3367_v17, 0.0  ;;  %vm3376_vm13 = vcmp.gt.f32.partialorder %v3368_v20, 0.0  ;;  %v3383_v27 = vmul.f32 0.2, %v3367_v17  ;;  %v3384_v39 = vmul.f32 0.2, %v3368_v20 }
 0x5e1   :  { %v3371_v63 = vmul.f32 %v3363_v44, %v3356_v5  ;;  %v3372_v24 = vmul.f32 %v3364_v28, %v3356_v5  ;;  %v3341_v12 = vsub.f32 1.5, %v3340_v31 }
 0x5e2   :  { %v3391_v47 = vsel %vm3375_vm12, %v3367_v17, %v3383_v27  ;;  %v3392_v40 = vsel %vm3376_vm13, %v3368_v20, %v3384_v39 }
 0x5e3   :  { %3399 = vst [vmem:[#allocation2 + $0x10] sm:$0xff] %v3391_v47  ;;  %vm3379_vm2 = vcmp.gt.f32.partialorder %v3371_v63, 0.0  ;;  %vm3380_vm3 = vcmp.gt.f32.partialorder %v3372_v24, 0.0  ;;  %v3387_v43 = vmul.f32 0.2, %v3371_v63  ;;  %v3342_v15 = vmul.f32 %v4022_v30, %v3341_v12 }
 0x5e4   :  { %3400 = vst [vmem:[#allocation2 + $0x18] sm:$0xff] %v3392_v40  ;;  %v3388_v37 = vmul.f32 0.2, %v3372_v24 }
 0x5e5   :  { %v3395_v21 = vsel %vm3379_vm2, %v3371_v63, %v3387_v43  ;;  %v3346_v61 = vsel %vm3345_vm4, %v4022_v30, %v3342_v15 }
 0x5e6   :  { %v3396_v26 = vsel %vm3380_vm3, %v3372_v24, %v3388_v37  ;;  %3403 = vst [vmem:[#allocation2 + $0x30] sm:$0xff] %v3395_v21  ;;  %v3369_v4 = vmul.f32 %v3361_v33, %v3346_v61  ;;  %v3370_v6 = vmul.f32 %v3362_v56, %v3346_v61 }
 0x5e7   :  { %3404 = vst [vmem:[#allocation2 + $0x38] sm:$0xff] %v3396_v26 }
 0x5e8   :  { %vm3377_vm5 = vcmp.gt.f32.partialorder %v3369_v4, 0.0  ;;  %vm3378_vm6 = vcmp.gt.f32.partialorder %v3370_v6, 0.0  ;;  %v3385_v42 = vmul.f32 0.2, %v3369_v4  ;;  %v3386_v62 = vmul.f32 0.2, %v3370_v6 }
 0x5ea   :  { %v3393_v29 = vsel %vm3377_vm5, %v3369_v4, %v3385_v42  ;;  %v3394_v8 = vsel %vm3378_vm6, %v3370_v6, %v3386_v62 }
 0x5eb   :  { %3401 = vst [vmem:[#allocation2 + $0x20] sm:$0xff] %v3393_v29 }
 0x5ec   :  { %3402 = vst [vmem:[#allocation2 + $0x28] sm:$0xff] %v3394_v8 }
 0x5ed   :  { %3417 = dma.vmem_to_hbm [thread:$0]  %s3410_s6, 1024, %s3412_s9, [#allocation3], %s4055_s10, %s4055_s10, %s4056_s11  }
 0x5ee   :  { %4047 = dma.done.wait [#allocation3], 1024  }
 0x5ef   :  { %4048 = vsyncadd [#allocation3], 4294966272 }
 0x5f0   :  { %3422 = vsyncpa [#allocation3], 1 }

</bundles_post_ra>
